<compile_context>
chip_gen: v7x
topology: tpu7x:2x2x1
jax: 0.10.0
libtpu: 0.0.40
codegen_flags: <defaults>
</compile_context>

<pallas_src>
import functools

import jax
import jax.numpy as jnp
from jax.experimental import pallas as pl
from jax.experimental.pallas import tpu as pltpu

D = 512             # cls_embedding_dim == atomic_embedding_dim
N_HEADS = 4
HEAD_DIM = D // N_HEADS
OUT_PAD = 128       # lane-dense classifier output width (sliced to n_out)
BN_EPS = 1e-5
MATMUL_DTYPE = jnp.bfloat16   # MXU operand dtype; accumulation is always f32


# -----------------------------------------------------------------------------
# Fused kernel: attention + mean-pool + (concat) MLP + classifier
# -----------------------------------------------------------------------------
def unimol_fused_kernel(cls_ref, x_ref,
                        w_in_ref, b_in_ref, w_out_ref, b_out_ref,
                        w1a_ref, w1b_ref, b1_ref, s1_ref, t1_ref,
                        w2_ref, b2_ref, s2_ref, t2_ref,
                        w3_ref, b3_ref, s3_ref, t3_ref,
                        wc_ref, bc_ref,
                        o_ref, *, exp_dtype):
    bt, S, _ = x_ref.shape

    # ---- packed QKV projection: bt*S rows in one MXU call -------------------
    # x is already bf16; the 1/sqrt(HEAD_DIM) query scale is folded into
    # W_in/b_in at init, so qkv can be cast to bf16 right after the bias add.
    x = x_ref[...].reshape(bt * S, D)
    qkv = (jnp.dot(x, w_in_ref[...], preferred_element_type=jnp.float32)
           + b_in_ref[...]).astype(MATMUL_DTYPE)            # (bt*S, 3D) bf16

    inv_s = 1.0 / jnp.float32(S)

    # ---- per-head attention; heads are lane-aligned 128-wide slices ---------
    # mean(attn_out) @ W_out == sum_h mean(P_h @ V_h) @ W_out[h*128:(h+1)*128],
    # so the sequence mean is taken BEFORE the output projection and head
    # outputs are accumulated without any lane-axis concatenate.
    # TODO(synk): for very large S (>~256) switch this static unroll to a
    # lax.fori_loop over heads (and/or tile S flash-style) so several
    # (bt,S,S) score temporaries cannot stay live at once.
    summary = jnp.zeros((bt, D), jnp.float32)
    for h in range(N_HEADS):                        # static loop over 4 heads
        lo = h * HEAD_DIM
        qh = qkv[:, lo:lo + HEAD_DIM].reshape(bt, S, HEAD_DIM)
        kh = qkv[:, D + lo:D + lo + HEAD_DIM].reshape(bt, S, HEAD_DIM)
        vh = qkv[:, 2 * D + lo:2 * D + lo + HEAD_DIM].reshape(bt, S, HEAD_DIM)

        # scores via batched contraction on the last dim (no explicit .T)
        s = jnp.einsum('bqd,bkd->bqk', qh, kh,
                       preferred_element_type=jnp.float32)      # (bt, S, S)
        s = s - jnp.max(s, axis=-1, keepdims=True)
        p = jnp.exp(s.astype(exp_dtype)).astype(jnp.float32)    # bf16 EUP on v6e/v7x
        p = p * (1.0 / jnp.sum(p, axis=-1, keepdims=True))      # exact softmax denom

        oh = jnp.einsum('bqk,bkd->bqd', p.astype(MATMUL_DTYPE), vh,
                        preferred_element_type=jnp.float32)     # (bt, S, 128)
        pooled_h = jnp.sum(oh, axis=1) * inv_s                  # (bt, 128)
        summary = summary + jnp.dot(
            pooled_h.astype(MATMUL_DTYPE),
            w_out_ref[lo:lo + HEAD_DIM, :],
            preferred_element_type=jnp.float32)
    summary = summary + b_out_ref[...]                          # (bt, D) f32

    # ---- MLP; concat([cls, summary]) @ W1 fused as two partial matmuls ------
    h1 = (jnp.dot(cls_ref[...], w1a_ref[...], preferred_element_type=jnp.float32)
          + jnp.dot(summary.astype(MATMUL_DTYPE), w1b_ref[...],
                    preferred_element_type=jnp.float32)
          + b1_ref[...])
    h1 = jnp.maximum(h1 * s1_ref[...] + t1_ref[...], 0.0)

    h2 = jnp.dot(h1.astype(MATMUL_DTYPE), w2_ref[...],
                 preferred_element_type=jnp.float32) + b2_ref[...]
    h2 = jnp.maximum(h2 * s2_ref[...] + t2_ref[...], 0.0)

    h3 = jnp.dot(h2.astype(MATMUL_DTYPE), w3_ref[...],
                 preferred_element_type=jnp.float32) + b3_ref[...]
    h3 = jnp.maximum(h3 * s3_ref[...] + t3_ref[...], 0.0)

    # lane-dense (bt, 128) classifier output, sliced to n_out in the wrapper
    o_ref[...] = jnp.dot(h3.astype(MATMUL_DTYPE), wc_ref[...],
                         preferred_element_type=jnp.float32) + bc_ref[...]


# -----------------------------------------------------------------------------
# Chip profile + tiling
# -----------------------------------------------------------------------------
def _round_up(x, m):
    return ((x + m - 1) // m) * m


def _tpu_profile():
    """Physical VMEM, bf16-EUP availability and megacore hint by device kind."""
    kind = ""
    try:
        kind = jax.devices()[0].device_kind.lower()
    except Exception:
        pass
    if "v6" in kind:                                   # v6e
        return {"vmem": 128 << 20, "bf16_exp": True, "two_tc": False}
    if "v5" in kind:                                   # v5e / v5p (no bf16 EUP on v5e)
        return {"vmem": 128 << 20, "bf16_exp": False, "two_tc": False}
    if "v7" in kind or "tpu7" in kind or "7x" in kind:  # v7x: 64 MiB VMEM, 2 TCs
        return {"vmem": 64 << 20, "bf16_exp": True, "two_tc": True}
    # unknown chip: conservative VMEM, exact-precision exp
    return {"vmem": 64 << 20, "bf16_exp": False, "two_tc": False}


def _choose_tiling(B, S, hidden_dim, profile):
    """Batch-tile size (rows per grid step) and scoped VMEM limit."""
    phys = profile["vmem"]
    base_limit = (96 << 20) if phys >= (128 << 20) else (48 << 20)

    # resident weight bytes (bf16, single-buffered) + small f32 biases/scales
    weight_bytes = 2 * (D * 3 * D + D * D + 2 * D * D + D * hidden_dim
                        + hidden_dim * hidden_dim + hidden_dim * OUT_PAD) + (64 << 10)

    # conservative per-batch-row VMEM cost of one grid step
    per_row = (2 * S * D * 2                 # x tile (bf16, double-buffered)
               + S * 3 * D * 6               # qkv: f32 matmul result + bf16 copy
               + 8 * S * S                   # per-head scores / probs
               + S * HEAD_DIM * 4            # per-head attention output
               + 2 * D * 2 + 2 * OUT_PAD * 4 # cls tile + out tile (db)
               + (2 * D + 2 * hidden_dim) * 4)  # MLP activations
    budget = int(base_limit * 0.70) - weight_bytes

    if B <= 8:
        bt = B                               # block == full array dim -> legal
    else:
        # target ~2048 attention rows (bt*S) per step, clamped by VMEM budget
        bt_rows = max(8, (2048 // max(S, 1)) // 8 * 8)
        bt_cap = max(8, (max(budget, 0) // max(per_row, 1)) // 8 * 8)
        bt = min(bt_rows, bt_cap, 512, _round_up(B, 8))
        if profile["two_tc"] and B >= 16:
            # guarantee >=2 grid steps so both v7x TensorCores get work
            bt = min(bt, _round_up(pl.cdiv(B, 2), 8))
        # prefer a tile that divides B (avoids the full-input pad copy)
        for cand in range(bt, max(7, bt // 2 - 1), -8):
            if B % cand == 0:
                bt = cand
                break

    est = weight_bytes + bt * per_row + (8 << 20)
    vmem_limit = int(min(max(base_limit, est), phys - (8 << 20)))
    return bt, vmem_limit


def _const_spec(arr):
    """Whole-array BlockSpec for a constant operand; single-buffered if possible."""
    nd = arr.ndim                            # bind eagerly (avoid late-binding bug)
    idx = lambda b, _nd=nd: (0,) * _nd
    if hasattr(pl, "Buffered"):
        try:
            return pl.BlockSpec(arr.shape, idx, pipeline_mode=pl.Buffered(1))
        except TypeError:
            pass
    return pl.BlockSpec(arr.shape, idx)


# -----------------------------------------------------------------------------
# Fused forward wrapper (one pallas_call for the whole hot path)
# -----------------------------------------------------------------------------
def unimol_fused_forward(params, cls_embeddings, atomic_embeddings):
    """cls: (B, 512), atomic: (B, S, 512) -> logits (B, n_out) f32."""
    B, S, _ = atomic_embeddings.shape
    n_out = params["wc_t"].shape[1]
    assert n_out <= OUT_PAD
    hidden_dim = params["w2_t"].shape[1]

    profile = _tpu_profile()
    exp_dtype = jnp.bfloat16 if profile["bf16_exp"] else jnp.float32
    bt, vmem_limit = _choose_tiling(B, S, hidden_dim, profile)

    # inputs are only ever MXU operands -> ship as bf16 (halves HBM read / VMEM)
    cls_embeddings = cls_embeddings.astype(MATMUL_DTYPE)
    atomic_embeddings = atomic_embeddings.astype(MATMUL_DTYPE)

    n_tiles = pl.cdiv(B, bt)
    b_pad = n_tiles * bt
    if b_pad != B:
        cls_embeddings = jnp.pad(cls_embeddings, ((0, b_pad - B), (0, 0)))
        atomic_embeddings = jnp.pad(atomic_embeddings,
                                    ((0, b_pad - B), (0, 0), (0, 0)))

    # lane-dense classifier output: pad (H, n_out) -> (H, 128)
    wc_pad = jnp.pad(params["wc_t"], ((0, 0), (0, OUT_PAD - n_out)))
    bc_pad = jnp.pad(params["bc"], ((0, 0), (0, OUT_PAD - n_out)))

    weight_args = (
        params["attn_w_in_t"], params["attn_b_in"],
        params["attn_w_out_t"], params["attn_b_out"],
        params["w1_top_t"], params["w1_bot_t"], params["b1"],
        params["s1"], params["t1"],
        params["w2_t"], params["b2"], params["s2"], params["t2"],
        params["w3_t"], params["b3"], params["s3"], params["t3"],
        wc_pad, bc_pad)

    out = pl.pallas_call(
        functools.partial(unimol_fused_kernel, exp_dtype=exp_dtype),
        out_shape=jax.ShapeDtypeStruct((b_pad, OUT_PAD), jnp.float32),
        grid=(n_tiles,),
        in_specs=[
            pl.BlockSpec((bt, D), lambda b: (b, 0)),
            pl.BlockSpec((bt, S, D), lambda b: (b, 0, 0)),
            *[_const_spec(w) for w in weight_args],
        ],
        out_specs=pl.BlockSpec((bt, OUT_PAD), lambda b: (b, 0)),
        compiler_params=pltpu.CompilerParams(
            dimension_semantics=("parallel",),
            vmem_limit_bytes=vmem_limit),
    )(cls_embeddings, atomic_embeddings, *weight_args)
    return out[:B, :n_out]


# -----------------------------------------------------------------------------
# Parameter construction (deterministic, synthetic) + f32 reference copy
# -----------------------------------------------------------------------------
def fold_bn(gamma, beta, running_mean, running_var):
    scale = gamma / jnp.sqrt(running_var + BN_EPS)
    shift = beta - running_mean * scale
    return scale[None, :], shift[None, :]


def init_params(key, hidden_dim, task_type="classification"):
    ks = jax.random.split(key, 16)

    def lin(k, fan_in, fan_out):
        bound = 1.0 / jnp.sqrt(fan_in)
        w = jax.random.uniform(k, (fan_out, fan_in), jnp.float32, -bound, bound)
        b = jax.random.uniform(jax.random.fold_in(k, 1), (fan_out,),
                               jnp.float32, -bound, bound)
        return w, b

    # MultiheadAttention params.
    w_in, b_in = lin(ks[0], D, 3 * D)          # in_proj_weight (3D, D)
    w_out, b_out = lin(ks[1], D, D)            # out_proj (D, D)

    # MLP.
    w1, b1 = lin(ks[2], 2 * D, 512)
    w2, b2 = lin(ks[3], 512, hidden_dim)
    w3, b3 = lin(ks[4], hidden_dim, hidden_dim)
    n_out = 2 if task_type == "classification" else 1
    wc, bc = lin(ks[5], hidden_dim, n_out)

    # BatchNorm running stats / affine (synthetic but deterministic).
    def bn(k, n):
        g = 1.0 + 0.1 * jax.random.normal(k, (n,), jnp.float32)
        b_ = 0.1 * jax.random.normal(jax.random.fold_in(k, 1), (n,), jnp.float32)
        rm = 0.05 * jax.random.normal(jax.random.fold_in(k, 2), (n,), jnp.float32)
        rv = 1.0 + 0.1 * jax.random.uniform(jax.random.fold_in(k, 3), (n,),
                                            jnp.float32)
        return fold_bn(g, b_, rm, rv)

    s1, t1 = bn(ks[6], 512)
    s2, t2 = bn(ks[7], hidden_dim)
    s3, t3 = bn(ks[8], hidden_dim)

    # Fold the 1/sqrt(HEAD_DIM) query scale into W_in/b_in (Q rows).
    scale = 1.0 / float(HEAD_DIM) ** 0.5
    w_in_s = w_in.at[:D].multiply(scale)
    b_in_s = b_in.at[:D].multiply(scale)

    wdt = MATMUL_DTYPE   # matmul weights shipped as bf16 (halves DMA + VMEM)
    w1_t = w1.T          # (1024, 512); split so concat([cls,summary]) is fused
    params = {
        "attn_w_in_t": w_in_s.T.astype(wdt), "attn_b_in": b_in_s[None, :],
        "attn_w_out_t": w_out.T.astype(wdt), "attn_b_out": b_out[None, :],
        "w1_top_t": w1_t[:D].astype(wdt), "w1_bot_t": w1_t[D:].astype(wdt),
        "b1": b1[None, :], "s1": s1, "t1": t1,
        "w2_t": w2.T.astype(wdt), "b2": b2[None, :], "s2": s2, "t2": t2,
        "w3_t": w3.T.astype(wdt), "b3": b3[None, :], "s3": s3, "t3": t3,
        "wc_t": wc.T.astype(wdt), "bc": bc[None, :],
    }
    # Unmodified f32 weights for the tolerance-tested reference path.
    ref = {"w_in": w_in, "b_in": b_in, "w_out": w_out, "b_out": b_out,
           "w1": w1, "b1": b1, "s1": s1, "t1": t1,
           "w2": w2, "b2": b2, "s2": s2, "t2": t2,
           "w3": w3, "b3": b3, "s3": s3, "t3": t3,
           "wc": wc, "bc": bc}
    return params, ref


def reference_forward(ref, cls_e, atomic_e):
    """Pure-JAX f32 reference of the PyTorch forward (eval mode)."""
    B, S, _ = atomic_e.shape
    qkv = atomic_e @ ref["w_in"].T + ref["b_in"]                    # (B,S,3D)
    q, k, v = jnp.split(qkv, 3, axis=-1)

    def heads(t):
        return t.reshape(B, S, N_HEADS, HEAD_DIM).transpose(0, 2, 1, 3)

    q = heads(q) / jnp.sqrt(jnp.float32(HEAD_DIM))
    k, v = heads(k), heads(v)
    s = jnp.einsum('bhqd,bhkd->bhqk', q, k)
    p = jax.nn.softmax(s, axis=-1)
    o = jnp.einsum('bhqk,bhkd->bhqd', p, v)
    o = o.transpose(0, 2, 1, 3).reshape(B, S, D) @ ref["w_out"].T + ref["b_out"]
    summary = o.mean(axis=1)

    x = jnp.concatenate([cls_e, summary], axis=1)
    h = jnp.maximum((x @ ref["w1"].T + ref["b1"]) * ref["s1"] + ref["t1"], 0.0)
    h = jnp.maximum((h @ ref["w2"].T + ref["b2"]) * ref["s2"] + ref["t2"], 0.0)
    h = jnp.maximum((h @ ref["w3"].T + ref["b3"]) * ref["s3"] + ref["t3"], 0.0)
    return h @ ref["wc"].T + ref["bc"]


# -----------------------------------------------------------------------------
# Forward pass (thin JAX glue; the whole hot path is one Pallas kernel)
# -----------------------------------------------------------------------------
@functools.partial(jax.jit, static_argnames=("max_atomic_len",))
def unimol_3d_forward(params, cls_embeddings, atomic_embeddings,
                      max_atomic_len=None):
    if cls_embeddings.ndim > 2:
        cls_embeddings = jnp.squeeze(cls_embeddings, axis=1)

    # Matches the PyTorch reference exactly: pad with zeros (no key-padding
    # mask; the mean divides by the padded length) or truncate.
    if max_atomic_len is not None:
        B, n_atoms, d = atomic_embeddings.shape
        if n_atoms < max_atomic_len:
            pad = jnp.zeros((B, max_atomic_len - n_atoms, d),
                            atomic_embeddings.dtype)
            atomic_embeddings = jnp.concatenate([atomic_embeddings, pad], axis=1)
        elif n_atoms > max_atomic_len:
            atomic_embeddings = atomic_embeddings[:, :max_atomic_len, :]

    # dropout == identity in eval mode
    return unimol_fused_forward(params, cls_embeddings, atomic_embeddings)


if __name__ == "__main__":
    key = jax.random.PRNGKey(0)
    k_cls, k_atom, k_param = jax.random.split(key, 3)

    B, S = 2, 8
    hidden_dim = 256
    cls_embeddings = jax.random.normal(k_cls, (B, D), jnp.float32)
    atomic_embeddings = jax.random.normal(k_atom, (B, S, D), jnp.float32)

    params, ref = init_params(k_param, hidden_dim, task_type="classification")

    out = unimol_3d_forward(params, cls_embeddings, atomic_embeddings)
    jax.block_until_ready(out)
    assert out.shape == (B, 2) and out.dtype == jnp.float32

    # Tolerance-tested f32 reference path (kernel uses bf16 MXU operands).
    expected = reference_forward(ref, cls_embeddings, atomic_embeddings)
    assert bool(jnp.all(jnp.abs(out - expected)
                        <= 3e-2 + 5e-2 * jnp.abs(expected))), \
        "kernel output diverges from f32 reference"
    print("KERNEL_OK")
</pallas_src>

<mosaic_0001>
module attributes {stable_mosaic.version = 11 : i64} {
  func.func @unimol_fused_kernel(%arg0: i32, %arg1: memref<2x512xbf16, #tpu.memory_space<vmem>>, %arg2: memref<2x8x512xbf16, #tpu.memory_space<vmem>>, %arg3: memref<512x1536xbf16, #tpu.memory_space<vmem>>, %arg4: memref<1x1536xf32, #tpu.memory_space<vmem>>, %arg5: memref<512x512xbf16, #tpu.memory_space<vmem>>, %arg6: memref<1x512xf32, #tpu.memory_space<vmem>>, %arg7: memref<512x512xbf16, #tpu.memory_space<vmem>>, %arg8: memref<512x512xbf16, #tpu.memory_space<vmem>>, %arg9: memref<1x512xf32, #tpu.memory_space<vmem>>, %arg10: memref<1x512xf32, #tpu.memory_space<vmem>>, %arg11: memref<1x512xf32, #tpu.memory_space<vmem>>, %arg12: memref<512x256xbf16, #tpu.memory_space<vmem>>, %arg13: memref<1x256xf32, #tpu.memory_space<vmem>>, %arg14: memref<1x256xf32, #tpu.memory_space<vmem>>, %arg15: memref<1x256xf32, #tpu.memory_space<vmem>>, %arg16: memref<256x256xbf16, #tpu.memory_space<vmem>>, %arg17: memref<1x256xf32, #tpu.memory_space<vmem>>, %arg18: memref<1x256xf32, #tpu.memory_space<vmem>>, %arg19: memref<1x256xf32, #tpu.memory_space<vmem>>, %arg20: memref<256x128xbf16, #tpu.memory_space<vmem>>, %arg21: memref<1x128xf32, #tpu.memory_space<vmem>>, %arg22: memref<2x128xf32, #tpu.memory_space<vmem>>) attributes {dimension_semantics = [#tpu.dimension_semantics<parallel>], iteration_bounds = array<i64: 1>, scalar_prefetch = 0 : i64, scratch_operands = 0 : i64, tpu.core_type = #tpu.core_type<tc>, window_params = [{transform_indices = @transform_0, window_bounds = array<i64: 2, 512>}, {transform_indices = @transform_1, window_bounds = array<i64: 2, 8, 512>}, {pipeline_mode = #tpu.pipeline_mode<synchronous>, transform_indices = @transform_2, window_bounds = array<i64: 512, 1536>}, {pipeline_mode = #tpu.pipeline_mode<synchronous>, transform_indices = @transform_3, window_bounds = array<i64: 1, 1536>}, {pipeline_mode = #tpu.pipeline_mode<synchronous>, transform_indices = @transform_4, window_bounds = array<i64: 512, 512>}, {pipeline_mode = #tpu.pipeline_mode<synchronous>, transform_indices = @transform_5, window_bounds = array<i64: 1, 512>}, {pipeline_mode = #tpu.pipeline_mode<synchronous>, transform_indices = @transform_6, window_bounds = array<i64: 512, 512>}, {pipeline_mode = #tpu.pipeline_mode<synchronous>, transform_indices = @transform_7, window_bounds = array<i64: 512, 512>}, {pipeline_mode = #tpu.pipeline_mode<synchronous>, transform_indices = @transform_8, window_bounds = array<i64: 1, 512>}, {pipeline_mode = #tpu.pipeline_mode<synchronous>, transform_indices = @transform_9, window_bounds = array<i64: 1, 512>}, {pipeline_mode = #tpu.pipeline_mode<synchronous>, transform_indices = @transform_10, window_bounds = array<i64: 1, 512>}, {pipeline_mode = #tpu.pipeline_mode<synchronous>, transform_indices = @transform_11, window_bounds = array<i64: 512, 256>}, {pipeline_mode = #tpu.pipeline_mode<synchronous>, transform_indices = @transform_12, window_bounds = array<i64: 1, 256>}, {pipeline_mode = #tpu.pipeline_mode<synchronous>, transform_indices = @transform_13, window_bounds = array<i64: 1, 256>}, {pipeline_mode = #tpu.pipeline_mode<synchronous>, transform_indices = @transform_14, window_bounds = array<i64: 1, 256>}, {pipeline_mode = #tpu.pipeline_mode<synchronous>, transform_indices = @transform_15, window_bounds = array<i64: 256, 256>}, {pipeline_mode = #tpu.pipeline_mode<synchronous>, transform_indices = @transform_16, window_bounds = array<i64: 1, 256>}, {pipeline_mode = #tpu.pipeline_mode<synchronous>, transform_indices = @transform_17, window_bounds = array<i64: 1, 256>}, {pipeline_mode = #tpu.pipeline_mode<synchronous>, transform_indices = @transform_18, window_bounds = array<i64: 1, 256>}, {pipeline_mode = #tpu.pipeline_mode<synchronous>, transform_indices = @transform_19, window_bounds = array<i64: 256, 128>}, {pipeline_mode = #tpu.pipeline_mode<synchronous>, transform_indices = @transform_20, window_bounds = array<i64: 1, 128>}, {transform_indices = @transform_21, window_bounds = array<i64: 2, 128>}]} {
    %c0 = arith.constant 0 : index
    %c0_0 = arith.constant 0 : index
    %c0_1 = arith.constant 0 : index
    %0 = vector.load %arg2[%c0, %c0_0, %c0_1] : memref<2x8x512xbf16, #tpu.memory_space<vmem>>, vector<2x8x512xbf16>
    %1 = vector.shape_cast %0 : vector<2x8x512xbf16> to vector<16x512xbf16>
    %c0_2 = arith.constant 0 : index
    %c0_3 = arith.constant 0 : index
    %2 = vector.load %arg3[%c0_2, %c0_3] : memref<512x1536xbf16, #tpu.memory_space<vmem>>, vector<512x1536xbf16>
    %cst = arith.constant dense<0.000000e+00> : vector<16x1536xf32>
    %3 = tpu.matmul %1, %2, %cst {dimension_numbers = #tpu.dot_dimension_numbers<[1], [0], [0], [1], [0, 0, 1, 1], [], []>} : vector<16x512xbf16>, vector<512x1536xbf16>, vector<16x1536xf32> -> vector<16x1536xf32>
    %c0_4 = arith.constant 0 : index
    %c0_5 = arith.constant 0 : index
    %4 = vector.load %arg4[%c0_4, %c0_5] : memref<1x1536xf32, #tpu.memory_space<vmem>>, vector<1x1536xf32>
    %5 = vector.broadcast %4 : vector<1x1536xf32> to vector<16x1536xf32>
    %6 = arith.addf %3, %5 : vector<16x1536xf32>
    %7 = arith.truncf %6 : vector<16x1536xf32> to vector<16x1536xbf16>
    %cst_6 = arith.constant 1.000000e+00 : f32
    %cst_7 = arith.constant 8.000000e+00 : f32
    %8 = arith.divf %cst_6, %cst_7 : f32
    %cst_8 = arith.constant 0.000000e+00 : f32
    %9 = vector.broadcast %cst_8 : f32 to vector<2x512xf32>
    %10 = vector.extract_strided_slice %7 {offsets = [0, 0], sizes = [16, 128], strides = [1, 1]} : vector<16x1536xbf16> to vector<16x128xbf16>
    %11 = vector.shape_cast %10 : vector<16x128xbf16> to vector<2x8x128xbf16>
    %12 = vector.extract_strided_slice %7 {offsets = [0, 512], sizes = [16, 128], strides = [1, 1]} : vector<16x1536xbf16> to vector<16x128xbf16>
    %13 = vector.shape_cast %12 : vector<16x128xbf16> to vector<2x8x128xbf16>
    %14 = vector.extract_strided_slice %7 {offsets = [0, 1024], sizes = [16, 128], strides = [1, 1]} : vector<16x1536xbf16> to vector<16x128xbf16>
    %15 = vector.shape_cast %14 : vector<16x128xbf16> to vector<2x8x128xbf16>
    "tpu.trace_start"() <{level = 10 : i32, message = "bqd,bkd->bqk"}> : () -> ()
    %cst_9 = arith.constant dense<0.000000e+00> : vector<2x8x8xf32>
    %16 = tpu.matmul %11, %13, %cst_9 {dimension_numbers = #tpu.dot_dimension_numbers<[2], [2], [1], [1], [0, 0, 0, 1, 1, 1], [0], [0]>} : vector<2x8x128xbf16>, vector<2x8x128xbf16>, vector<2x8x8xf32> -> vector<2x8x8xf32>
    "tpu.trace_stop"() : () -> ()
    %cst_10 = arith.constant dense<0xFF800000> : vector<2x8xf32>
    %17 = vector.multi_reduction <maximumf>, %16, %cst_10 [2] : vector<2x8x8xf32> to vector<2x8xf32>
    %18 = vector.shape_cast %17 : vector<2x8xf32> to vector<2x8x1xf32>
    %19 = vector.broadcast %18 : vector<2x8x1xf32> to vector<2x8x8xf32>
    %20 = arith.subf %16, %19 : vector<2x8x8xf32>
    %21 = math.exp %20 : vector<2x8x8xf32>
    %cst_11 = arith.constant dense<0.000000e+00> : vector<2x8xf32>
    %22 = vector.multi_reduction <add>, %21, %cst_11 [2] : vector<2x8x8xf32> to vector<2x8xf32>
    %23 = vector.shape_cast %22 : vector<2x8xf32> to vector<2x8x1xf32>
    %cst_12 = arith.constant 1.000000e+00 : f32
    %24 = vector.broadcast %cst_12 : f32 to vector<2x8x1xf32>
    %25 = arith.divf %24, %23 : vector<2x8x1xf32>
    %26 = vector.broadcast %25 : vector<2x8x1xf32> to vector<2x8x8xf32>
    %27 = arith.mulf %21, %26 : vector<2x8x8xf32>
    %28 = arith.truncf %27 : vector<2x8x8xf32> to vector<2x8x8xbf16>
    "tpu.trace_start"() <{level = 10 : i32, message = "bqk,bkd->bqd"}> : () -> ()
    %cst_13 = arith.constant dense<0.000000e+00> : vector<2x8x128xf32>
    %29 = tpu.matmul %28, %15, %cst_13 {dimension_numbers = #tpu.dot_dimension_numbers<[2], [1], [1], [2], [0, 0, 0, 1, 1, 2], [0], [0]>} : vector<2x8x8xbf16>, vector<2x8x128xbf16>, vector<2x8x128xf32> -> vector<2x8x128xf32>
    "tpu.trace_stop"() : () -> ()
    %cst_14 = arith.constant dense<0.000000e+00> : vector<2x128xf32>
    %30 = vector.multi_reduction <add>, %29, %cst_14 [1] : vector<2x8x128xf32> to vector<2x128xf32>
    %31 = vector.broadcast %8 : f32 to vector<2x128xf32>
    %32 = arith.mulf %30, %31 : vector<2x128xf32>
    %33 = arith.truncf %32 : vector<2x128xf32> to vector<2x128xbf16>
    %c0_15 = arith.constant 0 : index
    %c0_16 = arith.constant 0 : index
    %34 = vector.load %arg5[%c0_15, %c0_16] : memref<512x512xbf16, #tpu.memory_space<vmem>>, vector<128x512xbf16>
    %cst_17 = arith.constant dense<0.000000e+00> : vector<2x512xf32>
    %35 = tpu.matmul %33, %34, %cst_17 {dimension_numbers = #tpu.dot_dimension_numbers<[1], [0], [0], [1], [0, 0, 1, 1], [], []>} : vector<2x128xbf16>, vector<128x512xbf16>, vector<2x512xf32> -> vector<2x512xf32>
    %36 = arith.addf %9, %35 : vector<2x512xf32>
    %37 = vector.extract_strided_slice %7 {offsets = [0, 128], sizes = [16, 128], strides = [1, 1]} : vector<16x1536xbf16> to vector<16x128xbf16>
    %38 = vector.shape_cast %37 : vector<16x128xbf16> to vector<2x8x128xbf16>
    %39 = vector.extract_strided_slice %7 {offsets = [0, 640], sizes = [16, 128], strides = [1, 1]} : vector<16x1536xbf16> to vector<16x128xbf16>
    %40 = vector.shape_cast %39 : vector<16x128xbf16> to vector<2x8x128xbf16>
    %41 = vector.extract_strided_slice %7 {offsets = [0, 1152], sizes = [16, 128], strides = [1, 1]} : vector<16x1536xbf16> to vector<16x128xbf16>
    %42 = vector.shape_cast %41 : vector<16x128xbf16> to vector<2x8x128xbf16>
    "tpu.trace_start"() <{level = 10 : i32, message = "bqd,bkd->bqk"}> : () -> ()
    %cst_18 = arith.constant dense<0.000000e+00> : vector<2x8x8xf32>
    %43 = tpu.matmul %38, %40, %cst_18 {dimension_numbers = #tpu.dot_dimension_numbers<[2], [2], [1], [1], [0, 0, 0, 1, 1, 1], [0], [0]>} : vector<2x8x128xbf16>, vector<2x8x128xbf16>, vector<2x8x8xf32> -> vector<2x8x8xf32>
    "tpu.trace_stop"() : () -> ()
    %cst_19 = arith.constant dense<0xFF800000> : vector<2x8xf32>
    %44 = vector.multi_reduction <maximumf>, %43, %cst_19 [2] : vector<2x8x8xf32> to vector<2x8xf32>
    %45 = vector.shape_cast %44 : vector<2x8xf32> to vector<2x8x1xf32>
    %46 = vector.broadcast %45 : vector<2x8x1xf32> to vector<2x8x8xf32>
    %47 = arith.subf %43, %46 : vector<2x8x8xf32>
    %48 = math.exp %47 : vector<2x8x8xf32>
    %cst_20 = arith.constant dense<0.000000e+00> : vector<2x8xf32>
    %49 = vector.multi_reduction <add>, %48, %cst_20 [2] : vector<2x8x8xf32> to vector<2x8xf32>
    %50 = vector.shape_cast %49 : vector<2x8xf32> to vector<2x8x1xf32>
    %cst_21 = arith.constant 1.000000e+00 : f32
    %51 = vector.broadcast %cst_21 : f32 to vector<2x8x1xf32>
    %52 = arith.divf %51, %50 : vector<2x8x1xf32>
    %53 = vector.broadcast %52 : vector<2x8x1xf32> to vector<2x8x8xf32>
    %54 = arith.mulf %48, %53 : vector<2x8x8xf32>
    %55 = arith.truncf %54 : vector<2x8x8xf32> to vector<2x8x8xbf16>
    "tpu.trace_start"() <{level = 10 : i32, message = "bqk,bkd->bqd"}> : () -> ()
    %cst_22 = arith.constant dense<0.000000e+00> : vector<2x8x128xf32>
    %56 = tpu.matmul %55, %42, %cst_22 {dimension_numbers = #tpu.dot_dimension_numbers<[2], [1], [1], [2], [0, 0, 0, 1, 1, 2], [0], [0]>} : vector<2x8x8xbf16>, vector<2x8x128xbf16>, vector<2x8x128xf32> -> vector<2x8x128xf32>
    "tpu.trace_stop"() : () -> ()
    %cst_23 = arith.constant dense<0.000000e+00> : vector<2x128xf32>
    %57 = vector.multi_reduction <add>, %56, %cst_23 [1] : vector<2x8x128xf32> to vector<2x128xf32>
    %58 = vector.broadcast %8 : f32 to vector<2x128xf32>
    %59 = arith.mulf %57, %58 : vector<2x128xf32>
    %60 = arith.truncf %59 : vector<2x128xf32> to vector<2x128xbf16>
    %c128 = arith.constant 128 : index
    %c0_24 = arith.constant 0 : index
    %61 = vector.load %arg5[%c128, %c0_24] : memref<512x512xbf16, #tpu.memory_space<vmem>>, vector<128x512xbf16>
    %cst_25 = arith.constant dense<0.000000e+00> : vector<2x512xf32>
    %62 = tpu.matmul %60, %61, %cst_25 {dimension_numbers = #tpu.dot_dimension_numbers<[1], [0], [0], [1], [0, 0, 1, 1], [], []>} : vector<2x128xbf16>, vector<128x512xbf16>, vector<2x512xf32> -> vector<2x512xf32>
    %63 = arith.addf %36, %62 : vector<2x512xf32>
    %64 = vector.extract_strided_slice %7 {offsets = [0, 256], sizes = [16, 128], strides = [1, 1]} : vector<16x1536xbf16> to vector<16x128xbf16>
    %65 = vector.shape_cast %64 : vector<16x128xbf16> to vector<2x8x128xbf16>
    %66 = vector.extract_strided_slice %7 {offsets = [0, 768], sizes = [16, 128], strides = [1, 1]} : vector<16x1536xbf16> to vector<16x128xbf16>
    %67 = vector.shape_cast %66 : vector<16x128xbf16> to vector<2x8x128xbf16>
    %68 = vector.extract_strided_slice %7 {offsets = [0, 1280], sizes = [16, 128], strides = [1, 1]} : vector<16x1536xbf16> to vector<16x128xbf16>
    %69 = vector.shape_cast %68 : vector<16x128xbf16> to vector<2x8x128xbf16>
    "tpu.trace_start"() <{level = 10 : i32, message = "bqd,bkd->bqk"}> : () -> ()
    %cst_26 = arith.constant dense<0.000000e+00> : vector<2x8x8xf32>
    %70 = tpu.matmul %65, %67, %cst_26 {dimension_numbers = #tpu.dot_dimension_numbers<[2], [2], [1], [1], [0, 0, 0, 1, 1, 1], [0], [0]>} : vector<2x8x128xbf16>, vector<2x8x128xbf16>, vector<2x8x8xf32> -> vector<2x8x8xf32>
    "tpu.trace_stop"() : () -> ()
    %cst_27 = arith.constant dense<0xFF800000> : vector<2x8xf32>
    %71 = vector.multi_reduction <maximumf>, %70, %cst_27 [2] : vector<2x8x8xf32> to vector<2x8xf32>
    %72 = vector.shape_cast %71 : vector<2x8xf32> to vector<2x8x1xf32>
    %73 = vector.broadcast %72 : vector<2x8x1xf32> to vector<2x8x8xf32>
    %74 = arith.subf %70, %73 : vector<2x8x8xf32>
    %75 = math.exp %74 : vector<2x8x8xf32>
    %cst_28 = arith.constant dense<0.000000e+00> : vector<2x8xf32>
    %76 = vector.multi_reduction <add>, %75, %cst_28 [2] : vector<2x8x8xf32> to vector<2x8xf32>
    %77 = vector.shape_cast %76 : vector<2x8xf32> to vector<2x8x1xf32>
    %cst_29 = arith.constant 1.000000e+00 : f32
    %78 = vector.broadcast %cst_29 : f32 to vector<2x8x1xf32>
    %79 = arith.divf %78, %77 : vector<2x8x1xf32>
    %80 = vector.broadcast %79 : vector<2x8x1xf32> to vector<2x8x8xf32>
    %81 = arith.mulf %75, %80 : vector<2x8x8xf32>
    %82 = arith.truncf %81 : vector<2x8x8xf32> to vector<2x8x8xbf16>
    "tpu.trace_start"() <{level = 10 : i32, message = "bqk,bkd->bqd"}> : () -> ()
    %cst_30 = arith.constant dense<0.000000e+00> : vector<2x8x128xf32>
    %83 = tpu.matmul %82, %69, %cst_30 {dimension_numbers = #tpu.dot_dimension_numbers<[2], [1], [1], [2], [0, 0, 0, 1, 1, 2], [0], [0]>} : vector<2x8x8xbf16>, vector<2x8x128xbf16>, vector<2x8x128xf32> -> vector<2x8x128xf32>
    "tpu.trace_stop"() : () -> ()
    %cst_31 = arith.constant dense<0.000000e+00> : vector<2x128xf32>
    %84 = vector.multi_reduction <add>, %83, %cst_31 [1] : vector<2x8x128xf32> to vector<2x128xf32>
    %85 = vector.broadcast %8 : f32 to vector<2x128xf32>
    %86 = arith.mulf %84, %85 : vector<2x128xf32>
    %87 = arith.truncf %86 : vector<2x128xf32> to vector<2x128xbf16>
    %c256 = arith.constant 256 : index
    %c0_32 = arith.constant 0 : index
    %88 = vector.load %arg5[%c256, %c0_32] : memref<512x512xbf16, #tpu.memory_space<vmem>>, vector<128x512xbf16>
    %cst_33 = arith.constant dense<0.000000e+00> : vector<2x512xf32>
    %89 = tpu.matmul %87, %88, %cst_33 {dimension_numbers = #tpu.dot_dimension_numbers<[1], [0], [0], [1], [0, 0, 1, 1], [], []>} : vector<2x128xbf16>, vector<128x512xbf16>, vector<2x512xf32> -> vector<2x512xf32>
    %90 = arith.addf %63, %89 : vector<2x512xf32>
    %91 = vector.extract_strided_slice %7 {offsets = [0, 384], sizes = [16, 128], strides = [1, 1]} : vector<16x1536xbf16> to vector<16x128xbf16>
    %92 = vector.shape_cast %91 : vector<16x128xbf16> to vector<2x8x128xbf16>
    %93 = vector.extract_strided_slice %7 {offsets = [0, 896], sizes = [16, 128], strides = [1, 1]} : vector<16x1536xbf16> to vector<16x128xbf16>
    %94 = vector.shape_cast %93 : vector<16x128xbf16> to vector<2x8x128xbf16>
    %95 = vector.extract_strided_slice %7 {offsets = [0, 1408], sizes = [16, 128], strides = [1, 1]} : vector<16x1536xbf16> to vector<16x128xbf16>
    %96 = vector.shape_cast %95 : vector<16x128xbf16> to vector<2x8x128xbf16>
    "tpu.trace_start"() <{level = 10 : i32, message = "bqd,bkd->bqk"}> : () -> ()
    %cst_34 = arith.constant dense<0.000000e+00> : vector<2x8x8xf32>
    %97 = tpu.matmul %92, %94, %cst_34 {dimension_numbers = #tpu.dot_dimension_numbers<[2], [2], [1], [1], [0, 0, 0, 1, 1, 1], [0], [0]>} : vector<2x8x128xbf16>, vector<2x8x128xbf16>, vector<2x8x8xf32> -> vector<2x8x8xf32>
    "tpu.trace_stop"() : () -> ()
    %cst_35 = arith.constant dense<0xFF800000> : vector<2x8xf32>
    %98 = vector.multi_reduction <maximumf>, %97, %cst_35 [2] : vector<2x8x8xf32> to vector<2x8xf32>
    %99 = vector.shape_cast %98 : vector<2x8xf32> to vector<2x8x1xf32>
    %100 = vector.broadcast %99 : vector<2x8x1xf32> to vector<2x8x8xf32>
    %101 = arith.subf %97, %100 : vector<2x8x8xf32>
    %102 = math.exp %101 : vector<2x8x8xf32>
    %cst_36 = arith.constant dense<0.000000e+00> : vector<2x8xf32>
    %103 = vector.multi_reduction <add>, %102, %cst_36 [2] : vector<2x8x8xf32> to vector<2x8xf32>
    %104 = vector.shape_cast %103 : vector<2x8xf32> to vector<2x8x1xf32>
    %cst_37 = arith.constant 1.000000e+00 : f32
    %105 = vector.broadcast %cst_37 : f32 to vector<2x8x1xf32>
    %106 = arith.divf %105, %104 : vector<2x8x1xf32>
    %107 = vector.broadcast %106 : vector<2x8x1xf32> to vector<2x8x8xf32>
    %108 = arith.mulf %102, %107 : vector<2x8x8xf32>
    %109 = arith.truncf %108 : vector<2x8x8xf32> to vector<2x8x8xbf16>
    "tpu.trace_start"() <{level = 10 : i32, message = "bqk,bkd->bqd"}> : () -> ()
    %cst_38 = arith.constant dense<0.000000e+00> : vector<2x8x128xf32>
    %110 = tpu.matmul %109, %96, %cst_38 {dimension_numbers = #tpu.dot_dimension_numbers<[2], [1], [1], [2], [0, 0, 0, 1, 1, 2], [0], [0]>} : vector<2x8x8xbf16>, vector<2x8x128xbf16>, vector<2x8x128xf32> -> vector<2x8x128xf32>
    "tpu.trace_stop"() : () -> ()
    %cst_39 = arith.constant dense<0.000000e+00> : vector<2x128xf32>
    %111 = vector.multi_reduction <add>, %110, %cst_39 [1] : vector<2x8x128xf32> to vector<2x128xf32>
    %112 = vector.broadcast %8 : f32 to vector<2x128xf32>
    %113 = arith.mulf %111, %112 : vector<2x128xf32>
    %114 = arith.truncf %113 : vector<2x128xf32> to vector<2x128xbf16>
    %c384 = arith.constant 384 : index
    %c0_40 = arith.constant 0 : index
    %115 = vector.load %arg5[%c384, %c0_40] : memref<512x512xbf16, #tpu.memory_space<vmem>>, vector<128x512xbf16>
    %cst_41 = arith.constant dense<0.000000e+00> : vector<2x512xf32>
    %116 = tpu.matmul %114, %115, %cst_41 {dimension_numbers = #tpu.dot_dimension_numbers<[1], [0], [0], [1], [0, 0, 1, 1], [], []>} : vector<2x128xbf16>, vector<128x512xbf16>, vector<2x512xf32> -> vector<2x512xf32>
    %117 = arith.addf %90, %116 : vector<2x512xf32>
    %c0_42 = arith.constant 0 : index
    %c0_43 = arith.constant 0 : index
    %118 = vector.load %arg6[%c0_42, %c0_43] : memref<1x512xf32, #tpu.memory_space<vmem>>, vector<1x512xf32>
    %119 = vector.broadcast %118 : vector<1x512xf32> to vector<2x512xf32>
    %120 = arith.addf %117, %119 : vector<2x512xf32>
    %c0_44 = arith.constant 0 : index
    %c0_45 = arith.constant 0 : index
    %121 = vector.load %arg1[%c0_44, %c0_45] : memref<2x512xbf16, #tpu.memory_space<vmem>>, vector<2x512xbf16>
    %c0_46 = arith.constant 0 : index
    %c0_47 = arith.constant 0 : index
    %122 = vector.load %arg7[%c0_46, %c0_47] : memref<512x512xbf16, #tpu.memory_space<vmem>>, vector<512x512xbf16>
    %cst_48 = arith.constant dense<0.000000e+00> : vector<2x512xf32>
    %123 = tpu.matmul %121, %122, %cst_48 {dimension_numbers = #tpu.dot_dimension_numbers<[1], [0], [0], [1], [0, 0, 1, 1], [], []>} : vector<2x512xbf16>, vector<512x512xbf16>, vector<2x512xf32> -> vector<2x512xf32>
    %124 = arith.truncf %120 : vector<2x512xf32> to vector<2x512xbf16>
    %c0_49 = arith.constant 0 : index
    %c0_50 = arith.constant 0 : index
    %125 = vector.load %arg8[%c0_49, %c0_50] : memref<512x512xbf16, #tpu.memory_space<vmem>>, vector<512x512xbf16>
    %cst_51 = arith.constant dense<0.000000e+00> : vector<2x512xf32>
    %126 = tpu.matmul %124, %125, %cst_51 {dimension_numbers = #tpu.dot_dimension_numbers<[1], [0], [0], [1], [0, 0, 1, 1], [], []>} : vector<2x512xbf16>, vector<512x512xbf16>, vector<2x512xf32> -> vector<2x512xf32>
    %127 = arith.addf %123, %126 : vector<2x512xf32>
    %c0_52 = arith.constant 0 : index
    %c0_53 = arith.constant 0 : index
    %128 = vector.load %arg9[%c0_52, %c0_53] : memref<1x512xf32, #tpu.memory_space<vmem>>, vector<1x512xf32>
    %129 = vector.broadcast %128 : vector<1x512xf32> to vector<2x512xf32>
    %130 = arith.addf %127, %129 : vector<2x512xf32>
    %c0_54 = arith.constant 0 : index
    %c0_55 = arith.constant 0 : index
    %131 = vector.load %arg10[%c0_54, %c0_55] : memref<1x512xf32, #tpu.memory_space<vmem>>, vector<1x512xf32>
    %132 = vector.broadcast %131 : vector<1x512xf32> to vector<2x512xf32>
    %133 = arith.mulf %130, %132 : vector<2x512xf32>
    %c0_56 = arith.constant 0 : index
    %c0_57 = arith.constant 0 : index
    %134 = vector.load %arg11[%c0_56, %c0_57] : memref<1x512xf32, #tpu.memory_space<vmem>>, vector<1x512xf32>
    %135 = vector.broadcast %134 : vector<1x512xf32> to vector<2x512xf32>
    %136 = arith.addf %133, %135 : vector<2x512xf32>
    %cst_58 = arith.constant 0.000000e+00 : f32
    %137 = vector.broadcast %cst_58 : f32 to vector<2x512xf32>
    %138 = arith.maximumf %136, %137 : vector<2x512xf32>
    %139 = arith.truncf %138 : vector<2x512xf32> to vector<2x512xbf16>
    %c0_59 = arith.constant 0 : index
    %c0_60 = arith.constant 0 : index
    %140 = vector.load %arg12[%c0_59, %c0_60] : memref<512x256xbf16, #tpu.memory_space<vmem>>, vector<512x256xbf16>
    %cst_61 = arith.constant dense<0.000000e+00> : vector<2x256xf32>
    %141 = tpu.matmul %139, %140, %cst_61 {dimension_numbers = #tpu.dot_dimension_numbers<[1], [0], [0], [1], [0, 0, 1, 1], [], []>} : vector<2x512xbf16>, vector<512x256xbf16>, vector<2x256xf32> -> vector<2x256xf32>
    %c0_62 = arith.constant 0 : index
    %c0_63 = arith.constant 0 : index
    %142 = vector.load %arg13[%c0_62, %c0_63] : memref<1x256xf32, #tpu.memory_space<vmem>>, vector<1x256xf32>
    %143 = vector.broadcast %142 : vector<1x256xf32> to vector<2x256xf32>
    %144 = arith.addf %141, %143 : vector<2x256xf32>
    %c0_64 = arith.constant 0 : index
    %c0_65 = arith.constant 0 : index
    %145 = vector.load %arg14[%c0_64, %c0_65] : memref<1x256xf32, #tpu.memory_space<vmem>>, vector<1x256xf32>
    %146 = vector.broadcast %145 : vector<1x256xf32> to vector<2x256xf32>
    %147 = arith.mulf %144, %146 : vector<2x256xf32>
    %c0_66 = arith.constant 0 : index
    %c0_67 = arith.constant 0 : index
    %148 = vector.load %arg15[%c0_66, %c0_67] : memref<1x256xf32, #tpu.memory_space<vmem>>, vector<1x256xf32>
    %149 = vector.broadcast %148 : vector<1x256xf32> to vector<2x256xf32>
    %150 = arith.addf %147, %149 : vector<2x256xf32>
    %cst_68 = arith.constant 0.000000e+00 : f32
    %151 = vector.broadcast %cst_68 : f32 to vector<2x256xf32>
    %152 = arith.maximumf %150, %151 : vector<2x256xf32>
    %153 = arith.truncf %152 : vector<2x256xf32> to vector<2x256xbf16>
    %c0_69 = arith.constant 0 : index
    %c0_70 = arith.constant 0 : index
    %154 = vector.load %arg16[%c0_69, %c0_70] : memref<256x256xbf16, #tpu.memory_space<vmem>>, vector<256x256xbf16>
    %cst_71 = arith.constant dense<0.000000e+00> : vector<2x256xf32>
    %155 = tpu.matmul %153, %154, %cst_71 {dimension_numbers = #tpu.dot_dimension_numbers<[1], [0], [0], [1], [0, 0, 1, 1], [], []>} : vector<2x256xbf16>, vector<256x256xbf16>, vector<2x256xf32> -> vector<2x256xf32>
    %c0_72 = arith.constant 0 : index
    %c0_73 = arith.constant 0 : index
    %156 = vector.load %arg17[%c0_72, %c0_73] : memref<1x256xf32, #tpu.memory_space<vmem>>, vector<1x256xf32>
    %157 = vector.broadcast %156 : vector<1x256xf32> to vector<2x256xf32>
    %158 = arith.addf %155, %157 : vector<2x256xf32>
    %c0_74 = arith.constant 0 : index
    %c0_75 = arith.constant 0 : index
    %159 = vector.load %arg18[%c0_74, %c0_75] : memref<1x256xf32, #tpu.memory_space<vmem>>, vector<1x256xf32>
    %160 = vector.broadcast %159 : vector<1x256xf32> to vector<2x256xf32>
    %161 = arith.mulf %158, %160 : vector<2x256xf32>
    %c0_76 = arith.constant 0 : index
    %c0_77 = arith.constant 0 : index
    %162 = vector.load %arg19[%c0_76, %c0_77] : memref<1x256xf32, #tpu.memory_space<vmem>>, vector<1x256xf32>
    %163 = vector.broadcast %162 : vector<1x256xf32> to vector<2x256xf32>
    %164 = arith.addf %161, %163 : vector<2x256xf32>
    %cst_78 = arith.constant 0.000000e+00 : f32
    %165 = vector.broadcast %cst_78 : f32 to vector<2x256xf32>
    %166 = arith.maximumf %164, %165 : vector<2x256xf32>
    %167 = arith.truncf %166 : vector<2x256xf32> to vector<2x256xbf16>
    %c0_79 = arith.constant 0 : index
    %c0_80 = arith.constant 0 : index
    %168 = vector.load %arg20[%c0_79, %c0_80] : memref<256x128xbf16, #tpu.memory_space<vmem>>, vector<256x128xbf16>
    %cst_81 = arith.constant dense<0.000000e+00> : vector<2x128xf32>
    %169 = tpu.matmul %167, %168, %cst_81 {dimension_numbers = #tpu.dot_dimension_numbers<[1], [0], [0], [1], [0, 0, 1, 1], [], []>} : vector<2x256xbf16>, vector<256x128xbf16>, vector<2x128xf32> -> vector<2x128xf32>
    %c0_82 = arith.constant 0 : index
    %c0_83 = arith.constant 0 : index
    %170 = vector.load %arg21[%c0_82, %c0_83] : memref<1x128xf32, #tpu.memory_space<vmem>>, vector<1x128xf32>
    %171 = vector.broadcast %170 : vector<1x128xf32> to vector<2x128xf32>
    %172 = arith.addf %169, %171 : vector<2x128xf32>
    %c0_84 = arith.constant 0 : index
    %c0_85 = arith.constant 0 : index
    %173 = vector.load %arg22[%c0_84, %c0_85] : memref<2x128xf32, #tpu.memory_space<vmem>>, vector<2x128xf32>
    tpu.vector_store %arg22[%c0_84, %c0_85], %172 {strides = array<i32>} : memref<2x128xf32, #tpu.memory_space<vmem>>, vector<2x128xf32>,
    return
  }
  func.func @transform_0(%arg0: i32) -> (i32, i32) {
    %c0_i32 = arith.constant 0 : i32
    %c0_i32_0 = arith.constant 0 : i32
    return %arg0, %c0_i32 : i32, i32
  }
  func.func @transform_1(%arg0: i32) -> (i32, i32, i32) {
    %c0_i32 = arith.constant 0 : i32
    %c0_i32_0 = arith.constant 0 : i32
    %c0_i32_1 = arith.constant 0 : i32
    return %arg0, %c0_i32, %c0_i32_0 : i32, i32, i32
  }
  func.func @transform_2(%arg0: i32) -> (i32, i32) {
    %c0_i32 = arith.constant 0 : i32
    %c0_i32_0 = arith.constant 0 : i32
    %c0_i32_1 = arith.constant 0 : i32
    return %c0_i32, %c0_i32_0 : i32, i32
  }
  func.func @transform_3(%arg0: i32) -> (i32, i32) {
    %c0_i32 = arith.constant 0 : i32
    %c0_i32_0 = arith.constant 0 : i32
    %c0_i32_1 = arith.constant 0 : i32
    return %c0_i32, %c0_i32_0 : i32, i32
  }
  func.func @transform_4(%arg0: i32) -> (i32, i32) {
    %c0_i32 = arith.constant 0 : i32
    %c0_i32_0 = arith.constant 0 : i32
    %c0_i32_1 = arith.constant 0 : i32
    return %c0_i32, %c0_i32_0 : i32, i32
  }
  func.func @transform_5(%arg0: i32) -> (i32, i32) {
    %c0_i32 = arith.constant 0 : i32
    %c0_i32_0 = arith.constant 0 : i32
    %c0_i32_1 = arith.constant 0 : i32
    return %c0_i32, %c0_i32_0 : i32, i32
  }
  func.func @transform_6(%arg0: i32) -> (i32, i32) {
    %c0_i32 = arith.constant 0 : i32
    %c0_i32_0 = arith.constant 0 : i32
    %c0_i32_1 = arith.constant 0 : i32
    return %c0_i32, %c0_i32_0 : i32, i32
  }
  func.func @transform_7(%arg0: i32) -> (i32, i32) {
    %c0_i32 = arith.constant 0 : i32
    %c0_i32_0 = arith.constant 0 : i32
    %c0_i32_1 = arith.constant 0 : i32
    return %c0_i32, %c0_i32_0 : i32, i32
  }
  func.func @transform_8(%arg0: i32) -> (i32, i32) {
    %c0_i32 = arith.constant 0 : i32
    %c0_i32_0 = arith.constant 0 : i32
    %c0_i32_1 = arith.constant 0 : i32
    return %c0_i32, %c0_i32_0 : i32, i32
  }
  func.func @transform_9(%arg0: i32) -> (i32, i32) {
    %c0_i32 = arith.constant 0 : i32
    %c0_i32_0 = arith.constant 0 : i32
    %c0_i32_1 = arith.constant 0 : i32
    return %c0_i32, %c0_i32_0 : i32, i32
  }
  func.func @transform_10(%arg0: i32) -> (i32, i32) {
    %c0_i32 = arith.constant 0 : i32
    %c0_i32_0 = arith.constant 0 : i32
    %c0_i32_1 = arith.constant 0 : i32
    return %c0_i32, %c0_i32_0 : i32, i32
  }
  func.func @transform_11(%arg0: i32) -> (i32, i32) {
    %c0_i32 = arith.constant 0 : i32
    %c0_i32_0 = arith.constant 0 : i32
    %c0_i32_1 = arith.constant 0 : i32
    return %c0_i32, %c0_i32_0 : i32, i32
  }
  func.func @transform_12(%arg0: i32) -> (i32, i32) {
    %c0_i32 = arith.constant 0 : i32
    %c0_i32_0 = arith.constant 0 : i32
    %c0_i32_1 = arith.constant 0 : i32
    return %c0_i32, %c0_i32_0 : i32, i32
  }
  func.func @transform_13(%arg0: i32) -> (i32, i32) {
    %c0_i32 = arith.constant 0 : i32
    %c0_i32_0 = arith.constant 0 : i32
    %c0_i32_1 = arith.constant 0 : i32
    return %c0_i32, %c0_i32_0 : i32, i32
  }
  func.func @transform_14(%arg0: i32) -> (i32, i32) {
    %c0_i32 = arith.constant 0 : i32
    %c0_i32_0 = arith.constant 0 : i32
    %c0_i32_1 = arith.constant 0 : i32
    return %c0_i32, %c0_i32_0 : i32, i32
  }
  func.func @transform_15(%arg0: i32) -> (i32, i32) {
    %c0_i32 = arith.constant 0 : i32
    %c0_i32_0 = arith.constant 0 : i32
    %c0_i32_1 = arith.constant 0 : i32
    return %c0_i32, %c0_i32_0 : i32, i32
  }
  func.func @transform_16(%arg0: i32) -> (i32, i32) {
    %c0_i32 = arith.constant 0 : i32
    %c0_i32_0 = arith.constant 0 : i32
    %c0_i32_1 = arith.constant 0 : i32
    return %c0_i32, %c0_i32_0 : i32, i32
  }
  func.func @transform_17(%arg0: i32) -> (i32, i32) {
    %c0_i32 = arith.constant 0 : i32
    %c0_i32_0 = arith.constant 0 : i32
    %c0_i32_1 = arith.constant 0 : i32
    return %c0_i32, %c0_i32_0 : i32, i32
  }
  func.func @transform_18(%arg0: i32) -> (i32, i32) {
    %c0_i32 = arith.constant 0 : i32
    %c0_i32_0 = arith.constant 0 : i32
    %c0_i32_1 = arith.constant 0 : i32
    return %c0_i32, %c0_i32_0 : i32, i32
  }
  func.func @transform_19(%arg0: i32) -> (i32, i32) {
    %c0_i32 = arith.constant 0 : i32
    %c0_i32_0 = arith.constant 0 : i32
    %c0_i32_1 = arith.constant 0 : i32
    return %c0_i32, %c0_i32_0 : i32, i32
  }
  func.func @transform_20(%arg0: i32) -> (i32, i32) {
    %c0_i32 = arith.constant 0 : i32
    %c0_i32_0 = arith.constant 0 : i32
    %c0_i32_1 = arith.constant 0 : i32
    return %c0_i32, %c0_i32_0 : i32, i32
  }
  func.func @transform_21(%arg0: i32) -> (i32, i32) {
    %c0_i32 = arith.constant 0 : i32
    %c0_i32_0 = arith.constant 0 : i32
    return %arg0, %c0_i32 : i32, i32
  }
}

</mosaic_0001>

<bundles_post_ra>
// kernel: unimol_3d_forward.1
= control target key start
LH: loop header
LB: loop body
LE: loop exit
PB: predicated region body
PF: predicated region fallthrough
CT: control target
= control target key end

     0   :  { %s12001_s0 = inlined_call_operand.vmem [shape: bf16[2,512], index: 0, kind: input, shape index: {}]   ;;  %s12002_s1 = inlined_call_operand.vmem [shape: bf16[2,8,512], index: 1, kind: input, shape index: {}]   ;;  %s12003_s2 = inlined_call_operand.hbm [shape: bf16[512,1536], index: 2, kind: input, shape index: {}]   ;;  %s12004_s3 = inlined_call_operand.hbm [shape: f32[1,1536], index: 3, kind: input, shape index: {}]   ;;  %s12005_s4 = inlined_call_operand.hbm [shape: bf16[512,512], index: 4, kind: input, shape index: {}]   ;;  %s12006_s5 = inlined_call_operand.hbm [shape: f32[1,512], index: 5, kind: input, shape index: {}]   ;;  %s12007_s6 = inlined_call_operand.hbm [shape: bf16[512,512], index: 6, kind: input, shape index: {}]   ;;  %s12008_s7 = inlined_call_operand.hbm [shape: bf16[512,512], index: 7, kind: input, shape index: {}]   ;;  %s12009_s8 = inlined_call_operand.hbm [shape: f32[1,512], index: 8, kind: input, shape index: {}]   ;;  %s12010_s9 = inlined_call_operand.hbm [shape: f32[1,512], index: 9, kind: input, shape index: {}]   ;;  %s12011_s10 = inlined_call_operand.hbm [shape: f32[1,512], index: 10, kind: input, shape index: {}]   ;;  %s12012_s11 = inlined_call_operand.hbm [shape: bf16[512,256], index: 11, kind: input, shape index: {}]   ;;  %s12013_s12 = inlined_call_operand.hbm [shape: f32[1,256], index: 12, kind: input, shape index: {}]   ;;  %s12014_s13 = inlined_call_operand.hbm [shape: f32[1,256], index: 13, kind: input, shape index: {}]   ;;  %s12015_s14 = inlined_call_operand.hbm [shape: f32[1,256], index: 14, kind: input, shape index: {}]   ;;  %s12016_s15 = inlined_call_operand.hbm [shape: bf16[256,256], index: 15, kind: input, shape index: {}]   ;;  %s12017_s16 = inlined_call_operand.hbm [shape: f32[1,256], index: 16, kind: input, shape index: {}]   ;;  %s12018_s17 = inlined_call_operand.hbm [shape: f32[1,256], index: 17, kind: input, shape index: {}]   ;;  %s12019_s18 = inlined_call_operand.hbm [shape: f32[1,256], index: 18, kind: input, shape index: {}]   ;;  %s12020_s19 = inlined_call_operand.vmem [shape: bf16[256,128], index: 19, kind: input, shape index: {}]   ;;  %s12021_s20 = inlined_call_operand.vmem [shape: f32[1,128], index: 20, kind: input, shape index: {}]   ;;  %s12022_s21 = inlined_call_operand.hbm [shape: f32[2,128], index: 21, kind: output, shape index: {}]  }
   0x1   :  { %12030 = sst [smem:[#allocation40_spill]] %s12001_s0 }
   0x2   :  { %12031 = sst [smem:[#allocation41_spill]] %s12002_s1 }
   0x3   :  { %12032 = sst [smem:[#allocation42_spill]] %s12003_s2 }
   0x4   :  { %12033 = sst [smem:[#allocation43_spill]] %s12004_s3 }
   0x5   :  { %12034 = sst [smem:[#allocation44_spill]] %s12005_s4 }
   0x6   :  { %12035 = sst [smem:[#allocation45_spill]] %s12006_s5 }
   0x7   :  { %26 = vsyncpa [#allocation3], 0 }
   0x8   :  { %27 = vsyncpa [#allocation6], 0 }
   0x9   :  { %28 = vsyncpa [#allocation9], 0 }
   0xa   :  { %29 = vsyncpa [#allocation12], 0 }
   0xb   :  { %30 = vsyncpa [#allocation15], 0 }
   0xc   :  { %31 = vsyncpa [#allocation18], 0 }
   0xd   :  { %32 = vsyncpa [#allocation21], 0 }
   0xe   :  { %33 = vsyncpa [#allocation24], 0 }
   0xf   :  { %34 = vsyncpa [#allocation27], 0 }
  0x10   :  { %35 = vsyncpa [#allocation4], 0  ;;  %s11207_s2 = smov [#allocation5]   ;;  %s11208_s26 = smov [#allocation8]  }
  0x11   :  { %s58_s25 = sshll.u32 %s11207_s2, 4  ;;  %s80_s27 = sshll.u32 %s11208_s26, 4  ;;  %s59_s25 = int_to_ptr.vmem [resolvable:$true] %s58_s25  ;;  %s81_s27 = int_to_ptr.vmem [resolvable:$true] %s80_s27 }
  0x12   :  { %s12036_s29 = sld [smem:[#allocation43_spill]] }
  0x18   :  { %s10791_s0 = scalar_lea.hbm %s12036_s29, 192 }
  0x19   :  { %p10792_p0 = scmp.ne.s32.totalorder %s12036_s29, %s10791_s0  ;;  %p10795_p1 = scmp.lt.u32.totalorder %s10791_s0, %s12036_s29 }
  0x1b   :  { %p10797_p2 = pnand %p10795_p1, %p10792_p0 }
  0x1d   :  { %10800 = shalt.err (!%p10797_p2)
}
  0x1e   :  { %s10801_s23 = scalar_lea.vmem %s59_s25, 192  ;;  %p10806_p4 = scmp.lt.s32.totalorder %s59_s25, %s59_s25 }
  0x1f   :  { %p10802_p3 = scmp.ne.s32.totalorder %s59_s25, %s10801_s23  ;;  %p10807_p5 = scmp.lt.s32.totalorder %s10801_s23, %s10801_s23 }
  0x21   :  { %p10808_p6 = por %p10807_p5, %p10806_p4 }
  0x23   :  { %p10809_p7 = pnand %p10808_p6, %p10802_p3 }
  0x25   :  { %10812 = shalt.err (!%p10809_p7)
}
  0x26   :  { %61 = dma.hbm_to_vmem [thread:$0]  %s12036_s29, 192, %s59_s25, [#allocation6]  }
  0x27   :  { %s12037_s3 = sld [smem:[#allocation45_spill]] }
  0x2d   :  { %s10813_s28 = scalar_lea.hbm %s12037_s3, 64 }
  0x2e   :  { %p10814_p8 = scmp.ne.s32.totalorder %s12037_s3, %s10813_s28  ;;  %p10817_p9 = scmp.lt.u32.totalorder %s10813_s28, %s12037_s3 }
  0x30   :  { %p10819_p10 = pnand %p10817_p9, %p10814_p8 }
  0x32   :  { %10822 = shalt.err (!%p10819_p10)
}
  0x33   :  { %s10823_s22 = scalar_lea.vmem %s81_s27, 64  ;;  %p10828_p12 = scmp.lt.s32.totalorder %s81_s27, %s81_s27 }
  0x34   :  { %p10824_p11 = scmp.ne.s32.totalorder %s81_s27, %s10823_s22  ;;  %p10829_p13 = scmp.lt.s32.totalorder %s10823_s22, %s10823_s22 }
  0x36   :  { %p10830_p0 = por %p10829_p13, %p10828_p12 }
  0x38   :  { %p10831_p1 = pnand %p10830_p0, %p10824_p11 }
  0x3a   :  { %10834 = shalt.err (!%p10831_p1)
}
  0x3b   :  { %83 = dma.hbm_to_vmem [thread:$0]  %s12037_s3, 64, %s81_s27, [#allocation9]  }
  0x3c   :  { %s11209_s23 = smov [#allocation11]   ;;  %s11210_s24 = smov [#allocation14]  }
  0x3d   :  { %s101_s1 = sshll.u32 %s11209_s23, 4  ;;  %s124_s2 = sshll.u32 %s11210_s24, 4  ;;  %s102_s1 = int_to_ptr.vmem [resolvable:$true] %s101_s1  ;;  %s125_s2 = int_to_ptr.vmem [resolvable:$true] %s124_s2 }
  0x3e   :  { %s10835_s4 = scalar_lea.hbm %s12008_s7, 16384 }
  0x3f   :  { %p10836_p2 = scmp.ne.s32.totalorder %s12008_s7, %s10835_s4  ;;  %p10839_p3 = scmp.lt.u32.totalorder %s10835_s4, %s12008_s7 }
  0x41   :  { %p10841_p4 = pnand %p10839_p3, %p10836_p2 }
  0x43   :  { %10844 = shalt.err (!%p10841_p4)
}
  0x44   :  { %s10845_s27 = scalar_lea.vmem %s102_s1, 16384  ;;  %p10850_p6 = scmp.lt.s32.totalorder %s102_s1, %s102_s1 }
  0x45   :  { %p10846_p5 = scmp.ne.s32.totalorder %s102_s1, %s10845_s27  ;;  %p10851_p7 = scmp.lt.s32.totalorder %s10845_s27, %s10845_s27 }
  0x47   :  { %p10852_p8 = por %p10851_p7, %p10850_p6 }
  0x49   :  { %p10853_p9 = pnand %p10852_p8, %p10846_p5 }
  0x4b   :  { %10856 = shalt.err (!%p10853_p9)
}
  0x4c   :  { %s12028_s3 = smov 256   ;;  %s11212_s25 = smov 16  }
  0x4d   :  { %107 = dma.hbm_to_vmem [thread:$0]  %s12008_s7, 16384, %s102_s1, [#allocation12], %s12028_s3, %s12028_s3, %s11212_s25  }
  0x4e   :  { %s10857_s28 = scalar_lea.hbm %s12010_s9, 64 }
  0x4f   :  { %p10858_p10 = scmp.ne.s32.totalorder %s12010_s9, %s10857_s28  ;;  %p10861_p11 = scmp.lt.u32.totalorder %s10857_s28, %s12010_s9 }
  0x51   :  { %p10863_p12 = pnand %p10861_p11, %p10858_p10 }
  0x53   :  { %10866 = shalt.err (!%p10863_p12)
}
  0x54   :  { %s10867_s22 = scalar_lea.vmem %s125_s2, 64  ;;  %p10872_p0 = scmp.lt.s32.totalorder %s125_s2, %s125_s2 }
  0x55   :  { %p10868_p13 = scmp.ne.s32.totalorder %s125_s2, %s10867_s22  ;;  %p10873_p1 = scmp.lt.s32.totalorder %s10867_s22, %s10867_s22 }
  0x57   :  { %p10874_p2 = por %p10873_p1, %p10872_p0 }
  0x59   :  { %p10875_p3 = pnand %p10874_p2, %p10868_p13 }
  0x5b   :  { %10878 = shalt.err (!%p10875_p3)
}
  0x5c   :  { %127 = dma.hbm_to_vmem [thread:$0]  %s12010_s9, 64, %s125_s2, [#allocation15]  }
  0x5d   :  { %s11213_s27 = smov [#allocation17]   ;;  %s10879_s26 = scalar_lea.hbm %s12012_s11, 8192 }
  0x5e   :  { %s143_s29 = sshll.u32 %s11213_s27, 4  ;;  %p10880_p4 = scmp.ne.s32.totalorder %s12012_s11, %s10879_s26  ;;  %s144_s29 = int_to_ptr.vmem [resolvable:$true] %s143_s29 }
  0x5f   :  { %p10883_p5 = scmp.lt.u32.totalorder %s10879_s26, %s12012_s11 }
  0x61   :  { %p10885_p6 = pnand %p10883_p5, %p10880_p4 }
  0x63   :  { %10888 = shalt.err (!%p10885_p6)
}
  0x64   :  { %s10889_s5 = scalar_lea.vmem %s144_s29, 8192  ;;  %p10894_p8 = scmp.lt.s32.totalorder %s144_s29, %s144_s29 }
  0x65   :  { %p10890_p7 = scmp.ne.s32.totalorder %s144_s29, %s10889_s5  ;;  %p10895_p9 = scmp.lt.s32.totalorder %s10889_s5, %s10889_s5 }
  0x67   :  { %p10896_p10 = por %p10895_p9, %p10894_p8 }
  0x69   :  { %p10897_p11 = pnand %p10896_p10, %p10890_p7 }
  0x6b   :  { %10900 = shalt.err (!%p10897_p11)
}
  0x6c   :  { %s11214_s9 = smov 128   ;;  %s11215_s2 = smov 8  }
  0x6d   :  { %149 = dma.hbm_to_vmem [thread:$0]  %s12012_s11, 8192, %s144_s29, [#allocation18], %s11214_s9, %s11214_s9, %s11215_s2  }
  0x6e   :  { %s11216_s1 = smov [#allocation20]   ;;  %s11217_s23 = smov [#allocation23]  }
  0x6f   :  { %s166_s27 = sshll.u32 %s11216_s1, 4  ;;  %s185_s24 = sshll.u32 %s11217_s23, 4  ;;  %s167_s27 = int_to_ptr.vmem [resolvable:$true] %s166_s27  ;;  %s186_s24 = int_to_ptr.vmem [resolvable:$true] %s185_s24 }
  0x70   :  { %s10901_s4 = scalar_lea.hbm %s12014_s13, 32 }
  0x71   :  { %p10902_p12 = scmp.ne.s32.totalorder %s12014_s13, %s10901_s4  ;;  %p10905_p13 = scmp.lt.u32.totalorder %s10901_s4, %s12014_s13 }
  0x73   :  { %p10907_p0 = pnand %p10905_p13, %p10902_p12 }
  0x75   :  { %10910 = shalt.err (!%p10907_p0)
}
  0x76   :  { %s10911_s11 = scalar_lea.vmem %s167_s27, 32  ;;  %p10916_p2 = scmp.lt.s32.totalorder %s167_s27, %s167_s27 }
  0x77   :  { %p10912_p1 = scmp.ne.s32.totalorder %s167_s27, %s10911_s11  ;;  %p10917_p3 = scmp.lt.s32.totalorder %s10911_s11, %s10911_s11 }
  0x79   :  { %p10918_p4 = por %p10917_p3, %p10916_p2 }
  0x7b   :  { %p10919_p5 = pnand %p10918_p4, %p10912_p1 }
  0x7d   :  { %10922 = shalt.err (!%p10919_p5)
}
  0x7e   :  { %169 = dma.hbm_to_vmem [thread:$0]  %s12014_s13, 32, %s167_s27, [#allocation21]  }
  0x7f   :  { %s10923_s23 = scalar_lea.hbm %s12016_s15, 4096 }
  0x80   :  { %p10924_p6 = scmp.ne.s32.totalorder %s12016_s15, %s10923_s23  ;;  %p10927_p7 = scmp.lt.u32.totalorder %s10923_s23, %s12016_s15 }
  0x82   :  { %p10929_p8 = pnand %p10927_p7, %p10924_p6 }
  0x84   :  { %10932 = shalt.err (!%p10929_p8)
}
  0x85   :  { %s10933_s30 = scalar_lea.vmem %s186_s24, 4096  ;;  %p10938_p10 = scmp.lt.s32.totalorder %s186_s24, %s186_s24 }
  0x86   :  { %p10934_p9 = scmp.ne.s32.totalorder %s186_s24, %s10933_s30  ;;  %p10939_p11 = scmp.lt.s32.totalorder %s10933_s30, %s10933_s30 }
  0x88   :  { %p10940_p12 = por %p10939_p11, %p10938_p10 }
  0x8a   :  { %p10941_p13 = pnand %p10940_p12, %p10934_p9 }
  0x8c   :  { %10944 = shalt.err (!%p10941_p13)
}
  0x8d   :  { %191 = dma.hbm_to_vmem [thread:$0]  %s12016_s15, 4096, %s186_s24, [#allocation24], %s11214_s9, %s11214_s9, %s11215_s2  }
  0x8e   :  { %s11218_s0 = smov [#allocation26]   ;;  %s11219_s11 = smov [#allocation2]  }
  0x8f   :  { %s208_s5 = sshll.u32 %s11218_s0, 4  ;;  %s45_s29 = sshll.u32 %s11219_s11, 4  ;;  %s209_s5 = int_to_ptr.vmem [resolvable:$true] %s208_s5  ;;  %s46_s29 = int_to_ptr.vmem [resolvable:$true] %s45_s29 }
  0x90   :  { %s10945_s1 = scalar_lea.hbm %s12018_s17, 32 }
  0x91   :  { %p10946_p0 = scmp.ne.s32.totalorder %s12018_s17, %s10945_s1  ;;  %p10949_p1 = scmp.lt.u32.totalorder %s10945_s1, %s12018_s17 }
  0x93   :  { %p10951_p2 = pnand %p10949_p1, %p10946_p0 }
  0x95   :  { %10954 = shalt.err (!%p10951_p2)
}
  0x96   :  { %s10955_s15 = scalar_lea.vmem %s209_s5, 32  ;;  %p10960_p4 = scmp.lt.s32.totalorder %s209_s5, %s209_s5 }
  0x97   :  { %p10956_p3 = scmp.ne.s32.totalorder %s209_s5, %s10955_s15  ;;  %p10961_p5 = scmp.lt.s32.totalorder %s10955_s15, %s10955_s15 }
  0x99   :  { %p10962_p6 = por %p10961_p5, %p10960_p4 }
  0x9b   :  { %p10963_p7 = pnand %p10962_p6, %p10956_p3 }
  0x9d   :  { %10966 = shalt.err (!%p10963_p7)
}
  0x9e   :  { %211 = dma.hbm_to_vmem [thread:$0]  %s12018_s17, 32, %s209_s5, [#allocation27]  }
  0x9f   :  { %s12038_s30 = sld [smem:[#allocation42_spill]] }
  0xa5   :  { %s10967_s13 = scalar_lea.hbm %s12038_s30, 49152 }
  0xa6   :  { %p10968_p8 = scmp.ne.s32.totalorder %s12038_s30, %s10967_s13  ;;  %p10971_p9 = scmp.lt.u32.totalorder %s10967_s13, %s12038_s30 }
  0xa8   :  { %p10973_p10 = pnand %p10971_p9, %p10968_p8 }
  0xaa   :  { %10976 = shalt.err (!%p10973_p10)
}
  0xab   :  { %s10977_s7 = scalar_lea.vmem %s46_s29, 49152  ;;  %p10982_p12 = scmp.lt.s32.totalorder %s46_s29, %s46_s29 }
  0xac   :  { %p10978_p11 = scmp.ne.s32.totalorder %s46_s29, %s10977_s7  ;;  %p10983_p13 = scmp.lt.s32.totalorder %s10977_s7, %s10977_s7 }
  0xae   :  { %p10984_p0 = por %p10983_p13, %p10982_p12 }
  0xb0   :  { %p10985_p1 = pnand %p10984_p0, %p10978_p11 }
  0xb2   :  { %10988 = shalt.err (!%p10985_p1)
}
  0xb3   :  { %s11220_s17 = smov 768   ;;  %s11221_s5 = smov 48  }
  0xb4   :  { %51 = dma.hbm_to_vmem [thread:$0]  %s12038_s30, 49152, %s46_s29, [#allocation3], %s11220_s17, %s11220_s17, %s11221_s5  }
  0xb5   :  { %s11222_s3 = smov [#allocation7]   ;;  %s11223_s28 = smov [#allocation10]  }
  0xb6   :  { %s67_s26 = sshll.u32 %s11222_s3, 4  ;;  %s89_s15 = sshll.u32 %s11223_s28, 4  ;;  %s68_s26 = int_to_ptr.vmem [resolvable:$true] %s67_s26  ;;  %s90_s15 = int_to_ptr.vmem [resolvable:$true] %s89_s15 }
  0xb7   :  { %s12039_s24 = sld [smem:[#allocation44_spill]] }
  0xbd   :  { %s10989_s4 = scalar_lea.hbm %s12039_s24, 16384 }
  0xbe   :  { %p10990_p2 = scmp.ne.s32.totalorder %s12039_s24, %s10989_s4  ;;  %p10993_p3 = scmp.lt.u32.totalorder %s10989_s4, %s12039_s24 }
  0xc0   :  { %p10995_p4 = pnand %p10993_p3, %p10990_p2 }
  0xc2   :  { %10998 = shalt.err (!%p10995_p4)
}
  0xc3   :  { %s10999_s29 = scalar_lea.vmem %s68_s26, 16384  ;;  %p11004_p6 = scmp.lt.s32.totalorder %s68_s26, %s68_s26 }
  0xc4   :  { %p11000_p5 = scmp.ne.s32.totalorder %s68_s26, %s10999_s29  ;;  %p11005_p7 = scmp.lt.s32.totalorder %s10999_s29, %s10999_s29 }
  0xc6   :  { %p11006_p8 = por %p11005_p7, %p11004_p6 }
  0xc8   :  { %p11007_p9 = pnand %p11006_p8, %p11000_p5 }
  0xca   :  { %11010 = shalt.err (!%p11007_p9)
}
  0xcb   :  { %s12040_s30 = smov 256   ;;  %s11011_s1 = scalar_lea.hbm %s12007_s6, 16384 }
  0xcc   :  { %73 = dma.hbm_to_vmem [thread:$0]  %s12039_s24, 16384, %s68_s26, [#allocation6], %s12040_s30, %s12040_s30, %s11212_s25  }
  0xcd   :  { %p11012_p10 = scmp.ne.s32.totalorder %s12007_s6, %s11011_s1  ;;  %p11015_p11 = scmp.lt.u32.totalorder %s11011_s1, %s12007_s6 }
  0xcf   :  { %p11017_p12 = pnand %p11015_p11, %p11012_p10 }
  0xd1   :  { %11020 = shalt.err (!%p11017_p12)
}
  0xd2   :  { %s11021_s2 = scalar_lea.vmem %s90_s15, 16384  ;;  %p11026_p0 = scmp.lt.s32.totalorder %s90_s15, %s90_s15 }
  0xd3   :  { %p11022_p13 = scmp.ne.s32.totalorder %s90_s15, %s11021_s2  ;;  %p11027_p1 = scmp.lt.s32.totalorder %s11021_s2, %s11021_s2 }
  0xd5   :  { %p11028_p2 = por %p11027_p1, %p11026_p0 }
  0xd7   :  { %p11029_p3 = pnand %p11028_p2, %p11022_p13 }
  0xd9   :  { %11032 = shalt.err (!%p11029_p3)
}
  0xda   :  { %95 = dma.hbm_to_vmem [thread:$0]  %s12007_s6, 16384, %s90_s15, [#allocation9], %s12040_s30, %s12040_s30, %s11212_s25  }
  0xdb   :  { %s11224_s4 = smov [#allocation13]   ;;  %s11225_s27 = smov [#allocation16]  }
  0xdc   :  { %s114_s13 = sshll.u32 %s11224_s4, 4  ;;  %s134_s0 = sshll.u32 %s11225_s27, 4  ;;  %s115_s13 = int_to_ptr.vmem [resolvable:$true] %s114_s13  ;;  %s135_s0 = int_to_ptr.vmem [resolvable:$true] %s134_s0 }
  0xdd   :  { %s11033_s22 = scalar_lea.hbm %s12009_s8, 64 }
  0xde   :  { %p11034_p4 = scmp.ne.s32.totalorder %s12009_s8, %s11033_s22  ;;  %p11037_p5 = scmp.lt.u32.totalorder %s11033_s22, %s12009_s8 }
  0xe0   :  { %p11039_p6 = pnand %p11037_p5, %p11034_p4 }
  0xe2   :  { %11042 = shalt.err (!%p11039_p6)
}
  0xe3   :  { %s11043_s6 = scalar_lea.vmem %s115_s13, 64  ;;  %p11048_p8 = scmp.lt.s32.totalorder %s115_s13, %s115_s13 }
  0xe4   :  { %p11044_p7 = scmp.ne.s32.totalorder %s115_s13, %s11043_s6  ;;  %p11049_p9 = scmp.lt.s32.totalorder %s11043_s6, %s11043_s6 }
  0xe6   :  { %p11050_p10 = por %p11049_p9, %p11048_p8 }
  0xe8   :  { %p11051_p11 = pnand %p11050_p10, %p11044_p7 }
  0xea   :  { %11054 = shalt.err (!%p11051_p11)
}
  0xeb   :  { %117 = dma.hbm_to_vmem [thread:$0]  %s12009_s8, 64, %s115_s13, [#allocation12]  }
  0xec   :  { %s11055_s3 = scalar_lea.hbm %s12011_s10, 64 }
  0xed   :  { %p11056_p12 = scmp.ne.s32.totalorder %s12011_s10, %s11055_s3  ;;  %p11059_p13 = scmp.lt.u32.totalorder %s11055_s3, %s12011_s10 }
  0xef   :  { %p11061_p0 = pnand %p11059_p13, %p11056_p12 }
  0xf1   :  { %11064 = shalt.err (!%p11061_p0)
}
  0xf2   :  { %s11065_s24 = scalar_lea.vmem %s135_s0, 64  ;;  %p11070_p2 = scmp.lt.s32.totalorder %s135_s0, %s135_s0 }
  0xf3   :  { %p11066_p1 = scmp.ne.s32.totalorder %s135_s0, %s11065_s24  ;;  %p11071_p3 = scmp.lt.s32.totalorder %s11065_s24, %s11065_s24 }
  0xf5   :  { %p11072_p4 = por %p11071_p3, %p11070_p2 }
  0xf7   :  { %p11073_p5 = pnand %p11072_p4, %p11066_p1 }
  0xf9   :  { %11076 = shalt.err (!%p11073_p5)
}
  0xfa   :  { %137 = dma.hbm_to_vmem [thread:$0]  %s12011_s10, 64, %s135_s0, [#allocation15]  }
  0xfb   :  { %s11226_s13 = smov [#allocation19]   ;;  %s11227_s11 = smov [#allocation22]  }
  0xfc   :  { %s156_s27 = sshll.u32 %s11226_s13, 4  ;;  %s176_s29 = sshll.u32 %s11227_s11, 4  ;;  %s157_s27 = int_to_ptr.vmem [resolvable:$true] %s156_s27  ;;  %s177_s29 = int_to_ptr.vmem [resolvable:$true] %s176_s29 }
  0xfd   :  { %s11077_s17 = scalar_lea.hbm %s12013_s12, 32 }
  0xfe   :  { %p11078_p6 = scmp.ne.s32.totalorder %s12013_s12, %s11077_s17  ;;  %p11081_p7 = scmp.lt.u32.totalorder %s11077_s17, %s12013_s12 }
 0x100   :  { %p11083_p8 = pnand %p11081_p7, %p11078_p6 }
 0x102   :  { %11086 = shalt.err (!%p11083_p8)
}
 0x103   :  { %s11087_s10 = scalar_lea.vmem %s157_s27, 32  ;;  %p11092_p10 = scmp.lt.s32.totalorder %s157_s27, %s157_s27 }
 0x104   :  { %p11088_p9 = scmp.ne.s32.totalorder %s157_s27, %s11087_s10  ;;  %p11093_p11 = scmp.lt.s32.totalorder %s11087_s10, %s11087_s10 }
 0x106   :  { %p11094_p12 = por %p11093_p11, %p11092_p10 }
 0x108   :  { %p11095_p13 = pnand %p11094_p12, %p11088_p9 }
 0x10a   :  { %11098 = shalt.err (!%p11095_p13)
}
 0x10b   :  { %159 = dma.hbm_to_vmem [thread:$0]  %s12013_s12, 32, %s157_s27, [#allocation18]  }
 0x10c   :  { %s11099_s3 = scalar_lea.hbm %s12015_s14, 32 }
 0x10d   :  { %p11100_p0 = scmp.ne.s32.totalorder %s12015_s14, %s11099_s3  ;;  %p11103_p1 = scmp.lt.u32.totalorder %s11099_s3, %s12015_s14 }
 0x10f   :  { %p11105_p2 = pnand %p11103_p1, %p11100_p0 }
 0x111   :  { %11108 = shalt.err (!%p11105_p2)
}
 0x112   :  { %s11109_s24 = scalar_lea.vmem %s177_s29, 32  ;;  %p11114_p4 = scmp.lt.s32.totalorder %s177_s29, %s177_s29 }
 0x113   :  { %p11110_p3 = scmp.ne.s32.totalorder %s177_s29, %s11109_s24  ;;  %p11115_p5 = scmp.lt.s32.totalorder %s11109_s24, %s11109_s24 }
 0x115   :  { %p11116_p6 = por %p11115_p5, %p11114_p4 }
 0x117   :  { %p11117_p7 = pnand %p11116_p6, %p11110_p3 }
 0x119   :  { %11120 = shalt.err (!%p11117_p7)
}
 0x11a   :  { %179 = dma.hbm_to_vmem [thread:$0]  %s12015_s14, 32, %s177_s29, [#allocation21]  }
 0x11b   :  { %s11228_s4 = smov [#allocation25]   ;;  %s11229_s27 = smov [#allocation28]  }
 0x11c   :  { %s198_s13 = sshll.u32 %s11228_s4, 4  ;;  %s218_s11 = sshll.u32 %s11229_s27, 4  ;;  %s199_s13 = int_to_ptr.vmem [resolvable:$true] %s198_s13  ;;  %s219_s11 = int_to_ptr.vmem [resolvable:$true] %s218_s11 }
 0x11d   :  { %s11121_s17 = scalar_lea.hbm %s12017_s16, 32 }
 0x11e   :  { %p11122_p8 = scmp.ne.s32.totalorder %s12017_s16, %s11121_s17  ;;  %p11125_p9 = scmp.lt.u32.totalorder %s11121_s17, %s12017_s16 }
 0x120   :  { %p11127_p10 = pnand %p11125_p9, %p11122_p8 }
 0x122   :  { %11130 = shalt.err (!%p11127_p10)
}
 0x123   :  { %s11131_s14 = scalar_lea.vmem %s199_s13, 32  ;;  %p11136_p12 = scmp.lt.s32.totalorder %s199_s13, %s199_s13 }
 0x124   :  { %p11132_p11 = scmp.ne.s32.totalorder %s199_s13, %s11131_s14  ;;  %p11137_p13 = scmp.lt.s32.totalorder %s11131_s14, %s11131_s14 }
 0x126   :  { %p11138_p0 = por %p11137_p13, %p11136_p12 }
 0x128   :  { %p11139_p1 = pnand %p11138_p0, %p11132_p11 }
 0x12a   :  { %11142 = shalt.err (!%p11139_p1)
}
 0x12b   :  { %201 = dma.hbm_to_vmem [thread:$0]  %s12017_s16, 32, %s199_s13, [#allocation24]  }
 0x12c   :  { %s11143_s30 = scalar_lea.hbm %s12019_s18, 32 }
 0x12d   :  { %p11144_p2 = scmp.ne.s32.totalorder %s12019_s18, %s11143_s30  ;;  %p11147_p3 = scmp.lt.u32.totalorder %s11143_s30, %s12019_s18 }
 0x12f   :  { %p11149_p4 = pnand %p11147_p3, %p11144_p2 }
 0x131   :  { %11152 = shalt.err (!%p11149_p4)
}
 0x132   :  { %s11153_s2 = scalar_lea.vmem %s219_s11, 32  ;;  %p11158_p6 = scmp.lt.s32.totalorder %s219_s11, %s219_s11 }
 0x133   :  { %p11154_p5 = scmp.ne.s32.totalorder %s219_s11, %s11153_s2  ;;  %p11159_p7 = scmp.lt.s32.totalorder %s11153_s2, %s11153_s2 }
 0x135   :  { %p11160_p8 = por %p11159_p7, %p11158_p6 }
 0x137   :  { %p11161_p9 = pnand %p11160_p8, %p11154_p5 }
 0x139   :  { %11164 = shalt.err (!%p11161_p9)
}
 0x13a   :  { %221 = dma.hbm_to_vmem [thread:$0]  %s12019_s18, 32, %s219_s11, [#allocation27]  }
 0x13b   :  { %11187 = dma.done.wait [#allocation3], 49152  }
 0x13c   :  { %11188 = vsyncadd [#allocation3], 4294918144 }
 0x13d   :  { %11189 = dma.done.wait [#allocation6], 16576  }
 0x13e   :  { %11190 = vsyncadd [#allocation6], 4294950720 }
 0x13f   :  { %11191 = dma.done.wait [#allocation9], 16448  }
 0x140   :  { %11192 = vsyncadd [#allocation9], 4294950848 }
 0x141   :  { %11193 = dma.done.wait [#allocation12], 16448  }
 0x142   :  { %11194 = vsyncadd [#allocation12], 4294950848 }
 0x143   :  { %11195 = dma.done.wait [#allocation15], 128  }
 0x144   :  { %11196 = vsyncadd [#allocation15], 4294967168 }
 0x145   :  { %11197 = dma.done.wait [#allocation18], 8224  }
 0x146   :  { %11198 = vsyncadd [#allocation18], 4294959072 }
 0x147   :  { %11199 = dma.done.wait [#allocation21], 64  }
 0x148   :  { %11200 = vsyncadd [#allocation21], 4294967232 }
 0x149   :  { %11201 = dma.done.wait [#allocation24], 4128  }
 0x14a   :  { %11202 = vsyncadd [#allocation24], 4294963168 }
 0x14b   :  { %11203 = dma.done.wait [#allocation27], 64  }
 0x14c   :  { %11204 = vsyncadd [#allocation27], 4294967232  ;;  %v9435_v0 = vld [vmem:[#allocation2 + $0x4] ss:$48 sps:$4 sm:$0xff]   ;;  %v9437_v1 = vld [vmem:[#allocation2] ss:$48 sps:$4 sm:$0xff]  }
 0x14d   :  { %2670 = vmatprep.subr.bf16.mxu0 %v9435_v0  ;;  %v9438_v2 = vld [vmem:[#allocation2 + $0x64] ss:$48 sps:$4 sm:$0xff]   ;;  %v9440_v3 = vld [vmem:[#allocation2 + $0x60] ss:$48 sps:$4 sm:$0xff]   ;;  %v9449_v6 = vld [vmem:[#allocation2 + $0xc] ss:$48 sps:$4 sm:$0xff]  }
 0x14e   :  { %2671 = vmatpush1.bf16.msra.mxu0 %v9437_v1  ;;  %v9441_v4 = vld [vmem:[#allocation2 + $0xc4] ss:$48 sps:$4 sm:$0xff]   ;;  %v9443_v5 = vld [vmem:[#allocation2 + $0xc0] ss:$48 sps:$4 sm:$0xff]   ;;  %v9452_v7 = vld [vmem:[#allocation2 + $0x8] ss:$48 sps:$4 sm:$0xff]   ;;  %2756 = vmatprep.subr.bf16.mxu1 %v9449_v6 }
 0x14f   :  { %2672 = vmatprep.subr.bf16.mxu0 %v9438_v2  ;;  %v9444_v8 = vld [vmem:[#allocation2 + $0x124] ss:$48 sps:$4 sm:$0xff]   ;;  %v9455_v9 = vld [vmem:[#allocation2 + $0x6c] ss:$48 sps:$4 sm:$0xff]   ;;  %2757 = vmatpush1.bf16.msra.mxu1 %v9452_v7  ;;  %v9458_v10 = vld [vmem:[#allocation2 + $0x68] ss:$48 sps:$4 sm:$0xff]  }
 0x150   :  { %v9446_v11 = vld [vmem:[#allocation2 + $0x120] ss:$48 sps:$4 sm:$0xff]   ;;  %2758 = vmatprep.subr.bf16.mxu1 %v9455_v9  ;;  %v9447_v12 = vld [vmem:[#allocation2 + $0x184] ss:$48 sps:$4 sm:$0xff]   ;;  %v9461_v13 = vld [vmem:[#allocation2 + $0xcc] ss:$48 sps:$4 sm:$0xff]  }
 0x151   :  { %v9464_v14 = vld [vmem:[#allocation2 + $0xc8] ss:$48 sps:$4 sm:$0xff]   ;;  %v9451_v15 = vld [vmem:[#allocation2 + $0x180] ss:$48 sps:$4 sm:$0xff]   ;;  %v9467_v16 = vld [vmem:[#allocation2 + $0x12c] ss:$48 sps:$4 sm:$0xff]  }
 0x152   :  { %2673 = vmatpush1.bf16.msra.mxu0 %v9440_v3  ;;  %v9453_v17 = vld [vmem:[#allocation2 + $0x1e4] ss:$48 sps:$4 sm:$0xff]   ;;  %v9457_v18 = vld [vmem:[#allocation2 + $0x1e0] ss:$48 sps:$4 sm:$0xff]   ;;  %v9470_v19 = vld [vmem:[#allocation2 + $0x128] ss:$48 sps:$4 sm:$0xff]  }
 0x153   :  { %2674 = vmatprep.subr.bf16.mxu0 %v9441_v4  ;;  %2759 = vmatpush1.bf16.msra.mxu1 %v9458_v10  ;;  %v9473_v20 = vld [vmem:[#allocation2 + $0x18c] ss:$48 sps:$4 sm:$0xff]   ;;  %v9459_v21 = vld [vmem:[#allocation2 + $0x244] ss:$48 sps:$4 sm:$0xff]   ;;  %v9476_v22 = vld [vmem:[#allocation2 + $0x188] ss:$48 sps:$4 sm:$0xff]  }
 0x154   :  { %2760 = vmatprep.subr.bf16.mxu1 %v9461_v13  ;;  %v9463_v23 = vld [vmem:[#allocation2 + $0x240] ss:$48 sps:$4 sm:$0xff]   ;;  %v9479_v24 = vld [vmem:[#allocation2 + $0x1ec] ss:$48 sps:$4 sm:$0xff]   ;;  %v9465_v25 = vld [vmem:[#allocation2 + $0x2a4] ss:$48 sps:$4 sm:$0xff]  }
 0x155   :  { %v9469_v26 = vld [vmem:[#allocation2 + $0x2a0] ss:$48 sps:$4 sm:$0xff]   ;;  %v9482_v27 = vld [vmem:[#allocation2 + $0x1e8] ss:$48 sps:$4 sm:$0xff]   ;;  %v9485_v28 = vld [vmem:[#allocation2 + $0x24c] ss:$48 sps:$4 sm:$0xff]  }
 0x156   :  { %2675 = vmatpush1.bf16.msra.mxu0 %v9443_v5  ;;  %v9471_v29 = vld [vmem:[#allocation2 + $0x304] ss:$48 sps:$4 sm:$0xff]   ;;  %v9488_v30 = vld [vmem:[#allocation2 + $0x248] ss:$48 sps:$4 sm:$0xff]   ;;  %v9475_v31 = vld [vmem:[#allocation2 + $0x300] ss:$48 sps:$4 sm:$0xff]  }
 0x157   :  { %2676 = vmatprep.subr.bf16.mxu0 %v9444_v8  ;;  %2761 = vmatpush1.bf16.msra.mxu1 %v9464_v14  ;;  %v9491_v32 = vld [vmem:[#allocation2 + $0x2ac] ss:$48 sps:$4 sm:$0xff]   ;;  %v9477_v33 = vld [vmem:[#allocation2 + $0x364] ss:$48 sps:$4 sm:$0xff]   ;;  %v9481_v34 = vld [vmem:[#allocation2 + $0x360] ss:$48 sps:$4 sm:$0xff]  }
 0x158   :  { %2762 = vmatprep.subr.bf16.mxu1 %v9467_v16  ;;  %v9494_v35 = vld [vmem:[#allocation2 + $0x2a8] ss:$48 sps:$4 sm:$0xff]   ;;  %v9497_v36 = vld [vmem:[#allocation2 + $0x30c] ss:$48 sps:$4 sm:$0xff]   ;;  %v9483_v37 = vld [vmem:[#allocation2 + $0x3c4] ss:$48 sps:$4 sm:$0xff]  }
 0x159   :  { %v9500_v38 = vld [vmem:[#allocation2 + $0x308] ss:$48 sps:$4 sm:$0xff]   ;;  %s12041_s12 = sld [smem:[#allocation41_spill]]  ;;  %v9487_v40 = vld [vmem:[#allocation2 + $0x3c0] ss:$48 sps:$4 sm:$0xff]   ;;  %vm11231_vm0 = vmmov 0  }
 0x15a   :  { %2677 = vmatpush1.bf16.msra.mxu0 %v9446_v11  ;;  %v9503_v41 = vld [vmem:[#allocation2 + $0x36c] ss:$48 sps:$4 sm:$0xff]   ;;  %v9489_v42 = vld [vmem:[#allocation2 + $0x424] ss:$48 sps:$4 sm:$0xff]   ;;  %v9506_v43 = vld [vmem:[#allocation2 + $0x368] ss:$48 sps:$4 sm:$0xff]  }
 0x15b   :  { %2678 = vmatprep.subr.bf16.mxu0 %v9447_v12  ;;  %2763 = vmatpush1.bf16.msra.mxu1 %v9470_v19  ;;  %v9493_v44 = vld [vmem:[#allocation2 + $0x420] ss:$48 sps:$4 sm:$0xff]   ;;  %v9509_v45 = vld [vmem:[#allocation2 + $0x3cc] ss:$48 sps:$4 sm:$0xff]   ;;  %v9495_v46 = vld [vmem:[#allocation2 + $0x484] ss:$48 sps:$4 sm:$0xff]  }
 0x15c   :  { %2764 = vmatprep.subr.bf16.mxu1 %v9473_v20  ;;  %v9512_v47 = vld [vmem:[#allocation2 + $0x3c8] ss:$48 sps:$4 sm:$0xff]   ;;  %v9499_v48 = vld [vmem:[#allocation2 + $0x480] ss:$48 sps:$4 sm:$0xff]   ;;  %v9515_v49 = vld [vmem:[#allocation2 + $0x42c] ss:$48 sps:$4 sm:$0xff]  }
 0x15d   :  { %v9501_v50 = vld [vmem:[#allocation2 + $0x4e4] ss:$48 sps:$4 sm:$0xff]   ;;  %v9518_v51 = vld [vmem:[#allocation2 + $0x428] ss:$48 sps:$4 sm:$0xff]   ;;  %v9505_v52 = vld [vmem:[#allocation2 + $0x4e0] ss:$48 sps:$4 sm:$0xff]  }
 0x15e   :  { %2679 = vmatpush1.bf16.msra.mxu0 %v9451_v15  ;;  %v9524_v53 = vld [vmem:[#allocation2 + $0x48c] ss:$48 sps:$4 sm:$0xff]   ;;  %v9507_v54 = vld [vmem:[#allocation2 + $0x544] ss:$48 sps:$4 sm:$0xff]   ;;  %v9527_v55 = vld [vmem:[#allocation2 + $0x488] ss:$48 sps:$4 sm:$0xff]  }
 0x15f   :  { %2680 = vmatprep.subr.bf16.mxu0 %v9453_v17  ;;  %2765 = vmatpush1.bf16.msra.mxu1 %v9476_v22  ;;  %v11567_v39 = vld [vmem:[%s12041_s12 + $0x4] ss:$16 sps:$4 sm:$0xff]   ;;  %v9511_v56 = vld [vmem:[#allocation2 + $0x540] ss:$48 sps:$4 sm:$0xff]   ;;  %v9531_v57 = vld [vmem:[#allocation2 + $0x4ec] ss:$48 sps:$4 sm:$0xff]  }
 0x160   :  { %2766 = vmatprep.subr.bf16.mxu1 %v9479_v24  ;;  %2702 = vmatprep.mubr.bf16.mxu0 %v11567_v39  ;;  %v9513_v58 = vld [vmem:[#allocation2 + $0x5a4] ss:$48 sps:$4 sm:$0xff]   ;;  %v9533_v59 = vld [vmem:[#allocation2 + $0x4e8] ss:$48 sps:$4 sm:$0xff]   ;;  %v9517_v60 = vld [vmem:[#allocation2 + $0x5a0] ss:$48 sps:$4 sm:$0xff]  }
 0x161   :  { %2788 = vmatprep.mubr.bf16.mxu1 %v11567_v39  ;;  %v9537_v61 = vld [vmem:[#allocation2 + $0x54c] ss:$48 sps:$4 sm:$0xff]   ;;  %v9523_v62 = vld [vmem:[#allocation2 + $0x604] ss:$48 sps:$4 sm:$0xff]   ;;  %v11574_v63 = vld [vmem:[%s12041_s12] ss:$16 sps:$4 sm:$0xff]  }
 0x162   :  { %2681 = vmatpush1.bf16.msra.mxu0 %v9457_v18  ;;  %v9539_v0 = vld [vmem:[#allocation2 + $0x548] ss:$48 sps:$4 sm:$0xff]   ;;  %v9521_v1 = vld [vmem:[#allocation2 + $0x600] ss:$48 sps:$4 sm:$0xff]   ;;  %v9543_v2 = vld [vmem:[#allocation2 + $0x5ac] ss:$48 sps:$4 sm:$0xff]  }
 0x163   :  { %2682 = vmatprep.subr.bf16.mxu0 %v9459_v21  ;;  %2767 = vmatpush1.bf16.msra.mxu1 %v9482_v27  ;;  %v9530_v3 = vld [vmem:[#allocation2 + $0x664] ss:$48 sps:$4 sm:$0xff]   ;;  %v9545_v4 = vld [vmem:[#allocation2 + $0x5a8] ss:$48 sps:$4 sm:$0xff]   ;;  %v9528_v5 = vld [vmem:[#allocation2 + $0x660] ss:$48 sps:$4 sm:$0xff]  }
 0x164   :  { %2768 = vmatprep.subr.bf16.mxu1 %v9485_v28  ;;  %v9551_v6 = vld [vmem:[#allocation2 + $0x60c] ss:$48 sps:$4 sm:$0xff]   ;;  %v9536_v7 = vld [vmem:[#allocation2 + $0x6c4] ss:$48 sps:$4 sm:$0xff]   ;;  %v9549_v8 = vld [vmem:[#allocation2 + $0x608] ss:$48 sps:$4 sm:$0xff]  }
 0x165   :  { %v9534_v9 = vld [vmem:[#allocation2 + $0x6c0] ss:$48 sps:$4 sm:$0xff]   ;;  %v9557_v10 = vld [vmem:[#allocation2 + $0x66c] ss:$48 sps:$4 sm:$0xff]   ;;  %v9542_v11 = vld [vmem:[#allocation2 + $0x724] ss:$48 sps:$4 sm:$0xff]  }
 0x166   :  { %2683 = vmatpush1.bf16.msra.mxu0 %v9463_v23  ;;  %v9555_v12 = vld [vmem:[#allocation2 + $0x668] ss:$48 sps:$4 sm:$0xff]   ;;  %v9540_v13 = vld [vmem:[#allocation2 + $0x720] ss:$48 sps:$4 sm:$0xff]   ;;  %v9563_v14 = vld [vmem:[#allocation2 + $0x6cc] ss:$48 sps:$4 sm:$0xff]  }
 0x167   :  { %2684 = vmatprep.subr.bf16.mxu0 %v9465_v25  ;;  %2769 = vmatpush1.bf16.msra.mxu1 %v9488_v30  ;;  %v9548_v15 = vld [vmem:[#allocation2 + $0x784] ss:$48 sps:$4 sm:$0xff]   ;;  %v9561_v16 = vld [vmem:[#allocation2 + $0x6c8] ss:$48 sps:$4 sm:$0xff]   ;;  %v9546_v17 = vld [vmem:[#allocation2 + $0x780] ss:$48 sps:$4 sm:$0xff]  }
 0x168   :  { %2770 = vmatprep.subr.bf16.mxu1 %v9491_v32  ;;  %v9569_v18 = vld [vmem:[#allocation2 + $0x72c] ss:$48 sps:$4 sm:$0xff]   ;;  %v9554_v19 = vld [vmem:[#allocation2 + $0x7e4] ss:$48 sps:$4 sm:$0xff]   ;;  %v9567_v20 = vld [vmem:[#allocation2 + $0x728] ss:$48 sps:$4 sm:$0xff]  }
 0x169   :  { %v11581_v21 = vld [vmem:[%s12041_s12 + $0xc] ss:$16 sps:$4 sm:$0xff]   ;;  %v9552_v22 = vld [vmem:[#allocation2 + $0x7e0] ss:$48 sps:$4 sm:$0xff]   ;;  %v9560_v24 = vld [vmem:[#allocation2 + $0x844] ss:$48 sps:$4 sm:$0xff]  }
 0x16a   :  { %2685 = vmatpush1.bf16.msra.mxu0 %v9469_v26  ;;  %v9575_v23 = vld [vmem:[#allocation2 + $0x78c] ss:$48 sps:$4 sm:$0xff]   ;;  %v9573_v25 = vld [vmem:[#allocation2 + $0x788] ss:$48 sps:$4 sm:$0xff]   ;;  %v9558_v26 = vld [vmem:[#allocation2 + $0x840] ss:$48 sps:$4 sm:$0xff]  }
 0x16b   :  { %2686 = vmatprep.subr.bf16.mxu0 %v9471_v29  ;;  %2771 = vmatpush1.bf16.msra.mxu1 %v9494_v35  ;;  %v9581_v27 = vld [vmem:[#allocation2 + $0x7ec] ss:$48 sps:$4 sm:$0xff]   ;;  %v9566_v28 = vld [vmem:[#allocation2 + $0x8a4] ss:$48 sps:$4 sm:$0xff]   ;;  %v9579_v29 = vld [vmem:[#allocation2 + $0x7e8] ss:$48 sps:$4 sm:$0xff]  }
 0x16c   :  { %2772 = vmatprep.subr.bf16.mxu1 %v9497_v36  ;;  %v9564_v30 = vld [vmem:[#allocation2 + $0x8a0] ss:$48 sps:$4 sm:$0xff]   ;;  %v9572_v32 = vld [vmem:[#allocation2 + $0x904] ss:$48 sps:$4 sm:$0xff]   ;;  %v9593_v35 = vld [vmem:[#allocation2 + $0x8ac] ss:$48 sps:$4 sm:$0xff]  }
 0x16d   :  { %v9578_v36 = vld [vmem:[#allocation2 + $0x964] ss:$48 sps:$4 sm:$0xff]   ;;  %vm3327_vm1 = vcmask 1043456   ;;  %vm3297_vm2 = vcmask 64512   ;;  %vm3734_vm3 = vcmask 1041409   ;;  %s12042_s23 = sld [smem:[#allocation40_spill]] }
 0x16e   :  { %2687 = vmatpush1.bf16.msra.mxu0 %v9475_v31  ;;  %v9587_v31 = vld [vmem:[#allocation2 + $0x84c] ss:$48 sps:$4 sm:$0xff]   ;;  %s11234_s26 = smov [#allocation29]  }
 0x16f   :  { %2688 = vmatprep.subr.bf16.mxu0 %v9477_v33  ;;  %2773 = vmatpush1.bf16.msra.mxu1 %v9500_v38  ;;  %v9585_v33 = vld [vmem:[#allocation2 + $0x848] ss:$48 sps:$4 sm:$0xff]   ;;  %v9576_v38 = vld [vmem:[#allocation2 + $0x960] ss:$48 sps:$4 sm:$0xff]   ;;  %s8244_s18 = sshll.u32 %s11234_s26, 4  ;;  %s8245_s18 = int_to_ptr.vmem [resolvable:$true] %s8244_s18 }
 0x170   :  { %2774 = vmatprep.subr.bf16.mxu1 %v9503_v41  ;;  %v9584_v41 = vld [vmem:[#allocation2 + $0x9c4] ss:$48 sps:$4 sm:$0xff]   ;;  %s11165_s24 = scalar_lea.vmem %s8245_s18, 32  ;;  %p11170_p11 = scmp.lt.s32.totalorder %s8245_s18, %s8245_s18 }
 0x171   :  { %p11166_p10 = scmp.ne.s32.totalorder %s8245_s18, %s11165_s24  ;;  %p11171_p12 = scmp.lt.s32.totalorder %s11165_s24, %s11165_s24 }
 0x172   :  { %2689 = vmatpush1.bf16.msra.mxu0 %v9481_v34  ;;  %v9570_v34 = vld [vmem:[#allocation2 + $0x900] ss:$48 sps:$4 sm:$0xff]  }
 0x173   :  { %2690 = vmatprep.subr.bf16.mxu0 %v9483_v37  ;;  %2775 = vmatpush1.bf16.msra.mxu1 %v9506_v43  ;;  %v9591_v37 = vld [vmem:[#allocation2 + $0x8a8] ss:$48 sps:$4 sm:$0xff]   ;;  %v9582_v43 = vld [vmem:[#allocation2 + $0x9c0] ss:$48 sps:$4 sm:$0xff]   ;;  %p11172_p13 = por %p11171_p12, %p11170_p11 }
 0x174   :  { %2776 = vmatprep.subr.bf16.mxu1 %v9509_v45  ;;  %v9590_v45 = vld [vmem:[#allocation2 + $0xa24] ss:$48 sps:$4 sm:$0xff]  }
 0x175   :  { %p11173_p0 = pnand %p11172_p13, %p11166_p10 }
 0x176   :  { %2691 = vmatpush1.bf16.msra.mxu0 %v9487_v40  ;;  %v9599_v40 = vld [vmem:[#allocation2 + $0x90c] ss:$48 sps:$4 sm:$0xff]  }
 0x177   :  { %2692 = vmatprep.subr.bf16.mxu0 %v9489_v42  ;;  %2777 = vmatpush1.bf16.msra.mxu1 %v9512_v47  ;;  %v9597_v42 = vld [vmem:[#allocation2 + $0x908] ss:$48 sps:$4 sm:$0xff]   ;;  %v9588_v47 = vld [vmem:[#allocation2 + $0xa20] ss:$48 sps:$4 sm:$0xff]  }
 0x178   :  { %2778 = vmatprep.subr.bf16.mxu1 %v9515_v49  ;;  %v9596_v49 = vld [vmem:[#allocation2 + $0xa84] ss:$48 sps:$4 sm:$0xff]  }
 0x17a   :  { %2693 = vmatpush1.bf16.msra.mxu0 %v9493_v44  ;;  %v9605_v44 = vld [vmem:[#allocation2 + $0x96c] ss:$48 sps:$4 sm:$0xff]  }
 0x17b   :  { %2694 = vmatprep.subr.bf16.mxu0 %v9495_v46  ;;  %2779 = vmatpush1.bf16.msra.mxu1 %v9518_v51  ;;  %v9603_v46 = vld [vmem:[#allocation2 + $0x968] ss:$48 sps:$4 sm:$0xff]   ;;  %v9594_v51 = vld [vmem:[#allocation2 + $0xa80] ss:$48 sps:$4 sm:$0xff]  }
 0x17c   :  { %2780 = vmatprep.subr.bf16.mxu1 %v9524_v53  ;;  %v9602_v53 = vld [vmem:[#allocation2 + $0xae4] ss:$48 sps:$4 sm:$0xff]  }
 0x17e   :  { %2695 = vmatpush1.bf16.msra.mxu0 %v9499_v48  ;;  %v9611_v48 = vld [vmem:[#allocation2 + $0x9cc] ss:$48 sps:$4 sm:$0xff]  }
 0x17f   :  { %2696 = vmatprep.subr.bf16.mxu0 %v9501_v50  ;;  %2781 = vmatpush1.bf16.msra.mxu1 %v9527_v55  ;;  %v9609_v50 = vld [vmem:[#allocation2 + $0x9c8] ss:$48 sps:$4 sm:$0xff]   ;;  %v9600_v55 = vld [vmem:[#allocation2 + $0xae0] ss:$48 sps:$4 sm:$0xff]  }
 0x180   :  { %2782 = vmatprep.subr.bf16.mxu1 %v9531_v57  ;;  %v9608_v57 = vld [vmem:[#allocation2 + $0xb44] ss:$48 sps:$4 sm:$0xff]  }
 0x182   :  { %2697 = vmatpush1.bf16.msra.mxu0 %v9505_v52  ;;  %v9617_v52 = vld [vmem:[#allocation2 + $0xa2c] ss:$48 sps:$4 sm:$0xff]  }
 0x183   :  { %2698 = vmatprep.subr.bf16.mxu0 %v9507_v54  ;;  %2783 = vmatpush1.bf16.msra.mxu1 %v9533_v59  ;;  %v9615_v54 = vld [vmem:[#allocation2 + $0xa28] ss:$48 sps:$4 sm:$0xff]   ;;  %v9606_v59 = vld [vmem:[#allocation2 + $0xb40] ss:$48 sps:$4 sm:$0xff]  }
 0x184   :  { %2784 = vmatprep.subr.bf16.mxu1 %v9537_v61  ;;  %v9614_v61 = vld [vmem:[#allocation2 + $0xba4] ss:$48 sps:$4 sm:$0xff]  }
 0x186   :  { %2699 = vmatpush1.bf16.msra.mxu0 %v9511_v56  ;;  %v9623_v56 = vld [vmem:[#allocation2 + $0xa8c] ss:$48 sps:$4 sm:$0xff]  }
 0x187   :  { %2700 = vmatprep.subr.bf16.mxu0 %v9513_v58  ;;  %2785 = vmatpush1.bf16.msra.mxu1 %v9539_v0  ;;  %v9621_v58 = vld [vmem:[#allocation2 + $0xa88] ss:$48 sps:$4 sm:$0xff]   ;;  %v9612_v0 = vld [vmem:[#allocation2 + $0xba0] ss:$48 sps:$4 sm:$0xff]  }
 0x188   :  { %2786 = vmatprep.subr.bf16.mxu1 %v9543_v2  ;;  %v9626_v2 = vld [vmem:[#allocation2 + $0x14] ss:$48 sps:$4 sm:$0xff]  }
 0x18a   :  { %2701 = vmatpush1.bf16.msra.mxu0 %v9517_v60  ;;  %v9629_v60 = vld [vmem:[#allocation2 + $0xaec] ss:$48 sps:$4 sm:$0xff]  }
 0x18b   :  { %2713 = vmatprep.subr.bf16.mxu0 %v9523_v62  ;;  %2787 = vmatpush1.bf16.msra.mxu1 %v9545_v4  ;;  %v9627_v62 = vld [vmem:[#allocation2 + $0xae8] ss:$48 sps:$4 sm:$0xff]  }
 0x18c   :  { %2799 = vmatprep.subr.bf16.mxu1 %v9551_v6  ;;  %v9633_v4 = vld [vmem:[#allocation2 + $0xb48] ss:$48 sps:$4 sm:$0xff]   ;;  %v9641_v6 = vld [vmem:[#allocation2 + $0xbac] ss:$48 sps:$4 sm:$0xff]  }
 0x18d   :  { %2703 = vmatmul.mubr.bf16.vlgmr.msra.gmra.mrb[0].mxu0 %v11574_v63 }
 0x18e   :  { %2714 = vmatpush1.bf16.msra.mxu0 %v9521_v1  ;;  %2789 = vmatmul.mubr.bf16.vlgmr.msra.gmra.mrb[0].mxu1 %v11574_v63  ;;  %v9635_v1 = vld [vmem:[#allocation2 + $0xb4c] ss:$48 sps:$4 sm:$0xff]  }
 0x18f   :  { %2715 = vmatprep.subr.bf16.mxu0 %v9530_v3  ;;  %2800 = vmatpush1.bf16.msra.mxu1 %v9549_v8  ;;  %v11588_v3 = vld [vmem:[%s12041_s12 + $0x8] ss:$16 sps:$4 sm:$0xff]  }
 0x190   :  { %2801 = vmatprep.subr.bf16.mxu1 %v9557_v10  ;;  %2745 = vmatprep.mubr.bf16.mxu0 %v11581_v21  ;;  %v9639_v8 = vld [vmem:[#allocation2 + $0xba8] ss:$48 sps:$4 sm:$0xff]   ;;  %v9650_v10 = vld [vmem:[#allocation2 + $0x1c] ss:$48 sps:$4 sm:$0xff]  }
 0x191   :  { %2831 = vmatprep.mubr.bf16.mxu1 %v11581_v21 }
 0x192   :  { %2716 = vmatpush1.bf16.msra.mxu0 %v9528_v5  ;;  %v9624_v5 = vld [vmem:[#allocation2 + $0x10] ss:$48 sps:$4 sm:$0xff]  }
 0x193   :  { %2717 = vmatprep.subr.bf16.mxu0 %v9536_v7  ;;  %2802 = vmatpush1.bf16.msra.mxu1 %v9555_v12  ;;  %v9632_v7 = vld [vmem:[#allocation2 + $0x74] ss:$48 sps:$4 sm:$0xff]   ;;  %v9648_v12 = vld [vmem:[#allocation2 + $0x18] ss:$48 sps:$4 sm:$0xff]  }
 0x194   :  { %2803 = vmatprep.subr.bf16.mxu1 %v9563_v14  ;;  %v9656_v14 = vld [vmem:[#allocation2 + $0x7c] ss:$48 sps:$4 sm:$0xff]  }
 0x196   :  { %2718 = vmatpush1.bf16.msra.mxu0 %v9534_v9  ;;  %v9630_v9 = vld [vmem:[#allocation2 + $0x70] ss:$48 sps:$4 sm:$0xff]  }
 0x197   :  { %2719 = vmatprep.subr.bf16.mxu0 %v9542_v11  ;;  %2804 = vmatpush1.bf16.msra.mxu1 %v9561_v16  ;;  %v9638_v11 = vld [vmem:[#allocation2 + $0xd4] ss:$48 sps:$4 sm:$0xff]   ;;  %v9654_v16 = vld [vmem:[#allocation2 + $0x78] ss:$48 sps:$4 sm:$0xff]  }
 0x198   :  { %2805 = vmatprep.subr.bf16.mxu1 %v9569_v18  ;;  %v9662_v18 = vld [vmem:[#allocation2 + $0xdc] ss:$48 sps:$4 sm:$0xff]  }
 0x19a   :  { %2720 = vmatpush1.bf16.msra.mxu0 %v9540_v13  ;;  %v9636_v13 = vld [vmem:[#allocation2 + $0xd0] ss:$48 sps:$4 sm:$0xff]  }
 0x19b   :  { %2721 = vmatprep.subr.bf16.mxu0 %v9548_v15  ;;  %2806 = vmatpush1.bf16.msra.mxu1 %v9567_v20  ;;  %v9644_v15 = vld [vmem:[#allocation2 + $0x134] ss:$48 sps:$4 sm:$0xff]   ;;  %v9660_v20 = vld [vmem:[#allocation2 + $0xd8] ss:$48 sps:$4 sm:$0xff]  }
 0x19c   :  { %2807 = vmatprep.subr.bf16.mxu1 %v9575_v23  ;;  %v9668_v23 = vld [vmem:[#allocation2 + $0x13c] ss:$48 sps:$4 sm:$0xff]  }
 0x19e   :  { %2722 = vmatpush1.bf16.msra.mxu0 %v9546_v17  ;;  %v9642_v17 = vld [vmem:[#allocation2 + $0x130] ss:$48 sps:$4 sm:$0xff]  }
 0x19f   :  { %2723 = vmatprep.subr.bf16.mxu0 %v9554_v19  ;;  %2808 = vmatpush1.bf16.msra.mxu1 %v9573_v25  ;;  %v9647_v19 = vld [vmem:[#allocation2 + $0x194] ss:$48 sps:$4 sm:$0xff]   ;;  %v9666_v25 = vld [vmem:[#allocation2 + $0x138] ss:$48 sps:$4 sm:$0xff]  }
 0x1a0   :  { %2809 = vmatprep.subr.bf16.mxu1 %v9581_v27  ;;  %v9659_v27 = vld [vmem:[#allocation2 + $0x254] ss:$48 sps:$4 sm:$0xff]  }
 0x1a2   :  { %2724 = vmatpush1.bf16.msra.mxu0 %v9552_v22  ;;  %v9645_v22 = vld [vmem:[#allocation2 + $0x190] ss:$48 sps:$4 sm:$0xff]  }
 0x1a3   :  { %2725 = vmatprep.subr.bf16.mxu0 %v9560_v24  ;;  %2810 = vmatpush1.bf16.msra.mxu1 %v9579_v29  ;;  %v9653_v24 = vld [vmem:[#allocation2 + $0x1f4] ss:$48 sps:$4 sm:$0xff]   ;;  %v9657_v29 = vld [vmem:[#allocation2 + $0x250] ss:$48 sps:$4 sm:$0xff]  }
 0x1a4   :  { %2811 = vmatprep.subr.bf16.mxu1 %v9587_v31  ;;  %v9665_v31 = vld [vmem:[#allocation2 + $0x2b4] ss:$48 sps:$4 sm:$0xff]  }
 0x1a6   :  { %2726 = vmatpush1.bf16.msra.mxu0 %v9558_v26  ;;  %v9651_v26 = vld [vmem:[#allocation2 + $0x1f0] ss:$48 sps:$4 sm:$0xff]  }
 0x1a7   :  { %2727 = vmatprep.subr.bf16.mxu0 %v9566_v28  ;;  %2812 = vmatpush1.bf16.msra.mxu1 %v9585_v33  ;;  %v9672_v28 = vld [vmem:[#allocation2 + $0x198] ss:$48 sps:$4 sm:$0xff]   ;;  %v9663_v33 = vld [vmem:[#allocation2 + $0x2b0] ss:$48 sps:$4 sm:$0xff]  }
 0x1a8   :  { %2813 = vmatprep.subr.bf16.mxu1 %v9593_v35  ;;  %v9671_v35 = vld [vmem:[#allocation2 + $0x314] ss:$48 sps:$4 sm:$0xff]  }
 0x1aa   :  { %2728 = vmatpush1.bf16.msra.mxu0 %v9564_v30  ;;  %v9680_v30 = vld [vmem:[#allocation2 + $0x1fc] ss:$48 sps:$4 sm:$0xff]  }
 0x1ab   :  { %2729 = vmatprep.subr.bf16.mxu0 %v9572_v32  ;;  %2814 = vmatpush1.bf16.msra.mxu1 %v9591_v37  ;;  %v9678_v32 = vld [vmem:[#allocation2 + $0x1f8] ss:$48 sps:$4 sm:$0xff]   ;;  %v9669_v37 = vld [vmem:[#allocation2 + $0x310] ss:$48 sps:$4 sm:$0xff]  }
 0x1ac   :  { %2815 = vmatprep.subr.bf16.mxu1 %v9599_v40  ;;  %v9677_v40 = vld [vmem:[#allocation2 + $0x374] ss:$48 sps:$4 sm:$0xff]  }
 0x1ae   :  { %2730 = vmatpush1.bf16.msra.mxu0 %v9570_v34  ;;  %v9686_v34 = vld [vmem:[#allocation2 + $0x25c] ss:$48 sps:$4 sm:$0xff]  }
 0x1af   :  { %2731 = vmatprep.subr.bf16.mxu0 %v9578_v36  ;;  %2816 = vmatpush1.bf16.msra.mxu1 %v9597_v42  ;;  %v9684_v36 = vld [vmem:[#allocation2 + $0x258] ss:$48 sps:$4 sm:$0xff]   ;;  %v9675_v42 = vld [vmem:[#allocation2 + $0x370] ss:$48 sps:$4 sm:$0xff]  }
 0x1b0   :  { %2817 = vmatprep.subr.bf16.mxu1 %v9605_v44  ;;  %v9683_v44 = vld [vmem:[#allocation2 + $0x3d4] ss:$48 sps:$4 sm:$0xff]  }
 0x1b2   :  { %2732 = vmatpush1.bf16.msra.mxu0 %v9576_v38  ;;  %v9692_v38 = vld [vmem:[#allocation2 + $0x2bc] ss:$48 sps:$4 sm:$0xff]  }
 0x1b3   :  { %2733 = vmatprep.subr.bf16.mxu0 %v9584_v41  ;;  %2818 = vmatpush1.bf16.msra.mxu1 %v9603_v46  ;;  %v9690_v41 = vld [vmem:[#allocation2 + $0x2b8] ss:$48 sps:$4 sm:$0xff]   ;;  %v9681_v46 = vld [vmem:[#allocation2 + $0x3d0] ss:$48 sps:$4 sm:$0xff]  }
 0x1b4   :  { %2819 = vmatprep.subr.bf16.mxu1 %v9611_v48  ;;  %v9689_v48 = vld [vmem:[#allocation2 + $0x434] ss:$48 sps:$4 sm:$0xff]  }
 0x1b6   :  { %2734 = vmatpush1.bf16.msra.mxu0 %v9582_v43  ;;  %v9698_v43 = vld [vmem:[#allocation2 + $0x31c] ss:$48 sps:$4 sm:$0xff]  }
 0x1b7   :  { %2735 = vmatprep.subr.bf16.mxu0 %v9590_v45  ;;  %2820 = vmatpush1.bf16.msra.mxu1 %v9609_v50  ;;  %v9696_v45 = vld [vmem:[#allocation2 + $0x318] ss:$48 sps:$4 sm:$0xff]   ;;  %v9687_v50 = vld [vmem:[#allocation2 + $0x430] ss:$48 sps:$4 sm:$0xff]  }
 0x1b8   :  { %2821 = vmatprep.subr.bf16.mxu1 %v9617_v52  ;;  %v9695_v52 = vld [vmem:[#allocation2 + $0x494] ss:$48 sps:$4 sm:$0xff]  }
 0x1ba   :  { %2736 = vmatpush1.bf16.msra.mxu0 %v9588_v47  ;;  %v9704_v47 = vld [vmem:[#allocation2 + $0x37c] ss:$48 sps:$4 sm:$0xff]  }
 0x1bb   :  { %2737 = vmatprep.subr.bf16.mxu0 %v9596_v49  ;;  %2822 = vmatpush1.bf16.msra.mxu1 %v9615_v54  ;;  %v9702_v49 = vld [vmem:[#allocation2 + $0x378] ss:$48 sps:$4 sm:$0xff]   ;;  %v9693_v54 = vld [vmem:[#allocation2 + $0x490] ss:$48 sps:$4 sm:$0xff]  }
 0x1bc   :  { %2823 = vmatprep.subr.bf16.mxu1 %v9623_v56  ;;  %v9701_v56 = vld [vmem:[#allocation2 + $0x4f4] ss:$48 sps:$4 sm:$0xff]  }
 0x1be   :  { %2738 = vmatpush1.bf16.msra.mxu0 %v9594_v51  ;;  %v9710_v51 = vld [vmem:[#allocation2 + $0x3dc] ss:$48 sps:$4 sm:$0xff]  }
 0x1bf   :  { %2739 = vmatprep.subr.bf16.mxu0 %v9602_v53  ;;  %2824 = vmatpush1.bf16.msra.mxu1 %v9621_v58  ;;  %v9708_v53 = vld [vmem:[#allocation2 + $0x3d8] ss:$48 sps:$4 sm:$0xff]   ;;  %v9699_v58 = vld [vmem:[#allocation2 + $0x4f0] ss:$48 sps:$4 sm:$0xff]  }
 0x1c0   :  { %2825 = vmatprep.subr.bf16.mxu1 %v9629_v60  ;;  %v9707_v60 = vld [vmem:[#allocation2 + $0x554] ss:$48 sps:$4 sm:$0xff]  }
 0x1c2   :  { %2740 = vmatpush1.bf16.msra.mxu0 %v9600_v55  ;;  %v9716_v55 = vld [vmem:[#allocation2 + $0x43c] ss:$48 sps:$4 sm:$0xff]  }
 0x1c3   :  { %2741 = vmatprep.subr.bf16.mxu0 %v9608_v57  ;;  %2826 = vmatpush1.bf16.msra.mxu1 %v9627_v62  ;;  %v9714_v57 = vld [vmem:[#allocation2 + $0x438] ss:$48 sps:$4 sm:$0xff]   ;;  %v9705_v62 = vld [vmem:[#allocation2 + $0x550] ss:$48 sps:$4 sm:$0xff]  }
 0x1c4   :  { %2827 = vmatprep.subr.bf16.mxu1 %v9635_v1  ;;  %v9713_v1 = vld [vmem:[#allocation2 + $0x5b4] ss:$48 sps:$4 sm:$0xff]  }
 0x1c6   :  { %2742 = vmatpush1.bf16.msra.mxu0 %v9606_v59  ;;  %v9722_v59 = vld [vmem:[#allocation2 + $0x49c] ss:$48 sps:$4 sm:$0xff]  }
 0x1c7   :  { %2743 = vmatprep.subr.bf16.mxu0 %v9614_v61  ;;  %2828 = vmatpush1.bf16.msra.mxu1 %v9633_v4  ;;  %v9720_v61 = vld [vmem:[#allocation2 + $0x498] ss:$48 sps:$4 sm:$0xff]   ;;  %v9711_v4 = vld [vmem:[#allocation2 + $0x5b0] ss:$48 sps:$4 sm:$0xff]  }
 0x1c8   :  { %2829 = vmatprep.subr.bf16.mxu1 %v9641_v6  ;;  %v9719_v6 = vld [vmem:[#allocation2 + $0x614] ss:$48 sps:$4 sm:$0xff]  }
 0x1ca   :  { %2744 = vmatpush1.bf16.msra.mxu0 %v9612_v0  ;;  %v9728_v0 = vld [vmem:[#allocation2 + $0x4fc] ss:$48 sps:$4 sm:$0xff]  }
 0x1cb   :  { %2842 = vmatprep.subr.bf16.mxu0 %v9626_v2  ;;  %2830 = vmatpush1.bf16.msra.mxu1 %v9639_v8  ;;  %v9726_v2 = vld [vmem:[#allocation2 + $0x4f8] ss:$48 sps:$4 sm:$0xff]   ;;  %v9717_v8 = vld [vmem:[#allocation2 + $0x610] ss:$48 sps:$4 sm:$0xff]  }
 0x1cc   :  { %2928 = vmatprep.subr.bf16.mxu1 %v9650_v10  ;;  %v9725_v10 = vld [vmem:[#allocation2 + $0x674] ss:$48 sps:$4 sm:$0xff]  }
 0x1cd   :  { %2746 = vmatmul.mubr.bf16.vlgmr.msra.gmra.mrb[0].mxu0 %v11588_v3 }
 0x1ce   :  { %2843 = vmatpush1.bf16.msra.mxu0 %v9624_v5  ;;  %2874 = vmatprep.mubr.bf16.mxu0 %v11567_v39  ;;  %v9734_v5 = vld [vmem:[#allocation2 + $0x55c] ss:$48 sps:$4 sm:$0xff]  }
 0x1cf   :  { %2844 = vmatprep.subr.bf16.mxu0 %v9632_v7  ;;  %2832 = vmatmul.mubr.bf16.vlgmr.msra.gmra.mrb[0].mxu1 %v11588_v3  ;;  %v9732_v7 = vld [vmem:[#allocation2 + $0x558] ss:$48 sps:$4 sm:$0xff]  }
 0x1d0   :  { %2929 = vmatpush1.bf16.msra.mxu1 %v9648_v12  ;;  %2960 = vmatprep.mubr.bf16.mxu1 %v11567_v39  ;;  %v9674_v39 = vld [vmem:[#allocation2 + $0x19c] ss:$48 sps:$4 sm:$0xff]   ;;  %v9731_v12 = vld [vmem:[#allocation2 + $0x6d4] ss:$48 sps:$4 sm:$0xff]  }
 0x1d1   :  { %2930 = vmatprep.subr.bf16.mxu1 %v9656_v14  ;;  %v9746_v14 = vld [vmem:[#allocation2 + $0x61c] ss:$48 sps:$4 sm:$0xff]  }
 0x1d2   :  { %2845 = vmatpush1.bf16.msra.mxu0 %v9630_v9  ;;  %v9740_v9 = vld [vmem:[#allocation2 + $0x5bc] ss:$48 sps:$4 sm:$0xff]  }
 0x1d3   :  { %2846 = vmatprep.subr.bf16.mxu0 %v9638_v11  ;;  %v9723_v11 = vld [vmem:[#allocation2 + $0x670] ss:$48 sps:$4 sm:$0xff]  }
 0x1d4   :  { %2931 = vmatpush1.bf16.msra.mxu1 %v9654_v16  ;;  %v9737_v16 = vld [vmem:[#allocation2 + $0x734] ss:$48 sps:$4 sm:$0xff]  }
 0x1d5   :  { %2932 = vmatprep.subr.bf16.mxu1 %v9662_v18  ;;  %v9752_v18 = vld [vmem:[#allocation2 + $0x67c] ss:$48 sps:$4 sm:$0xff]  }
 0x1d6   :  { %2847 = vmatpush1.bf16.msra.mxu0 %v9636_v13  ;;  %v9738_v13 = vld [vmem:[#allocation2 + $0x5b8] ss:$48 sps:$4 sm:$0xff]  }
 0x1d7   :  { %2848 = vmatprep.subr.bf16.mxu0 %v9644_v15  ;;  %v9729_v15 = vld [vmem:[#allocation2 + $0x6d0] ss:$48 sps:$4 sm:$0xff]  }
 0x1d8   :  { %2933 = vmatpush1.bf16.msra.mxu1 %v9660_v20  ;;  %v9735_v20 = vld [vmem:[#allocation2 + $0x730] ss:$48 sps:$4 sm:$0xff]  }
 0x1d9   :  { %2934 = vmatprep.subr.bf16.mxu1 %v9668_v23  ;;  %v9758_v23 = vld [vmem:[#allocation2 + $0x6dc] ss:$48 sps:$4 sm:$0xff]  }
 0x1da   :  { %2849 = vmatpush1.bf16.msra.mxu0 %v9642_v17  ;;  %v9744_v17 = vld [vmem:[#allocation2 + $0x618] ss:$48 sps:$4 sm:$0xff]  }
 0x1db   :  { %2850 = vmatprep.subr.bf16.mxu0 %v9647_v19  ;;  %v9750_v19 = vld [vmem:[#allocation2 + $0x678] ss:$48 sps:$4 sm:$0xff]  }
 0x1dc   :  { %2935 = vmatpush1.bf16.msra.mxu1 %v9666_v25  ;;  %v9741_v25 = vld [vmem:[#allocation2 + $0x790] ss:$48 sps:$4 sm:$0xff]  }
 0x1dd   :  { %2936 = vmatprep.subr.bf16.mxu1 %v9674_v39  ;;  %v9749_v39 = vld [vmem:[#allocation2 + $0x7f4] ss:$48 sps:$4 sm:$0xff]  }
 0x1de   :  { %2851 = vmatpush1.bf16.msra.mxu0 %v9645_v22  ;;  %v9743_v22 = vld [vmem:[#allocation2 + $0x794] ss:$48 sps:$4 sm:$0xff]  }
 0x1df   :  { %2852 = vmatprep.subr.bf16.mxu0 %v9653_v24  ;;  %v9756_v24 = vld [vmem:[#allocation2 + $0x6d8] ss:$48 sps:$4 sm:$0xff]  }
 0x1e0   :  { %2937 = vmatpush1.bf16.msra.mxu1 %v9672_v28  ;;  %v9747_v28 = vld [vmem:[#allocation2 + $0x7f0] ss:$48 sps:$4 sm:$0xff]  }
 0x1e1   :  { %2938 = vmatprep.subr.bf16.mxu1 %v9680_v30  ;;  %v9768_v30 = vld [vmem:[#allocation2 + $0x798] ss:$48 sps:$4 sm:$0xff]  }
 0x1e2   :  { %2853 = vmatpush1.bf16.msra.mxu0 %v9651_v26  ;;  %v9764_v26 = vld [vmem:[#allocation2 + $0x73c] ss:$48 sps:$4 sm:$0xff]  }
 0x1e3   :  { %2854 = vmatprep.subr.bf16.mxu0 %v9659_v27  ;;  %v9762_v27 = vld [vmem:[#allocation2 + $0x738] ss:$48 sps:$4 sm:$0xff]  }
 0x1e4   :  { %2939 = vmatpush1.bf16.msra.mxu1 %v9678_v32  ;;  %v9761_v32 = vld [vmem:[#allocation2 + $0x8b4] ss:$48 sps:$4 sm:$0xff]  }
 0x1e5   :  { %2940 = vmatprep.subr.bf16.mxu1 %v9686_v34  ;;  %v9759_v34 = vld [vmem:[#allocation2 + $0x8b0] ss:$48 sps:$4 sm:$0xff]  }
 0x1e6   :  { %2855 = vmatpush1.bf16.msra.mxu0 %v9657_v29  ;;  %v9755_v29 = vld [vmem:[#allocation2 + $0x854] ss:$48 sps:$4 sm:$0xff]  }
 0x1e7   :  { %2856 = vmatprep.subr.bf16.mxu0 %v9665_v31  ;;  %v9776_v31 = vld [vmem:[#allocation2 + $0x7fc] ss:$48 sps:$4 sm:$0xff]  }
 0x1e8   :  { %2941 = vmatpush1.bf16.msra.mxu1 %v9684_v36  ;;  %v9767_v36 = vld [vmem:[#allocation2 + $0x914] ss:$48 sps:$4 sm:$0xff]  }
 0x1e9   :  { %2942 = vmatprep.subr.bf16.mxu1 %v9692_v38  ;;  %v9765_v38 = vld [vmem:[#allocation2 + $0x910] ss:$48 sps:$4 sm:$0xff]  }
 0x1ea   :  { %2857 = vmatpush1.bf16.msra.mxu0 %v9663_v33  ;;  %v9774_v33 = vld [vmem:[#allocation2 + $0x7f8] ss:$48 sps:$4 sm:$0xff]  }
 0x1eb   :  { %2858 = vmatprep.subr.bf16.mxu0 %v9671_v35  ;;  %v9782_v35 = vld [vmem:[#allocation2 + $0x85c] ss:$48 sps:$4 sm:$0xff]  }
 0x1ec   :  { %2943 = vmatpush1.bf16.msra.mxu1 %v9690_v41  ;;  %v9773_v41 = vld [vmem:[#allocation2 + $0x974] ss:$48 sps:$4 sm:$0xff]  }
 0x1ed   :  { %2944 = vmatprep.subr.bf16.mxu1 %v9698_v43  ;;  %v9771_v43 = vld [vmem:[#allocation2 + $0x970] ss:$48 sps:$4 sm:$0xff]  }
 0x1ee   :  { %2859 = vmatpush1.bf16.msra.mxu0 %v9669_v37  ;;  %v9780_v37 = vld [vmem:[#allocation2 + $0x858] ss:$48 sps:$4 sm:$0xff]  }
 0x1ef   :  { %2860 = vmatprep.subr.bf16.mxu0 %v9677_v40  ;;  %v9788_v40 = vld [vmem:[#allocation2 + $0x8bc] ss:$48 sps:$4 sm:$0xff]  }
 0x1f0   :  { %2945 = vmatpush1.bf16.msra.mxu1 %v9696_v45  ;;  %v9779_v45 = vld [vmem:[#allocation2 + $0x9d4] ss:$48 sps:$4 sm:$0xff]  }
 0x1f1   :  { %2946 = vmatprep.subr.bf16.mxu1 %v9704_v47  ;;  %v9785_v47 = vld [vmem:[#allocation2 + $0xa34] ss:$48 sps:$4 sm:$0xff]  }
 0x1f2   :  { %2861 = vmatpush1.bf16.msra.mxu0 %v9675_v42  ;;  %v9786_v42 = vld [vmem:[#allocation2 + $0x8b8] ss:$48 sps:$4 sm:$0xff]  }
 0x1f3   :  { %2862 = vmatprep.subr.bf16.mxu0 %v9683_v44  ;;  %v9794_v44 = vld [vmem:[#allocation2 + $0x91c] ss:$48 sps:$4 sm:$0xff]  }
 0x1f4   :  { %2947 = vmatpush1.bf16.msra.mxu1 %v9702_v49  ;;  %v9800_v49 = vld [vmem:[#allocation2 + $0x97c] ss:$48 sps:$4 sm:$0xff]  }
 0x1f5   :  { %2948 = vmatprep.subr.bf16.mxu1 %v9710_v51  ;;  %v9791_v51 = vld [vmem:[#allocation2 + $0xa94] ss:$48 sps:$4 sm:$0xff]  }
 0x1f6   :  { %2863 = vmatpush1.bf16.msra.mxu0 %v9681_v46  ;;  %v9777_v46 = vld [vmem:[#allocation2 + $0x9d0] ss:$48 sps:$4 sm:$0xff]  }
 0x1f7   :  { %2864 = vmatprep.subr.bf16.mxu0 %v9689_v48  ;;  %v9792_v48 = vld [vmem:[#allocation2 + $0x918] ss:$48 sps:$4 sm:$0xff]  }
 0x1f8   :  { %2949 = vmatpush1.bf16.msra.mxu1 %v9708_v53  ;;  %v9806_v53 = vld [vmem:[#allocation2 + $0x9dc] ss:$48 sps:$4 sm:$0xff]  }
 0x1f9   :  { %2950 = vmatprep.subr.bf16.mxu1 %v9716_v55  ;;  %v9797_v55 = vld [vmem:[#allocation2 + $0xaf4] ss:$48 sps:$4 sm:$0xff]  }
 0x1fa   :  { %2865 = vmatpush1.bf16.msra.mxu0 %v9687_v50  ;;  %v9783_v50 = vld [vmem:[#allocation2 + $0xa30] ss:$48 sps:$4 sm:$0xff]  }
 0x1fb   :  { %2866 = vmatprep.subr.bf16.mxu0 %v9695_v52  ;;  %v9798_v52 = vld [vmem:[#allocation2 + $0x978] ss:$48 sps:$4 sm:$0xff]  }
 0x1fc   :  { %2951 = vmatpush1.bf16.msra.mxu1 %v9714_v57  ;;  %v9812_v57 = vld [vmem:[#allocation2 + $0xa3c] ss:$48 sps:$4 sm:$0xff]  }
 0x1fd   :  { %2952 = vmatprep.subr.bf16.mxu1 %v9722_v59  ;;  %v9803_v59 = vld [vmem:[#allocation2 + $0xb54] ss:$48 sps:$4 sm:$0xff]  }
 0x1fe   :  { %2867 = vmatpush1.bf16.msra.mxu0 %v9693_v54  ;;  %v9789_v54 = vld [vmem:[#allocation2 + $0xa90] ss:$48 sps:$4 sm:$0xff]  }
 0x1ff   :  { %2868 = vmatprep.subr.bf16.mxu0 %v9701_v56  ;;  %v9804_v56 = vld [vmem:[#allocation2 + $0x9d8] ss:$48 sps:$4 sm:$0xff]  }
 0x200   :  { %2953 = vmatpush1.bf16.msra.mxu1 %v9720_v61  ;;  %v9815_v61 = vld [vmem:[#allocation2 + $0xa9c] ss:$48 sps:$4 sm:$0xff]  }
 0x201   :  { %2954 = vmatprep.subr.bf16.mxu1 %v9728_v0  ;;  %v9809_v0 = vld [vmem:[#allocation2 + $0xbb4] ss:$48 sps:$4 sm:$0xff]  }
 0x202   :  { %2869 = vmatpush1.bf16.msra.mxu0 %v9699_v58  ;;  %v9795_v58 = vld [vmem:[#allocation2 + $0xaf0] ss:$48 sps:$4 sm:$0xff]  }
 0x203   :  { %2870 = vmatprep.subr.bf16.mxu0 %v9707_v60  ;;  %v9810_v60 = vld [vmem:[#allocation2 + $0xa38] ss:$48 sps:$4 sm:$0xff]  }
 0x204   :  { %2955 = vmatpush1.bf16.msra.mxu1 %v9726_v2  ;;  %v9818_v2 = vld [vmem:[#allocation2 + $0xafc] ss:$48 sps:$4 sm:$0xff]  }
 0x205   :  { %2956 = vmatprep.subr.bf16.mxu1 %v9734_v5  ;;  %v9816_v5 = vld [vmem:[#allocation2 + $0xaf8] ss:$48 sps:$4 sm:$0xff]  }
 0x206   :  { %2871 = vmatpush1.bf16.msra.mxu0 %v9705_v62  ;;  %v9801_v62 = vld [vmem:[#allocation2 + $0xb50] ss:$48 sps:$4 sm:$0xff]  }
 0x207   :  { %2872 = vmatprep.subr.bf16.mxu0 %v9713_v1  ;;  %v9813_v1 = vld [vmem:[#allocation2 + $0xa98] ss:$48 sps:$4 sm:$0xff]  }
 0x208   :  { %2957 = vmatpush1.bf16.msra.mxu1 %v9732_v7  ;;  %v9878_v7 = vld [vmem:[#allocation2 + $0x24] ss:$48 sps:$4 sm:$0xff]  }
 0x209   :  { %2958 = vmatprep.subr.bf16.mxu1 %v9740_v9  ;;  %v9824_v9 = vld [vmem:[#allocation2 + $0xbbc] ss:$48 sps:$4 sm:$0xff]  }
 0x20a   :  { %2873 = vmatpush1.bf16.msra.mxu0 %v9711_v4  ;;  %v9807_v4 = vld [vmem:[#allocation2 + $0xbb0] ss:$48 sps:$4 sm:$0xff]  }
 0x20b   :  { %2885 = vmatprep.subr.bf16.mxu0 %v9719_v6  ;;  %v9821_v6 = vld [vmem:[#allocation2 + $0xb5c] ss:$48 sps:$4 sm:$0xff]  }
 0x20c   :  { %2959 = vmatpush1.bf16.msra.mxu1 %v9738_v13  ;;  %v9827_v13 = vld [vmem:[#allocation2 + $0x2c] ss:$48 sps:$4 sm:$0xff]  }
 0x20d   :  { %2875 = vmatmul.mubr.bf16.vlgmr.msra.gmra.mrb[4].mxu0 %v11574_v63  ;;  %2971 = vmatprep.subr.bf16.mxu1 %v9746_v14  ;;  %v9882_v14 = vld [vmem:[#allocation2 + $0x80] ss:$48 sps:$4 sm:$0xff]  }
 0x20e   :  { %2886 = vmatpush1.bf16.msra.mxu0 %v9717_v8  ;;  %2917 = vmatprep.mubr.bf16.mxu0 %v11581_v21  ;;  %v9819_v8 = vld [vmem:[#allocation2 + $0xb58] ss:$48 sps:$4 sm:$0xff]  }
 0x20f   :  { %2887 = vmatprep.subr.bf16.mxu0 %v9725_v10  ;;  %2961 = vmatmul.mubr.bf16.vlgmr.msra.gmra.mrb[4].mxu1 %v11574_v63  ;;  %v9770_v63 = vld [vmem:[#allocation2 + $0x79c] ss:$48 sps:$4 sm:$0xff]   ;;  %v9876_v10 = vld [vmem:[#allocation2 + $0x20] ss:$48 sps:$4 sm:$0xff]  }
 0x210   :  { %2972 = vmatpush1.bf16.msra.mxu1 %v9744_v17  ;;  %3003 = vmatprep.mubr.bf16.mxu1 %v11581_v21  ;;  %v9753_v21 = vld [vmem:[#allocation2 + $0x850] ss:$48 sps:$4 sm:$0xff]   ;;  %v10785_v17 = vld [vmem:[%s12041_s12 + $0x4] ss:$16 sps:$4 sm:$0xff]  }
 0x211   :  { %2973 = vmatprep.subr.bf16.mxu1 %v9752_v18  ;;  %v9830_v18 = vld [vmem:[#allocation2 + $0x8c] ss:$48 sps:$4 sm:$0xff]  }
 0x212   :  { %2888 = vmatpush1.bf16.msra.mxu0 %v9723_v11  ;;  %v9884_v11 = vld [vmem:[#allocation2 + $0x84] ss:$48 sps:$4 sm:$0xff]  }
 0x213   :  { %2889 = vmatprep.subr.bf16.mxu0 %v9731_v12  ;;  %v9822_v12 = vld [vmem:[#allocation2 + $0xbb8] ss:$48 sps:$4 sm:$0xff]  }
 0x214   :  { %2974 = vmatpush1.bf16.msra.mxu1 %v9750_v19  ;;  %v9888_v19 = vld [vmem:[#allocation2 + $0xe0] ss:$48 sps:$4 sm:$0xff]  }
 0x215   :  { %2975 = vmatprep.subr.bf16.mxu1 %v9758_v23  ;;  %v9833_v23 = vld [vmem:[#allocation2 + $0xec] ss:$48 sps:$4 sm:$0xff]  }
 0x216   :  { %2890 = vmatpush1.bf16.msra.mxu0 %v9729_v15  ;;  %v9890_v15 = vld [vmem:[#allocation2 + $0xe4] ss:$48 sps:$4 sm:$0xff]  }
 0x217   :  { %2891 = vmatprep.subr.bf16.mxu0 %v9737_v16  ;;  %v9825_v16 = vld [vmem:[#allocation2 + $0x28] ss:$48 sps:$4 sm:$0xff]  }
 0x218   :  { %2976 = vmatpush1.bf16.msra.mxu1 %v9756_v24  ;;  %v9894_v24 = vld [vmem:[#allocation2 + $0x140] ss:$48 sps:$4 sm:$0xff]  }
 0x219   :  { %2977 = vmatprep.subr.bf16.mxu1 %v9764_v26  ;;  %v9831_v26 = vld [vmem:[#allocation2 + $0xe8] ss:$48 sps:$4 sm:$0xff]  }
 0x21a   :  { %2892 = vmatpush1.bf16.msra.mxu0 %v9735_v20  ;;  %v9896_v20 = vld [vmem:[#allocation2 + $0x144] ss:$48 sps:$4 sm:$0xff]  }
 0x21b   :  { %2893 = vmatprep.subr.bf16.mxu0 %v9743_v22  ;;  %v9828_v22 = vld [vmem:[#allocation2 + $0x88] ss:$48 sps:$4 sm:$0xff]  }
 0x21c   :  { %2978 = vmatpush1.bf16.msra.mxu1 %v9762_v27  ;;  %v9900_v27 = vld [vmem:[#allocation2 + $0x1a0] ss:$48 sps:$4 sm:$0xff]  }
 0x21d   :  { %2979 = vmatprep.subr.bf16.mxu1 %v9770_v63  ;;  %v9834_v63 = vld [vmem:[#allocation2 + $0x148] ss:$48 sps:$4 sm:$0xff]  }
 0x21e   :  { %2894 = vmatpush1.bf16.msra.mxu0 %v9741_v25  ;;  %v9902_v25 = vld [vmem:[#allocation2 + $0x1a4] ss:$48 sps:$4 sm:$0xff]  }
 0x21f   :  { %2895 = vmatprep.subr.bf16.mxu0 %v9749_v39  ;;  %v9836_v39 = vld [vmem:[#allocation2 + $0x14c] ss:$48 sps:$4 sm:$0xff]  }
 0x220   :  { %2980 = vmatpush1.bf16.msra.mxu1 %v9768_v30  ;;  %v9914_v30 = vld [vmem:[#allocation2 + $0x264] ss:$48 sps:$4 sm:$0xff]  }
 0x221   :  { %2981 = vmatprep.subr.bf16.mxu1 %v9776_v31  ;;  %v9837_v31 = vld [vmem:[#allocation2 + $0x1a8] ss:$48 sps:$4 sm:$0xff]  }
 0x222   :  { %2896 = vmatpush1.bf16.msra.mxu0 %v9747_v28  ;;  %v9908_v28 = vld [vmem:[#allocation2 + $0x204] ss:$48 sps:$4 sm:$0xff]  }
 0x223   :  { %2897 = vmatprep.subr.bf16.mxu0 %v9755_v29  ;;  %v9839_v29 = vld [vmem:[#allocation2 + $0x1ac] ss:$48 sps:$4 sm:$0xff]  }
 0x224   :  { %2982 = vmatpush1.bf16.msra.mxu1 %v9774_v33  ;;  %v9912_v33 = vld [vmem:[#allocation2 + $0x260] ss:$48 sps:$4 sm:$0xff]  }
 0x225   :  { %2983 = vmatprep.subr.bf16.mxu1 %v9782_v35  ;;  %v9840_v35 = vld [vmem:[#allocation2 + $0x208] ss:$48 sps:$4 sm:$0xff]  }
 0x226   :  { %2898 = vmatpush1.bf16.msra.mxu0 %v9753_v21  ;;  %v9906_v21 = vld [vmem:[#allocation2 + $0x200] ss:$48 sps:$4 sm:$0xff]  }
 0x227   :  { %2899 = vmatprep.subr.bf16.mxu0 %v9761_v32  ;;  %v9842_v32 = vld [vmem:[#allocation2 + $0x20c] ss:$48 sps:$4 sm:$0xff]  }
 0x228   :  { %2984 = vmatpush1.bf16.msra.mxu1 %v9780_v37  ;;  %v9918_v37 = vld [vmem:[#allocation2 + $0x2c0] ss:$48 sps:$4 sm:$0xff]  }
 0x229   :  { %2985 = vmatprep.subr.bf16.mxu1 %v9788_v40  ;;  %v9843_v40 = vld [vmem:[#allocation2 + $0x268] ss:$48 sps:$4 sm:$0xff]  }
 0x22a   :  { %2900 = vmatpush1.bf16.msra.mxu0 %v9759_v34  ;;  %v9920_v34 = vld [vmem:[#allocation2 + $0x2c4] ss:$48 sps:$4 sm:$0xff]  }
 0x22b   :  { %2901 = vmatprep.subr.bf16.mxu0 %v9767_v36  ;;  %v9845_v36 = vld [vmem:[#allocation2 + $0x26c] ss:$48 sps:$4 sm:$0xff]  }
 0x22c   :  { %2986 = vmatpush1.bf16.msra.mxu1 %v9786_v42  ;;  %v9924_v42 = vld [vmem:[#allocation2 + $0x320] ss:$48 sps:$4 sm:$0xff]  }
 0x22d   :  { %2987 = vmatprep.subr.bf16.mxu1 %v9794_v44  ;;  %v9846_v44 = vld [vmem:[#allocation2 + $0x2c8] ss:$48 sps:$4 sm:$0xff]  }
 0x22e   :  { %2902 = vmatpush1.bf16.msra.mxu0 %v9765_v38  ;;  %v9926_v38 = vld [vmem:[#allocation2 + $0x324] ss:$48 sps:$4 sm:$0xff]  }
 0x22f   :  { %2903 = vmatprep.subr.bf16.mxu0 %v9773_v41  ;;  %v9848_v41 = vld [vmem:[#allocation2 + $0x2cc] ss:$48 sps:$4 sm:$0xff]  }
 0x230   :  { %2988 = vmatpush1.bf16.msra.mxu1 %v9792_v48  ;;  %v9849_v48 = vld [vmem:[#allocation2 + $0x328] ss:$48 sps:$4 sm:$0xff]  }
 0x231   :  { %2989 = vmatprep.subr.bf16.mxu1 %v9800_v49  ;;  %v9854_v49 = vld [vmem:[#allocation2 + $0x38c] ss:$48 sps:$4 sm:$0xff]  }
 0x232   :  { %2904 = vmatpush1.bf16.msra.mxu0 %v9771_v43  ;;  %v9932_v43 = vld [vmem:[#allocation2 + $0x384] ss:$48 sps:$4 sm:$0xff]  }
 0x233   :  { %2905 = vmatprep.subr.bf16.mxu0 %v9779_v45  ;;  %v9851_v45 = vld [vmem:[#allocation2 + $0x32c] ss:$48 sps:$4 sm:$0xff]  }
 0x234   :  { %2990 = vmatpush1.bf16.msra.mxu1 %v9798_v52  ;;  %v9852_v52 = vld [vmem:[#allocation2 + $0x388] ss:$48 sps:$4 sm:$0xff]  }
 0x235   :  { %2991 = vmatprep.subr.bf16.mxu1 %v9806_v53  ;;  %v9857_v53 = vld [vmem:[#allocation2 + $0x3ec] ss:$48 sps:$4 sm:$0xff]  }
 0x236   :  { %2906 = vmatpush1.bf16.msra.mxu0 %v9777_v46  ;;  %v9930_v46 = vld [vmem:[#allocation2 + $0x380] ss:$48 sps:$4 sm:$0xff]  }
 0x237   :  { %2907 = vmatprep.subr.bf16.mxu0 %v9785_v47  ;;  %v9938_v47 = vld [vmem:[#allocation2 + $0x3e4] ss:$48 sps:$4 sm:$0xff]  }
 0x238   :  { %2992 = vmatpush1.bf16.msra.mxu1 %v9804_v56  ;;  %v9855_v56 = vld [vmem:[#allocation2 + $0x3e8] ss:$48 sps:$4 sm:$0xff]  }
 0x239   :  { %2993 = vmatprep.subr.bf16.mxu1 %v9812_v57  ;;  %v9860_v57 = vld [vmem:[#allocation2 + $0x44c] ss:$48 sps:$4 sm:$0xff]  }
 0x23a   :  { %2908 = vmatpush1.bf16.msra.mxu0 %v9783_v50  ;;  %v9936_v50 = vld [vmem:[#allocation2 + $0x3e0] ss:$48 sps:$4 sm:$0xff]  }
 0x23b   :  { %2909 = vmatprep.subr.bf16.mxu0 %v9791_v51  ;;  %v9944_v51 = vld [vmem:[#allocation2 + $0x444] ss:$48 sps:$4 sm:$0xff]  }
 0x23c   :  { %2994 = vmatpush1.bf16.msra.mxu1 %v9810_v60  ;;  %v9858_v60 = vld [vmem:[#allocation2 + $0x448] ss:$48 sps:$4 sm:$0xff]  }
 0x23d   :  { %2995 = vmatprep.subr.bf16.mxu1 %v9815_v61  ;;  %v9863_v61 = vld [vmem:[#allocation2 + $0x4ac] ss:$48 sps:$4 sm:$0xff]  }
 0x23e   :  { %2910 = vmatpush1.bf16.msra.mxu0 %v9789_v54  ;;  %v9942_v54 = vld [vmem:[#allocation2 + $0x440] ss:$48 sps:$4 sm:$0xff]  }
 0x23f   :  { %2911 = vmatprep.subr.bf16.mxu0 %v9797_v55  ;;  %v9950_v55 = vld [vmem:[#allocation2 + $0x4a4] ss:$48 sps:$4 sm:$0xff]  }
 0x240   :  { %2996 = vmatpush1.bf16.msra.mxu1 %v9813_v1  ;;  %v9861_v1 = vld [vmem:[#allocation2 + $0x4a8] ss:$48 sps:$4 sm:$0xff]  }
 0x241   :  { %2997 = vmatprep.subr.bf16.mxu1 %v9818_v2  ;;  %v9866_v2 = vld [vmem:[#allocation2 + $0x50c] ss:$48 sps:$4 sm:$0xff]  }
 0x242   :  { %2912 = vmatpush1.bf16.msra.mxu0 %v9795_v58  ;;  %v9948_v58 = vld [vmem:[#allocation2 + $0x4a0] ss:$48 sps:$4 sm:$0xff]  }
 0x243   :  { %2913 = vmatprep.subr.bf16.mxu0 %v9803_v59  ;;  %v9956_v59 = vld [vmem:[#allocation2 + $0x504] ss:$48 sps:$4 sm:$0xff]  }
 0x244   :  { %2998 = vmatpush1.bf16.msra.mxu1 %v9816_v5  ;;  %v9968_v5 = vld [vmem:[#allocation2 + $0x5c4] ss:$48 sps:$4 sm:$0xff]  }
 0x245   :  { %2999 = vmatprep.subr.bf16.mxu1 %v9821_v6  ;;  %v9864_v6 = vld [vmem:[#allocation2 + $0x508] ss:$48 sps:$4 sm:$0xff]  }
 0x246   :  { %2914 = vmatpush1.bf16.msra.mxu0 %v9801_v62  ;;  %v9954_v62 = vld [vmem:[#allocation2 + $0x500] ss:$48 sps:$4 sm:$0xff]  }
 0x247   :  { %2915 = vmatprep.subr.bf16.mxu0 %v9809_v0  ;;  %v9962_v0 = vld [vmem:[#allocation2 + $0x564] ss:$48 sps:$4 sm:$0xff]  }
 0x248   :  { %3000 = vmatpush1.bf16.msra.mxu1 %v9819_v8  ;;  %v9966_v8 = vld [vmem:[#allocation2 + $0x5c0] ss:$48 sps:$4 sm:$0xff]  }
 0x249   :  { %3001 = vmatprep.subr.bf16.mxu1 %v9824_v9  ;;  %v9971_v9 = vld [vmem:[#allocation2 + $0x624] ss:$48 sps:$4 sm:$0xff]  }
 0x24a   :  { %2916 = vmatpush1.bf16.msra.mxu0 %v9807_v4  ;;  %v9960_v4 = vld [vmem:[#allocation2 + $0x560] ss:$48 sps:$4 sm:$0xff]  }
 0x24b   :  { %3014 = vmatprep.subr.bf16.mxu0 %v9878_v7  ;;  %v9869_v7 = vld [vmem:[#allocation2 + $0x56c] ss:$48 sps:$4 sm:$0xff]  }
 0x24c   :  { %3002 = vmatpush1.bf16.msra.mxu1 %v9822_v12  ;;  %v9969_v12 = vld [vmem:[#allocation2 + $0x620] ss:$48 sps:$4 sm:$0xff]  }
 0x24d   :  { %2918 = vmatmul.mubr.bf16.vlgmr.msra.gmra.mrb[4].mxu0 %v11588_v3  ;;  %3100 = vmatprep.subr.bf16.mxu1 %v9827_v13  ;;  %v10786_v3 = vld [vmem:[%s12041_s12 + $0x8] ss:$16 sps:$4 sm:$0xff]   ;;  %v9974_v13 = vld [vmem:[#allocation2 + $0x684] ss:$48 sps:$4 sm:$0xff]  }
 0x24e   :  { %3015 = vmatpush1.bf16.msra.mxu0 %v9876_v10  ;;  %3046 = vmatprep.mubr.bf16.mxu0 %v10785_v17  ;;  %v9867_v10 = vld [vmem:[#allocation2 + $0x568] ss:$48 sps:$4 sm:$0xff]  }
 0x24f   :  { %3016 = vmatprep.subr.bf16.mxu0 %v9884_v11  ;;  %3004 = vmatmul.mubr.bf16.vlgmr.msra.gmra.mrb[4].mxu1 %v10786_v3  ;;  %v9872_v11 = vld [vmem:[#allocation2 + $0x5cc] ss:$48 sps:$4 sm:$0xff]  }
 0x250   :  { %3101 = vmatpush1.bf16.msra.mxu1 %v9825_v16  ;;  %3132 = vmatprep.mubr.bf16.mxu1 %v10785_v17  ;;  %v9972_v16 = vld [vmem:[#allocation2 + $0x680] ss:$48 sps:$4 sm:$0xff]   ;;  %v9881_v3 = vld [vmem:[#allocation2 + $0x68c] ss:$48 sps:$4 sm:$0xff]  }
 0x251   :  { %3102 = vmatprep.subr.bf16.mxu1 %v9830_v18  ;;  %v10787_v17 = vld [vmem:[%s12041_s12] ss:$16 sps:$4 sm:$0xff]   ;;  %v9977_v18 = vld [vmem:[#allocation2 + $0x6e4] ss:$48 sps:$4 sm:$0xff]  }
 0x252   :  { %3017 = vmatpush1.bf16.msra.mxu0 %v9882_v14  ;;  %v9870_v14 = vld [vmem:[#allocation2 + $0x5c8] ss:$48 sps:$4 sm:$0xff]  }
 0x253   :  { %3018 = vmatprep.subr.bf16.mxu0 %v9890_v15  ;;  %v9875_v15 = vld [vmem:[#allocation2 + $0x62c] ss:$48 sps:$4 sm:$0xff]  }
 0x254   :  { %3103 = vmatpush1.bf16.msra.mxu1 %v9828_v22  ;;  %v9975_v22 = vld [vmem:[#allocation2 + $0x6e0] ss:$48 sps:$4 sm:$0xff]  }
 0x255   :  { %3104 = vmatprep.subr.bf16.mxu1 %v9833_v23  ;;  %v9980_v23 = vld [vmem:[#allocation2 + $0x744] ss:$48 sps:$4 sm:$0xff]  }
 0x256   :  { %3019 = vmatpush1.bf16.msra.mxu0 %v9888_v19  ;;  %v9873_v19 = vld [vmem:[#allocation2 + $0x628] ss:$48 sps:$4 sm:$0xff]  }
 0x257   :  { %3020 = vmatprep.subr.bf16.mxu0 %v9896_v20  ;;  %v10788_v20 = vld [vmem:[%s12041_s12 + $0xc] ss:$16 sps:$4 sm:$0xff]  }
 0x258   :  { %3105 = vmatpush1.bf16.msra.mxu1 %v9831_v26  ;;  %v9978_v26 = vld [vmem:[#allocation2 + $0x740] ss:$48 sps:$4 sm:$0xff]  }
 0x259   :  { %3106 = vmatprep.subr.bf16.mxu1 %v9836_v39  ;;  %v9983_v39 = vld [vmem:[#allocation2 + $0x7a4] ss:$48 sps:$4 sm:$0xff]  }
 0x25a   :  { %3021 = vmatpush1.bf16.msra.mxu0 %v9894_v24  ;;  %v9879_v24 = vld [vmem:[#allocation2 + $0x688] ss:$48 sps:$4 sm:$0xff]  }
 0x25b   :  { %3022 = vmatprep.subr.bf16.mxu0 %v9902_v25  ;;  %v9887_v25 = vld [vmem:[#allocation2 + $0x6ec] ss:$48 sps:$4 sm:$0xff]  }
 0x25c   :  { %3107 = vmatpush1.bf16.msra.mxu1 %v9834_v63  ;;  %v9893_v63 = vld [vmem:[#allocation2 + $0x74c] ss:$48 sps:$4 sm:$0xff]  }
 0x25d   :  { %3108 = vmatprep.subr.bf16.mxu1 %v9839_v29  ;;  %v9981_v29 = vld [vmem:[#allocation2 + $0x7a0] ss:$48 sps:$4 sm:$0xff]  }
 0x25e   :  { %3023 = vmatpush1.bf16.msra.mxu0 %v9900_v27  ;;  %v670_v27 = vlaneseq }
 0x25f   :  { %3024 = vmatprep.subr.bf16.mxu0 %v9908_v28  ;;  %v9885_v28 = vld [vmem:[#allocation2 + $0x6e8] ss:$48 sps:$4 sm:$0xff]  }
 0x260   :  { %3109 = vmatpush1.bf16.msra.mxu1 %v9837_v31  ;;  %v9891_v31 = vld [vmem:[#allocation2 + $0x748] ss:$48 sps:$4 sm:$0xff]  }
 0x261   :  { %3110 = vmatprep.subr.bf16.mxu1 %v9842_v32  ;;  %v9899_v32 = vld [vmem:[#allocation2 + $0x7ac] ss:$48 sps:$4 sm:$0xff]  }
 0x262   :  { %3025 = vmatpush1.bf16.msra.mxu0 %v9906_v21  ;;  %v9986_v21 = vld [vmem:[#allocation2 + $0x804] ss:$48 sps:$4 sm:$0xff]  }
 0x263   :  { %3026 = vmatprep.subr.bf16.mxu0 %v9914_v30  ;;  %v11611_v30 = vshrl.u32 %v670_v27, 7  ;;  %v11230_v27 = vmov 0.0  }
 0x264   :  { %3111 = vmatpush1.bf16.msra.mxu1 %v9840_v35  ;;  %v9989_v35 = vld [vmem:[#allocation2 + $0x864] ss:$48 sps:$4 sm:$0xff]  }
 0x265   :  { %3112 = vmatprep.subr.bf16.mxu1 %v9845_v36  ;;  %v11616_v36 = vsub.s32 1, %v11611_v30 }
 0x266   :  { %3027 = vmatpush1.bf16.msra.mxu0 %v9912_v33  ;;  %v9984_v33 = vld [vmem:[#allocation2 + $0x800] ss:$48 sps:$4 sm:$0xff]  }
 0x267   :  { %3028 = vmatprep.subr.bf16.mxu0 %v9920_v34  ;;  %v11613_v34 = vld [vmem:[#allocation5] sm:$0xff] }
 0x268   :  { %3113 = vmatpush1.bf16.msra.mxu1 %v9843_v40  ;;  %v9905_v40 = vld [vmem:[#allocation2 + $0x80c] ss:$48 sps:$4 sm:$0xff]  }
 0x269   :  { %3114 = vmatprep.subr.bf16.mxu1 %v9848_v41  ;;  %v9987_v41 = vld [vmem:[#allocation2 + $0x860] ss:$48 sps:$4 sm:$0xff]  }
 0x26a   :  { %3029 = vmatpush1.bf16.msra.mxu0 %v9918_v37  ;;  %v9897_v37 = vld [vmem:[#allocation2 + $0x7a8] ss:$48 sps:$4 sm:$0xff]  }
 0x26b   :  { %3030 = vmatprep.subr.bf16.mxu0 %v9926_v38 }
 0x26c   :  { %3115 = vmatpush1.bf16.msra.mxu1 %v9846_v44  ;;  %v11624_v44 = vrot.slane %v11613_v34, %v11616_v36 }
 0x26d   :  { %3116 = vmatprep.subr.bf16.mxu1 %v9851_v45 }
 0x26e   :  { %3031 = vmatpush1.bf16.msra.mxu0 %v9924_v42 }
 0x26f   :  { %3032 = vmatprep.subr.bf16.mxu0 %v9932_v43  ;;  %v9992_v43 = vld [vmem:[#allocation2 + $0x8c4] ss:$48 sps:$4 sm:$0xff]  }
 0x270   :  { %3117 = vmatpush1.bf16.msra.mxu1 %v9849_v48 }
 0x271   :  { %3118 = vmatprep.subr.bf16.mxu1 %v9854_v49  ;;  %v9911_v49 = vld [vmem:[#allocation2 + $0x86c] ss:$48 sps:$4 sm:$0xff]  }
 0x272   :  { %3033 = vmatpush1.bf16.msra.mxu0 %v9930_v46 }
 0x273   :  { %3034 = vmatprep.subr.bf16.mxu0 %v9938_v47  ;;  %v9903_v47 = vld [vmem:[#allocation2 + $0x808] ss:$48 sps:$4 sm:$0xff]  }
 0x274   :  { %3119 = vmatpush1.bf16.msra.mxu1 %v9852_v52 }
 0x275   :  { %3120 = vmatprep.subr.bf16.mxu1 %v9857_v53  ;;  %v9909_v53 = vld [vmem:[#allocation2 + $0x868] ss:$48 sps:$4 sm:$0xff]  }
 0x276   :  { %3035 = vmatpush1.bf16.msra.mxu0 %v9936_v50  ;;  %v9990_v50 = vld [vmem:[#allocation2 + $0x8c0] ss:$48 sps:$4 sm:$0xff]  }
 0x277   :  { %3036 = vmatprep.subr.bf16.mxu0 %v9944_v51  ;;  %v9995_v51 = vld [vmem:[#allocation2 + $0x924] ss:$48 sps:$4 sm:$0xff]  }
 0x278   :  { %3121 = vmatpush1.bf16.msra.mxu1 %v9855_v56  ;;  %v9993_v56 = vld [vmem:[#allocation2 + $0x920] ss:$48 sps:$4 sm:$0xff]  }
 0x279   :  { %3122 = vmatprep.subr.bf16.mxu1 %v9860_v57 }
 0x27a   :  { %3037 = vmatpush1.bf16.msra.mxu0 %v9942_v54 }
 0x27b   :  { %3038 = vmatprep.subr.bf16.mxu0 %v9950_v55  ;;  %v9917_v55 = vld [vmem:[#allocation2 + $0x8cc] ss:$48 sps:$4 sm:$0xff]  }
 0x27c   :  { %3123 = vmatpush1.bf16.msra.mxu1 %v9858_v60  ;;  %v9915_v60 = vld [vmem:[#allocation2 + $0x8c8] ss:$48 sps:$4 sm:$0xff]  }
 0x27d   :  { %3124 = vmatprep.subr.bf16.mxu1 %v9863_v61  ;;  %v9923_v61 = vld [vmem:[#allocation2 + $0x92c] ss:$48 sps:$4 sm:$0xff]  }
 0x27e   :  { %3039 = vmatpush1.bf16.msra.mxu0 %v9948_v58  ;;  %v9998_v58 = vld [vmem:[#allocation2 + $0x984] ss:$48 sps:$4 sm:$0xff]  }
 0x27f   :  { %3040 = vmatprep.subr.bf16.mxu0 %v9956_v59 }
 0x280   :  { %3125 = vmatpush1.bf16.msra.mxu1 %v9861_v1  ;;  %v9921_v1 = vld [vmem:[#allocation2 + $0x928] ss:$48 sps:$4 sm:$0xff]  }
 0x281   :  { %3126 = vmatprep.subr.bf16.mxu1 %v9866_v2  ;;  %v9929_v2 = vld [vmem:[#allocation2 + $0x98c] ss:$48 sps:$4 sm:$0xff]  }
 0x282   :  { %3041 = vmatpush1.bf16.msra.mxu0 %v9954_v62  ;;  %v9996_v62 = vld [vmem:[#allocation2 + $0x980] ss:$48 sps:$4 sm:$0xff]  }
 0x283   :  { %3042 = vmatprep.subr.bf16.mxu0 %v9962_v0  ;;  %v10001_v0 = vld [vmem:[#allocation2 + $0x9e4] ss:$48 sps:$4 sm:$0xff]  }
 0x284   :  { %3127 = vmatpush1.bf16.msra.mxu1 %v9864_v6  ;;  %v9927_v6 = vld [vmem:[#allocation2 + $0x988] ss:$48 sps:$4 sm:$0xff]  }
 0x285   :  { %3128 = vmatprep.subr.bf16.mxu1 %v9869_v7  ;;  %v9935_v7 = vld [vmem:[#allocation2 + $0x9ec] ss:$48 sps:$4 sm:$0xff]  }
 0x286   :  { %3043 = vmatpush1.bf16.msra.mxu0 %v9960_v4  ;;  %v9999_v4 = vld [vmem:[#allocation2 + $0x9e0] ss:$48 sps:$4 sm:$0xff]  }
 0x287   :  { %3044 = vmatprep.subr.bf16.mxu0 %v9968_v5  ;;  %v10004_v5 = vld [vmem:[#allocation2 + $0xa44] ss:$48 sps:$4 sm:$0xff]  }
 0x288   :  { %3129 = vmatpush1.bf16.msra.mxu1 %v9867_v10  ;;  %v9933_v10 = vld [vmem:[#allocation2 + $0x9e8] ss:$48 sps:$4 sm:$0xff]  }
 0x289   :  { %3130 = vmatprep.subr.bf16.mxu1 %v9872_v11  ;;  %v9941_v11 = vld [vmem:[#allocation2 + $0xa4c] ss:$48 sps:$4 sm:$0xff]  }
 0x28a   :  { %3045 = vmatpush1.bf16.msra.mxu0 %v9966_v8  ;;  %v10002_v8 = vld [vmem:[#allocation2 + $0xa40] ss:$48 sps:$4 sm:$0xff]  }
 0x28b   :  { %3057 = vmatprep.subr.bf16.mxu0 %v9971_v9  ;;  %v10007_v9 = vld [vmem:[#allocation2 + $0xaa4] ss:$48 sps:$4 sm:$0xff]  }
 0x28c   :  { %3131 = vmatpush1.bf16.msra.mxu1 %v9870_v14  ;;  %v9939_v14 = vld [vmem:[#allocation2 + $0xa48] ss:$48 sps:$4 sm:$0xff]  }
 0x28d   :  { %3047 = vmatmul.mubr.bf16.vlgmr.msra.gmra.mrb[8].mxu0 %v10787_v17  ;;  %3143 = vmatprep.subr.bf16.mxu1 %v9875_v15  ;;  %v9947_v15 = vld [vmem:[#allocation2 + $0xaac] ss:$48 sps:$4 sm:$0xff]  }
 0x28e   :  { %3058 = vmatpush1.bf16.msra.mxu0 %v9969_v12  ;;  %3089 = vmatprep.mubr.bf16.mxu0 %v10788_v20  ;;  %v10005_v12 = vld [vmem:[#allocation2 + $0xaa0] ss:$48 sps:$4 sm:$0xff]  }
 0x28f   :  { %3059 = vmatprep.subr.bf16.mxu0 %v9974_v13  ;;  %3133 = vmatmul.mubr.bf16.vlgmr.msra.gmra.mrb[8].mxu1 %v10787_v17  ;;  %v10010_v13 = vld [vmem:[#allocation2 + $0xb04] ss:$48 sps:$4 sm:$0xff]  }
 0x290   :  { %3144 = vmatpush1.bf16.msra.mxu1 %v9873_v19  ;;  %3175 = vmatprep.mubr.bf16.mxu1 %v10788_v20  ;;  %v10013_v17 = vld [vmem:[#allocation2 + $0xb64] ss:$48 sps:$4 sm:$0xff]   ;;  %v9953_v19 = vld [vmem:[#allocation2 + $0xb0c] ss:$48 sps:$4 sm:$0xff]   ;;  %v10011_v20 = vld [vmem:[#allocation2 + $0xb60] ss:$48 sps:$4 sm:$0xff]  }
 0x291   :  { %3145 = vmatprep.subr.bf16.mxu1 %v9881_v3  ;;  %v10016_v3 = vld [vmem:[#allocation2 + $0xbc4] ss:$48 sps:$4 sm:$0xff]  }
 0x292   :  { %3060 = vmatpush1.bf16.msra.mxu0 %v9972_v16  ;;  %v10008_v16 = vld [vmem:[#allocation2 + $0xb00] ss:$48 sps:$4 sm:$0xff]  }
 0x293   :  { %3061 = vmatprep.subr.bf16.mxu0 %v9977_v18  ;;  %v9945_v18 = vld [vmem:[#allocation2 + $0xaa8] ss:$48 sps:$4 sm:$0xff]  }
 0x294   :  { %3146 = vmatpush1.bf16.msra.mxu1 %v9879_v24  ;;  %v10014_v24 = vld [vmem:[#allocation2 + $0xbc0] ss:$48 sps:$4 sm:$0xff]  }
 0x295   :  { %3147 = vmatprep.subr.bf16.mxu1 %v9887_v25  ;;  %v9957_v25 = vld [vmem:[#allocation2 + $0xb68] ss:$48 sps:$4 sm:$0xff]  }
 0x296   :  { %3062 = vmatpush1.bf16.msra.mxu0 %v9975_v22  ;;  %v9951_v22 = vld [vmem:[#allocation2 + $0xb08] ss:$48 sps:$4 sm:$0xff]  }
 0x297   :  { %3063 = vmatprep.subr.bf16.mxu0 %v9980_v23  ;;  %v9959_v23 = vld [vmem:[#allocation2 + $0xb6c] ss:$48 sps:$4 sm:$0xff]  }
 0x298   :  { %3148 = vmatpush1.bf16.msra.mxu1 %v9885_v28  ;;  %v10789_v28 = vld [vmem:[%s12041_s12 + $0x8] ss:$16 sps:$4 sm:$0xff]  }
 0x299   :  { %3149 = vmatprep.subr.bf16.mxu1 %v9893_v63  ;;  %v688_v63 = vsub.s32 4, %v11611_v30 }
 0x29a   :  { %3064 = vmatpush1.bf16.msra.mxu0 %v9978_v26  ;;  %v9965_v26 = vld [vmem:[#allocation2 + $0xbcc] ss:$48 sps:$4 sm:$0xff]  }
 0x29b   :  { %3065 = vmatprep.subr.bf16.mxu0 %v9983_v39  ;;  %v9963_v39 = vld [vmem:[#allocation2 + $0xbc8] ss:$48 sps:$4 sm:$0xff]  }
 0x29c   :  { %3150 = vmatpush1.bf16.msra.mxu1 %v9891_v31  ;;  %v11652_v31 = vsub.s32 0, %v11611_v30 }
 0x29d   :  { %3151 = vmatprep.subr.bf16.mxu1 %v9899_v32 }
 0x29e   :  { %3066 = vmatpush1.bf16.msra.mxu0 %v9981_v29  ;;  %v692_v29 = vsub.s32 5, %v11611_v30 }
 0x29f   :  { %3067 = vmatprep.subr.bf16.mxu0 %v9986_v21  ;;  %v689_v21 = vrot.slane %v11613_v34, %v688_v63 }
 0x2a0   :  { %v11618_v38 = vpop.f32.mrb[0].mxu0  ;;  %3152 = vmatpush1.bf16.msra.mxu1 %v9897_v37  ;;  %v693_v32 = vrot.slane %v11613_v34, %v692_v29 }
 0x2a1   :  { %v11620_v42 = vpop.f32.mrb[1].mxu0  ;;  %3153 = vmatprep.subr.bf16.mxu1 %v9905_v40  ;;  %v673_v40 = vrot.slane %v11613_v34, %v11652_v31 }
 0x2a2   :  { %v11626_v45 = vpop.f32.mrb[2].mxu0  ;;  %3068 = vmatpush1.bf16.msra.mxu0 %v9984_v33  ;;  %v11631_v52 = vpop.f32.mrb[0].mxu1 }
 0x2a3   :  { %v2753_v46 = vpop.f32.mrb[3].mxu0  ;;  %3069 = vmatprep.subr.bf16.mxu0 %v9989_v35  ;;  %v11633_v54 = vpop.f32.mrb[1].mxu1 }
 0x2a4   :  { %v11629_v48 = vadd.f32 %v2753_v46, %v11624_v44  ;;  %v11635_v57 = vpop.f32.mrb[2].mxu1  ;;  %3154 = vmatpush1.bf16.msra.mxu1 %v9903_v47 }
 0x2a5   :  { %v11637_v59 = vpop.f32.mrb[3].mxu1  ;;  %3155 = vmatprep.subr.bf16.mxu1 %v9911_v49 }
 0x2a6   :  { %3070 = vmatpush1.bf16.msra.mxu0 %v9987_v41 }
 0x2a7   :  { %3071 = vmatprep.subr.bf16.mxu0 %v9992_v43 }
 0x2a8   :  { %3156 = vmatpush1.bf16.msra.mxu1 %v9909_v53  ;;  %v9354_v53 = vadd.f32 %v11620_v42, %v11624_v44  ;;  %v667_v44 = vld [vmem:[#allocation5 + $0x8] sm:$0xf] }
 0x2a9   :  { %3157 = vmatprep.subr.bf16.mxu1 %v9917_v55 }
 0x2aa   :  { %3072 = vmatpush1.bf16.msra.mxu0 %v9990_v50 }
 0x2ab   :  { %3073 = vmatprep.subr.bf16.mxu0 %v9995_v51  ;;  %v9353_v51 = vadd.f32 %v11618_v38, %v673_v40 }
 0x2ac   :  { %3158 = vmatpush1.bf16.msra.mxu1 %v9915_v60 }
 0x2ad   :  { %3159 = vmatprep.subr.bf16.mxu1 %v9923_v61  ;;  %v9179_v60 = vpack.c.bf16 %v9353_v51, %v9353_v51 }
 0x2ae   :  { %3074 = vmatpush1.bf16.msra.mxu0 %v9993_v56 }
 0x2af   :  { %3075 = vmatprep.subr.bf16.mxu0 %v9998_v58 }
 0x2b0   :  { %3160 = vmatpush1.bf16.msra.mxu1 %v9921_v1  ;;  %v705_v1 = vrot.slane %v667_v44, %v11652_v31 }
 0x2b1   :  { %3161 = vmatprep.subr.bf16.mxu1 %v9929_v2  ;;  %v709_v2 = vrot.slane %v667_v44, %v11616_v36 }
 0x2b2   :  { %3076 = vmatpush1.bf16.msra.mxu0 %v9996_v62  ;;  %v9185_v62 = vpack.c.bf16 %v9354_v53, %v9354_v53 }
 0x2b3   :  { %3077 = vmatprep.subr.bf16.mxu0 %v10001_v0  ;;  %v9355_v0 = vadd.f32 %v11626_v45, %v673_v40 }
 0x2b4   :  { %3162 = vmatpush1.bf16.msra.mxu1 %v9927_v6  ;;  %v11683_v6 = vsub.s32 2, %v11611_v30 }
 0x2b5   :  { %3163 = vmatprep.subr.bf16.mxu1 %v9935_v7  ;;  %v9180_v42 = vpack.c.bf16 %v9355_v0, %v9355_v0 }
 0x2b6   :  { %3078 = vmatpush1.bf16.msra.mxu0 %v9999_v4 }
 0x2b7   :  { %3079 = vmatprep.subr.bf16.mxu0 %v10004_v5 }
 0x2b8   :  { %3164 = vmatpush1.bf16.msra.mxu1 %v9933_v10 }
 0x2b9   :  { %3165 = vmatprep.subr.bf16.mxu1 %v9941_v11 }
 0x2ba   :  { %3080 = vmatpush1.bf16.msra.mxu0 %v10002_v8 }
 0x2bb   :  { %3081 = vmatprep.subr.bf16.mxu0 %v10007_v9  ;;  %v11686_v9 = vsub.s32 3, %v11611_v30 }
 0x2bc   :  { %3166 = vmatpush1.bf16.msra.mxu1 %v9939_v14 }
 0x2bd   :  { %3167 = vmatprep.subr.bf16.mxu1 %v9947_v15 }
 0x2be   :  { %3082 = vmatpush1.bf16.msra.mxu0 %v10005_v12 }
 0x2bf   :  { %3083 = vmatprep.subr.bf16.mxu0 %v10010_v13  ;;  %v713_v13 = vrot.slane %v667_v44, %v11683_v6 }
 0x2c0   :  { %3168 = vmatpush1.bf16.msra.mxu1 %v9945_v18 }
 0x2c1   :  { %3169 = vmatprep.subr.bf16.mxu1 %v9953_v19 }
 0x2c2   :  { %3084 = vmatpush1.bf16.msra.mxu0 %v10008_v16  ;;  %v717_v16 = vrot.slane %v667_v44, %v11686_v9 }
 0x2c3   :  { %3085 = vmatprep.subr.bf16.mxu0 %v10013_v17 }
 0x2c4   :  { %3170 = vmatpush1.bf16.msra.mxu1 %v9951_v22 }
 0x2c5   :  { %3171 = vmatprep.subr.bf16.mxu1 %v9959_v23 }
 0x2c6   :  { %3086 = vmatpush1.bf16.msra.mxu0 %v10011_v20 }
 0x2c7   :  { %3087 = vmatprep.subr.bf16.mxu0 %v10016_v3 }
 0x2c8   :  { %3172 = vmatpush1.bf16.msra.mxu1 %v9957_v25 }
 0x2c9   :  { %3173 = vmatprep.subr.bf16.mxu1 %v9965_v26 }
 0x2ca   :  { %3088 = vmatpush1.bf16.msra.mxu0 %v10014_v24 }
 0x2cb   :  { %9281 = vmatprep.subr.bf16.mxu0 %v11230_v27 }
 0x2cc   :  { %3174 = vmatpush1.bf16.msra.mxu1 %v9963_v39 }
 0x2cd   :  { %3090 = vmatmul.mubr.bf16.vlgmr.msra.gmra.mrb[8].mxu0 %v10789_v28  ;;  %9257 = vmatprep.subr.bf16.mxu1 %v11230_v27 }
 0x2ce   :  { %9283 = vmatprep.mubr.msk.bf16.mxu0 %vm11231_vm0, %v11230_v27 }
 0x2cf   :  { %3176 = vmatmul.mubr.bf16.vlgmr.msra.gmra.mrb[8].mxu1 %v10789_v28 }
 0x2d0   :  { %9259 = vmatprep.mubr.msk.bf16.mxu1 %vm11231_vm0, %v11230_v27 }
 0x320   :  { %v2919_v33 = vpop.f32.mrb[4].mxu0 }
 0x321   :  { %v9361_v35 = vadd.f32 %v2919_v33, %v689_v21  ;;  %v2921_v37 = vpop.f32.mrb[5].mxu0 }
 0x322   :  { %v9362_v41 = vadd.f32 %v2921_v37, %v693_v32  ;;  %v2923_v43 = vpop.f32.mrb[6].mxu0  ;;  %v11663_v56 = vpop.f32.mrb[4].mxu1 }
 0x323   :  { %v9181_v46 = vpack.c.bf16 %v9361_v35, %v9361_v35  ;;  %v2925_v47 = vpop.f32.mrb[7].mxu0  ;;  %v9363_v55 = vadd.f32 %v2923_v43, %v689_v21  ;;  %v11666_v34 = vpop.f32.mrb[5].mxu1 }
 0x324   :  { %v9187_v49 = vpack.c.bf16 %v9362_v41, %v9362_v41  ;;  %v11657_v50 = vadd.f32 %v2925_v47, %v693_v32  ;;  %v11668_v58 = vpop.f32.mrb[6].mxu1 }
 0x325   :  { %9258 = vmatpush3.bf16.xpose.msra.mxu1 %v9181_v46  ;;  %v11670_v61 = vpop.f32.mrb[7].mxu1  ;;  %v9182_v38 = vpack.c.bf16 %v9363_v55, %v9363_v55 }
 0x326   :  { %9282 = vmatpush3.bf16.xpose.msra.mxu0 %v9187_v49  ;;  %9263 = vmatprep.subr.bf16.mxu1 %v11230_v27 }
 0x327   :  { %9293 = vmatprep.subr.bf16.mxu0 %v11230_v27 }
 0x32c   :  { %9260 = vmatmul.mubr.bf16.vlgmr.msra.gmra.mrb[12].mxu1 %v9179_v60 }
 0x32d   :  { %9264 = vmatpush3.bf16.xpose.msra.mxu1 %v9182_v38  ;;  %9284 = vmatmul.mubr.bf16.vlgmr.msra.gmra.mrb[12].mxu0 %v9185_v62 }
 0x32e   :  { %9265 = vmatprep.mubr.msk.bf16.mxu1 %vm11231_vm0, %v11230_v27  ;;  %9269 = vmatprep.subr.bf16.mxu1 %v11230_v27 }
 0x32f   :  { %9295 = vmatprep.mubr.msk.bf16.mxu0 %vm11231_vm0, %v11230_v27 }
 0x334   :  { %9266 = vmatmul.mubr.bf16.vlgmr.msra.gmra.mrb[16].mxu1 %v9180_v42 }
 0x335   :  { %9271 = vmatprep.mubr.msk.bf16.mxu1 %vm11231_vm0, %v11230_v27 }
 0x3a0   :  { %v3091_v4 = vpop.f32.mrb[8].mxu0 }
 0x3a1   :  { %v9369_v45 = vadd.f32 %v3091_v4, %v705_v1  ;;  %v3093_v5 = vpop.f32.mrb[9].mxu0 }
 0x3a2   :  { %v9370_v7 = vadd.f32 %v3093_v5, %v709_v2  ;;  %v3095_v8 = vpop.f32.mrb[10].mxu0  ;;  %v3177_v3 = vpop.f32.mrb[8].mxu1 }
 0x3a3   :  { %v9183_v10 = vpack.c.bf16 %v9369_v45, %v9369_v45  ;;  %v9371_v11 = vadd.f32 %v3095_v8, %v705_v1  ;;  %v3097_v12 = vpop.f32.mrb[11].mxu0  ;;  %v9373_v23 = vadd.f32 %v3177_v3, %v713_v13  ;;  %v3179_v24 = vpop.f32.mrb[9].mxu1 }
 0x3a4   :  { %v9189_v14 = vpack.c.bf16 %v9370_v7, %v9370_v7  ;;  %v9372_v15 = vadd.f32 %v3097_v12, %v709_v2  ;;  %v9374_v26 = vadd.f32 %v3179_v24, %v717_v16  ;;  %v3181_v39 = vpop.f32.mrb[10].mxu1 }
 0x3a5   :  { %v3329_v17 = vsel %vm3327_vm1, %v9183_v10, 0  ;;  %v9184_v18 = vpack.c.bf16 %v9371_v11, %v9371_v11  ;;  %v9195_v28 = vpack.c.bf16 %v9373_v23, %v9373_v23  ;;  %v9375_v63 = vadd.f32 %v3181_v39, %v713_v13  ;;  %v3183_v29 = vpop.f32.mrb[11].mxu1 }
 0x3a6   :  { %v3594_v19 = vsel %vm3327_vm1, %v9189_v14, 0  ;;  %v9190_v20 = vpack.c.bf16 %v9372_v15, %v9372_v15  ;;  %9270 = vmatpush3.bf16.msra.mxu1 %v3329_v17  ;;  %v9201_v21 = vpack.c.bf16 %v9374_v26, %v9374_v26  ;;  %v9376_v32 = vadd.f32 %v3183_v29, %v717_v16 }
 0x3a7   :  { %v11693_v22 = vsel %vm3327_vm1, %v9184_v18, 0  ;;  %9294 = vmatpush3.bf16.msra.mxu0 %v3594_v19  ;;  %9275 = vmatprep.subr.bf16.mxu1 %v11230_v27  ;;  %v11700_v33 = vsel %vm3327_vm1, %v9195_v28, 0  ;;  %v9196_v35 = vpack.c.bf16 %v9375_v63, %v9375_v63 }
 0x3a8   :  { %v11697_v25 = vsel %vm3327_vm1, %v9190_v20, 0  ;;  %v11703_v37 = vsel %vm3327_vm1, %v9201_v21, 0  ;;  %v9202_v40 = vpack.c.bf16 %v9376_v32, %v9376_v32 }
 0x3a9   :  { %v11706_v41 = vsel %vm3327_vm1, %v9196_v35, 0  ;;  %v9188_v35 = vpack.c.bf16 %v11657_v50, %v11657_v50 }
 0x3aa   :  { %v11709_v43 = vsel %vm3327_vm1, %v9202_v40, 0 }
 0x3ff   :  { %v3251_v46 = vpop.f32.mrb[12].mxu1 }
 0x400   :  { %v9261_v47 = vpop.f32.mrb[13].mxu1  ;;  %v3518_v49 = vpop.f32.mrb[12].mxu0  ;;  %v3298_v51 = vsel %vm3297_vm2, %v3251_v46, -inf }
 0x401   :  { %v9285_v53 = vpop.f32.mrb[13].mxu0  ;;  %3299 = vmax.xlane.f32.xlu0 %v3298_v51  ;;  %v3254_v55 = vpop.f32.mrb[14].mxu1  ;;  %v3564_v4 = vsel %vm3297_vm2, %v3518_v49, -inf }
 0x402   :  { %v9262_v60 = vpop.f32.mrb[15].mxu1  ;;  %v3521_v62 = vpop.f32.mrb[14].mxu0 }
 0x403   :  { %v9286_v38 = vpop.f32.mrb[15].mxu0 }
 0x407   :  { %v3291_v0 = vpop.f32.mrb[16].mxu1 }
 0x408   :  { %v9267_v42 = vpop.f32.mrb[17].mxu1  ;;  %v3301_v44 = vsel %vm3297_vm2, %v3291_v0, -inf }
 0x409   :  { %3302 = vmax.xlane.f32.xlu0 %v3301_v44  ;;  %v3294_v1 = vpop.f32.mrb[18].mxu1 }
 0x40a   :  { %v9268_v2 = vpop.f32.mrb[19].mxu1 }
 0x40d   :  { %3565 = vmax.xlane.f32.xlu0 %v3564_v4 }
 0x48e   :  { %v3300_v45 = vpop.xlane.xlu0 %3299 }
 0x48f   :  { %v3304_v5 = vsub.f32 %v3251_v46, %v3300_v45  ;;  %v9186_v46 = vpack.c.bf16 %v11629_v48, %v11629_v48 }
 0x491   :  { %v3306_v7 = vmul.f32 1.442695, %v3304_v5 }
 0x493   :  { %10753 = vpow2.f32 %v3306_v7 }
 0x496   :  { %v3303_v8 = vpop.xlane.xlu0 %3302 }
 0x497   :  { %v3305_v10 = vsub.f32 %v3291_v0, %v3303_v8 }
 0x499   :  { %v3308_v11 = vmul.f32 1.442695, %v3305_v10 }
 0x49a   :  { %v3566_v12 = vpop.xlane.xlu0 %3565 }
 0x49b   :  { %10755 = vpow2.f32 %v3308_v11  ;;  %v3570_v13 = vsub.f32 %v3518_v49, %v3566_v12 }
 0x49d   :  { %v10754_v14 = vpop.eup %10753  ;;  %v3572_v15 = vmul.f32 1.442695, %v3570_v13 }
 0x49e   :  { %v3310_v16 = vsel %vm3297_vm2, %v10754_v14, 0.0 }
 0x49f   :  { %10757 = vpow2.f32 %v3572_v15  ;;  %3311 = vadd.xlane.f32.xlu1 %v3310_v16 }
 0x4a5   :  { %v10756_v17 = vpop.eup %10755 }
 0x4a6   :  { %v3313_v18 = vsel %vm3297_vm2, %v10756_v17, 0.0 }
 0x4a7   :  { %3314 = vadd.xlane.f32.xlu1 %v3313_v18 }
 0x4a9   :  { %v10758_v19 = vpop.eup %10757 }
 0x4aa   :  { %v3576_v20 = vsel %vm3297_vm2, %v10758_v19, 0.0 }
 0x4ab   :  { %3577 = vadd.xlane.f32.xlu0 %v3576_v20 }
 0x52c   :  { %v3312_v3 = vpop.xlane.xlu1 %3311 }
 0x52d   :  { %10759 = vrcp.f32 %v3312_v3 }
 0x534   :  { %v3315_v23 = vpop.xlane.xlu1 %3314 }
 0x535   :  { %10761 = vrcp.f32 %v3315_v23 }
 0x537   :  { %v10760_v24 = vpop.eup %10759 }
 0x538   :  { %v3320_v26 = vmul.f32 %v10760_v24, %v10754_v14  ;;  %v3578_v39 = vpop.xlane.xlu0 %3577 }
 0x539   :  { %10763 = vrcp.f32 %v3578_v39 }
 0x53a   :  { %v3322_v28 = vpack.c.bf16 %v3320_v26, %v3320_v26 }
 0x53c   :  { %9272 = vmatmul.mubr.msk.bf16.vlgmr.msra.gmra.mrb[20].mxu1 %vm3297_vm2, %v3322_v28 }
 0x53d   :  { %9276 = vmatpush3.bf16.msra.mxu1 %v11693_v22  ;;  %9277 = vmatprep.mubr.msk.bf16.mxu1 %vm11231_vm0, %v11230_v27 }
 0x53e   :  { %9287 = vmatprep.subr.bf16.mxu1 %v11230_v27 }
 0x53f   :  { %v10762_v63 = vpop.eup %10761 }
 0x540   :  { %v3321_v29 = vmul.f32 %v10762_v63, %v10756_v17 }
 0x542   :  { %v3323_v21 = vpack.c.bf16 %v3321_v29, %v3321_v29 }
 0x543   :  { %v10764_v32 = vpop.eup %10763 }
 0x544   :  { %v3586_v40 = vmul.f32 %v10764_v32, %v10758_v19  ;;  %9278 = vmatmul.mubr.msk.bf16.vlgmr.msra.gmra.mrb[24].mxu1 %vm3297_vm2, %v3323_v21  ;;  %v10017_v32 = vld [vmem:[#allocation7 + $0x100] ss:$16 sps:$4 sm:$0xff]  }
 0x545   :  { %9289 = vmatprep.mubr.msk.bf16.mxu1 %vm11231_vm0, %v11230_v27 }
 0x546   :  { %9288 = vmatpush3.bf16.xpose.msra.mxu1 %v9188_v35  ;;  %v3588_v22 = vpack.c.bf16 %v3586_v40, %v3586_v40  ;;  %v10019_v35 = vld [vmem:[#allocation7 + $0x104] ss:$16 sps:$4 sm:$0xff]   ;;  %v10022_v40 = vld [vmem:[#allocation7 + $0x10c] ss:$16 sps:$4 sm:$0xff]  }
 0x547   :  { %9299 = vmatprep.subr.bf16.mxu1 %v11230_v27  ;;  %3898 = vmatprep.subr.bf16.mxu0 %v10019_v35 }
 0x548   :  { %9296 = vmatmul.mubr.msk.bf16.vlgmr.msra.gmra.mrb[16].mxu0 %vm3297_vm2, %v3588_v22  ;;  %v10025_v22 = vld [vmem:[#allocation7 + $0x124] ss:$16 sps:$4 sm:$0xff]  }
 0x549   :  { %3899 = vmatpush1.bf16.msra.mxu0 %v10017_v32 }
 0x54a   :  { %3900 = vmatprep.subr.bf16.mxu0 %v10025_v22 }
 0x54d   :  { %9290 = vmatmul.mubr.bf16.vlgmr.msra.gmra.mrb[28].mxu1 %v9186_v46  ;;  %v10023_v46 = vld [vmem:[#allocation7 + $0x120] ss:$16 sps:$4 sm:$0xff]  }
 0x54e   :  { %9300 = vmatpush3.bf16.msra.mxu1 %v11697_v25  ;;  %9301 = vmatprep.mubr.msk.bf16.mxu1 %vm11231_vm0, %v11230_v27 }
 0x54f   :  { %3939 = vmatprep.subr.bf16.mxu1 %v10022_v40  ;;  %3901 = vmatpush1.bf16.msra.mxu0 %v10023_v46 }
 0x60f   :  { %v3365_v50 = vpop.f32.mrb[20].mxu1 }
 0x610   :  { %v3417_v47 = vrot.slane %v3365_v50, 4  ;;  %v9273_v49 = vpop.f32.mrb[21].mxu1 }
 0x611   :  { %v3368_v51 = vpop.f32.mrb[22].mxu1 }
 0x612   :  { %v3418_v53 = vadd.f32 %v3417_v47, %v3365_v50  ;;  %v9274_v55 = vpop.f32.mrb[23].mxu1  ;;  %v10031_v50 = vld [vmem:[#allocation7 + $0x144] ss:$16 sps:$4 sm:$0xff]   ;;  %v10029_v47 = vld [vmem:[#allocation7 + $0x140] ss:$16 sps:$4 sm:$0xff]  }
 0x613   :  { %3902 = vmatprep.subr.bf16.mxu0 %v10031_v50  ;;  %v10020_v55 = vld [vmem:[#allocation7 + $0x108] ss:$16 sps:$4 sm:$0xff]  }
 0x614   :  { %v3419_v60 = vrot.slane %v3418_v53, 2  ;;  %3903 = vmatpush1.bf16.msra.mxu0 %v10029_v47 }
 0x616   :  { %v3420_v62 = vadd.f32 %v3419_v60, %v3418_v53 }
 0x617   :  { %v3411_v38 = vpop.f32.mrb[24].mxu1 }
 0x618   :  { %v3421_v0 = vrot.slane %v3420_v62, 1  ;;  %v3423_v42 = vrot.slane %v3411_v38, 4  ;;  %v9279_v44 = vpop.f32.mrb[25].mxu1 }
 0x619   :  { %v3414_v1 = vpop.f32.mrb[26].mxu1  ;;  %v10037_v44 = vld [vmem:[#allocation7 + $0x164] ss:$16 sps:$4 sm:$0xff]  }
 0x61a   :  { %v3424_v48 = vadd.f32 %v3423_v42, %v3411_v38  ;;  %v9280_v2 = vpop.f32.mrb[27].mxu1  ;;  %v3422_v25 = vadd.f32 %v3421_v0, %v3420_v62  ;;  %v10028_v62 = vld [vmem:[#allocation7 + $0x12c] ss:$16 sps:$4 sm:$0xff]   ;;  %v10026_v38 = vld [vmem:[#allocation7 + $0x128] ss:$16 sps:$4 sm:$0xff]   ;;  %3904 = vmatprep.subr.bf16.mxu0 %v10037_v44 }
 0x61b   :  { %v11734_v4 = vpop.f32.mrb[16].mxu0  ;;  %v10034_v0 = vld [vmem:[#allocation7 + $0x14c] ss:$16 sps:$4 sm:$0xff]   ;;  %v10032_v42 = vld [vmem:[#allocation7 + $0x148] ss:$16 sps:$4 sm:$0xff]  }
 0x61c   :  { %v3425_v45 = vrot.slane %v3424_v48, 2  ;;  %v9297_v5 = vpop.f32.mrb[17].mxu0  ;;  %v3429_v11 = vmul.f32 0.125, %v3422_v25  ;;  %v10040_v1 = vld [vmem:[#allocation7 + $0x16c] ss:$16 sps:$4 sm:$0xff]  }
 0x61d   :  { %v3633_v7 = vpop.f32.mrb[18].mxu0  ;;  %v10038_v2 = vld [vmem:[#allocation7 + $0x168] ss:$16 sps:$4 sm:$0xff]   ;;  %v10043_v25 = vld [vmem:[#allocation7 + $0x184] ss:$16 sps:$4 sm:$0xff]  }
 0x61e   :  { %v3426_v8 = vadd.f32 %v3425_v45, %v3424_v48  ;;  %v9298_v10 = vpop.f32.mrb[19].mxu0  ;;  %v3431_v19 = vpack.c.bf16 %v3429_v11, %v3429_v11  ;;  %v10035_v48 = vld [vmem:[#allocation7 + $0x160] ss:$16 sps:$4 sm:$0xff]   ;;  %v10046_v45 = vld [vmem:[#allocation7 + $0x18c] ss:$16 sps:$4 sm:$0xff]  }
 0x61f   :  { %3905 = vmatpush1.bf16.msra.mxu0 %v10035_v48  ;;  %v10041_v5 = vld [vmem:[#allocation7 + $0x180] ss:$16 sps:$4 sm:$0xff]   ;;  %v10044_v7 = vld [vmem:[#allocation7 + $0x188] ss:$16 sps:$4 sm:$0xff]   ;;  %v10052_v10 = vld [vmem:[#allocation7 + $0x1ac] ss:$16 sps:$4 sm:$0xff]  }
 0x620   :  { %v3427_v12 = vrot.slane %v3426_v8, 1  ;;  %v3558_v13 = vpop.f32.mrb[28].mxu1  ;;  %v3982_v23 = vunpack.c.l.b16 %v3431_v19  ;;  %3906 = vmatprep.subr.bf16.mxu0 %v10043_v25  ;;  %v10047_v11 = vld [vmem:[#allocation7 + $0x1a0] ss:$16 sps:$4 sm:$0xff]   ;;  %v10073_v25 = vld [vmem:[#allocation7 + $0x24] ss:$16 sps:$4 sm:$0xff]  }
 0x621   :  { %v9291_v14 = vpop.f32.mrb[29].mxu1  ;;  %v3567_v15 = vsel %vm3297_vm2, %v3558_v13, -inf  ;;  %v10059_v19 = vld [vmem:[#allocation7 + $0x1e0] ss:$16 sps:$4 sm:$0xff]  }
 0x622   :  { %v3428_v16 = vadd.f32 %v3427_v12, %v3426_v8  ;;  %3568 = vmax.xlane.f32.xlu1 %v3567_v15  ;;  %v3561_v17 = vpop.f32.mrb[30].mxu1  ;;  %v10049_v8 = vld [vmem:[#allocation7 + $0x1a4] ss:$16 sps:$4 sm:$0xff]   ;;  %v10050_v12 = vld [vmem:[#allocation7 + $0x1a8] ss:$16 sps:$4 sm:$0xff]  }
 0x623   :  { %v9292_v18 = vpop.f32.mrb[31].mxu1  ;;  %3907 = vmatpush1.bf16.msra.mxu0 %v10041_v5  ;;  %v10058_v14 = vld [vmem:[#allocation7 + $0x1cc] ss:$16 sps:$4 sm:$0xff]   ;;  %v10053_v15 = vld [vmem:[#allocation7 + $0x1c0] ss:$16 sps:$4 sm:$0xff]  }
 0x624   :  { %v3430_v20 = vmul.f32 0.125, %v3428_v16  ;;  %3908 = vmatprep.subr.bf16.mxu0 %v10049_v8  ;;  %v10056_v16 = vld [vmem:[#allocation7 + $0x1c8] ss:$16 sps:$4 sm:$0xff]   ;;  %v10061_v17 = vld [vmem:[#allocation7 + $0x1e4] ss:$16 sps:$4 sm:$0xff]  }
 0x625   :  { %v10064_v18 = vld [vmem:[#allocation7 + $0x1ec] ss:$16 sps:$4 sm:$0xff]   ;;  %v10065_v44 = vld [vmem:[#allocation7] ss:$16 sps:$4 sm:$0xff]   ;;  %v10079_v8 = vld [vmem:[#allocation7 + $0x44] ss:$16 sps:$4 sm:$0xff]  }
 0x626   :  { %v3432_v3 = vpack.c.bf16 %v3430_v20, %v3430_v20  ;;  %v10062_v20 = vld [vmem:[#allocation7 + $0x1e8] ss:$16 sps:$4 sm:$0xff]   ;;  %v10071_v5 = vld [vmem:[#allocation7 + $0x20] ss:$16 sps:$4 sm:$0xff]  }
 0x627   :  { %3909 = vmatpush1.bf16.msra.mxu0 %v10047_v11  ;;  %v10077_v11 = vld [vmem:[#allocation7 + $0x40] ss:$16 sps:$4 sm:$0xff]  }
 0x628   :  { %v3983_v24 = vunpack.c.l.b16 %v3432_v3  ;;  %v10067_v3 = vld [vmem:[#allocation7 + $0x4] ss:$16 sps:$4 sm:$0xff]  }
 0x62a   :  { %v11738_v26 = vsel %vm3734_vm3, %v3983_v24, %v3982_v23  ;;  %v10070_v23 = vld [vmem:[#allocation7 + $0xc] ss:$16 sps:$4 sm:$0xff]   ;;  %v11232_v24 = vmov 0  }
 0x62b   :  { %3930 = vmatprep.mubr.bf16.mxu0 %v11232_v24 }
 0x6af   :  { %v3569_v39 = vpop.xlane.xlu1 %3568 }
 0x6b0   :  { %v3571_v28 = vsub.f32 %v3558_v13, %v3569_v39  ;;  %v10055_v13 = vld [vmem:[#allocation7 + $0x1c4] ss:$16 sps:$4 sm:$0xff]   ;;  %v3682_v39 = vrot.slane %v11734_v4, 4 }
 0x6b1   :  { %3910 = vmatprep.subr.bf16.mxu0 %v10055_v13  ;;  %v10085_v13 = vld [vmem:[#allocation7 + $0x64] ss:$16 sps:$4 sm:$0xff]  }
 0x6b2   :  { %v3574_v63 = vmul.f32 1.442695, %v3571_v28  ;;  %3911 = vmatpush1.bf16.msra.mxu0 %v10053_v15  ;;  %v3683_v28 = vadd.f32 %v3682_v39, %v11734_v4  ;;  %v10083_v15 = vld [vmem:[#allocation7 + $0x60] ss:$16 sps:$4 sm:$0xff]  }
 0x6b3   :  { %3912 = vmatprep.subr.bf16.mxu0 %v10061_v17  ;;  %v10091_v17 = vld [vmem:[#allocation7 + $0x84] ss:$16 sps:$4 sm:$0xff]   ;;  %v10095_v39 = vld [vmem:[#allocation7 + $0xa0] ss:$16 sps:$4 sm:$0xff]  }
 0x6b4   :  { %10765 = vpow2.f32 %v3574_v63  ;;  %v3684_v63 = vrot.slane %v3683_v28, 2 }
 0x6b6   :  { %3913 = vmatpush1.bf16.msra.mxu0 %v10059_v19  ;;  %v10089_v19 = vld [vmem:[#allocation7 + $0x80] ss:$16 sps:$4 sm:$0xff]  }
 0x6b7   :  { %4147 = vmatprep.subr.bf16.mxu0 %v10067_v3  ;;  %v10097_v3 = vld [vmem:[#allocation7 + $0xa4] ss:$16 sps:$4 sm:$0xff]  }
 0x6be   :  { %v10766_v29 = vpop.eup %10765 }
 0x6bf   :  { %v3579_v21 = vsel %vm3297_vm2, %v10766_v29, 0.0 }
 0x6c0   :  { %3580 = vadd.xlane.f32.xlu1 %v3579_v21 }
 0x74d   :  { %v3581_v49 = vpop.xlane.xlu1 %3580 }
 0x74e   :  { %10767 = vrcp.f32 %v3581_v49 }
 0x758   :  { %v10768_v51 = vpop.eup %10767 }
 0x759   :  { %v3587_v53 = vmul.f32 %v10768_v51, %v10766_v29  ;;  %v3685_v29 = vadd.f32 %v3684_v63, %v3683_v28  ;;  %v10098_v28 = vld [vmem:[#allocation7 + $0xa8] ss:$16 sps:$4 sm:$0xff]   ;;  %v10103_v63 = vld [vmem:[#allocation7 + $0xc4] ss:$16 sps:$4 sm:$0xff]  }
 0x75b   :  { %v3589_v60 = vpack.c.bf16 %v3587_v53, %v3587_v53  ;;  %v3686_v32 = vrot.slane %v3685_v29, 1 }
 0x75d   :  { %9302 = vmatmul.mubr.msk.bf16.vlgmr.msra.gmra.mrb[32].mxu1 %vm3297_vm2, %v3589_v60  ;;  %v3687_v47 = vadd.f32 %v3686_v32, %v3685_v29  ;;  %v10106_v29 = vld [vmem:[#allocation7 + $0xcc] ss:$16 sps:$4 sm:$0xff]   ;;  %v10104_v32 = vld [vmem:[#allocation7 + $0xc8] ss:$16 sps:$4 sm:$0xff]  }
 0x75e   :  { %3940 = vmatpush1.bf16.msra.mxu1 %v10020_v55  ;;  %3971 = vmatprep.mubr.bf16.mxu1 %v11232_v24 }
 0x75f   :  { %3941 = vmatprep.subr.bf16.mxu1 %v10028_v62  ;;  %v3694_v53 = vmul.f32 0.125, %v3687_v47  ;;  %v11750_v47 = vld [vmem:[#allocation5] sm:$0xff] }
 0x761   :  { %v3696_v62 = vpack.c.bf16 %v3694_v53, %v3694_v53 }
 0x762   :  { %3942 = vmatpush1.bf16.msra.mxu1 %v10026_v38 }
 0x763   :  { %3943 = vmatprep.subr.bf16.mxu1 %v10034_v0 }
 0x766   :  { %3944 = vmatpush1.bf16.msra.mxu1 %v10032_v42  ;;  %v3732_v42 = vunpack.c.l.b16 %v3696_v62 }
 0x767   :  { %3945 = vmatprep.subr.bf16.mxu1 %v10040_v1  ;;  %v10068_v1 = vld [vmem:[#allocation7 + $0x8] ss:$16 sps:$4 sm:$0xff]  }
 0x76a   :  { %3946 = vmatpush1.bf16.msra.mxu1 %v10038_v2 }
 0x76b   :  { %3947 = vmatprep.subr.bf16.mxu1 %v10046_v45  ;;  %v10076_v45 = vld [vmem:[#allocation7 + $0x2c] ss:$16 sps:$4 sm:$0xff]  }
 0x76e   :  { %3948 = vmatpush1.bf16.msra.mxu1 %v10044_v7  ;;  %v10074_v7 = vld [vmem:[#allocation7 + $0x28] ss:$16 sps:$4 sm:$0xff]  }
 0x76f   :  { %3949 = vmatprep.subr.bf16.mxu1 %v10052_v10  ;;  %v10082_v10 = vld [vmem:[#allocation7 + $0x4c] ss:$16 sps:$4 sm:$0xff]  }
 0x772   :  { %3950 = vmatpush1.bf16.msra.mxu1 %v10050_v12  ;;  %v10080_v12 = vld [vmem:[#allocation7 + $0x48] ss:$16 sps:$4 sm:$0xff]  }
 0x773   :  { %3951 = vmatprep.subr.bf16.mxu1 %v10058_v14  ;;  %v10088_v14 = vld [vmem:[#allocation7 + $0x6c] ss:$16 sps:$4 sm:$0xff]  }
 0x776   :  { %3952 = vmatpush1.bf16.msra.mxu1 %v10056_v16  ;;  %v10086_v16 = vld [vmem:[#allocation7 + $0x68] ss:$16 sps:$4 sm:$0xff]  }
 0x777   :  { %3953 = vmatprep.subr.bf16.mxu1 %v10064_v18  ;;  %v10094_v18 = vld [vmem:[#allocation7 + $0x8c] ss:$16 sps:$4 sm:$0xff]  }
 0x77a   :  { %3954 = vmatpush1.bf16.msra.mxu1 %v10062_v20  ;;  %v10092_v20 = vld [vmem:[#allocation7 + $0x88] ss:$16 sps:$4 sm:$0xff]  }
 0x77b   :  { %4188 = vmatprep.subr.bf16.mxu1 %v10070_v23  ;;  %v10100_v23 = vld [vmem:[#allocation7 + $0xac] ss:$16 sps:$4 sm:$0xff]  }
 0x830   :  { %v3676_v21 = vpop.f32.mrb[32].mxu1 }
 0x831   :  { %v3688_v35 = vrot.slane %v3676_v21, 4  ;;  %v9303_v40 = vpop.f32.mrb[33].mxu1 }
 0x832   :  { %v3679_v22 = vpop.f32.mrb[34].mxu1  ;;  %v10112_v40 = vld [vmem:[#allocation7 + $0xec] ss:$16 sps:$4 sm:$0xff]  }
 0x833   :  { %v3689_v46 = vadd.f32 %v3688_v35, %v3676_v21  ;;  %v9304_v50 = vpop.f32.mrb[35].mxu1  ;;  %v10101_v21 = vld [vmem:[#allocation7 + $0xc0] ss:$16 sps:$4 sm:$0xff]   ;;  %v10109_v35 = vld [vmem:[#allocation7 + $0xe4] ss:$16 sps:$4 sm:$0xff]   ;;  %v696_v22 = vsub.s32 6, %v11611_v30 }
 0x834   :  { %v10110_v50 = vld [vmem:[#allocation7 + $0xe8] ss:$16 sps:$4 sm:$0xff]  }
 0x835   :  { %v3690_v49 = vrot.slane %v3689_v46, 2 }
 0x837   :  { %v3691_v51 = vadd.f32 %v3690_v49, %v3689_v46  ;;  %v10107_v46 = vld [vmem:[#allocation7 + $0xe0] ss:$16 sps:$4 sm:$0xff]   ;;  %v697_v49 = vrot.slane %v11750_v47, %v696_v22 }
 0x839   :  { %v3692_v55 = vrot.slane %v3691_v51, 1  ;;  %v9365_v53 = vadd.f32 %v11663_v56, %v697_v49 }
 0x83b   :  { %v3693_v60 = vadd.f32 %v3692_v55, %v3691_v51  ;;  %v3985_v51 = vpack.c.b16 %v11738_v26, %v11738_v26  ;;  %v9367_v55 = vadd.f32 %v11668_v58, %v697_v49  ;;  %v9193_v26 = vpack.c.bf16 %v9365_v53, %v9365_v53  ;;  %v10118_v53 = vld [vmem:[#allocation7 + $0x20c] ss:$16 sps:$4 sm:$0xff]  }
 0x83d   :  { %v3695_v38 = vmul.f32 0.125, %v3693_v60  ;;  %v681_v60 = vrot.slane %v11750_v47, %v11683_v6  ;;  %v9194_v62 = vpack.c.bf16 %v9367_v55, %v9367_v55 }
 0x83f   :  { %v3697_v0 = vpack.c.bf16 %v3695_v38, %v3695_v38  ;;  %v9357_v38 = vadd.f32 %v11631_v52, %v681_v60  ;;  %v9359_v56 = vadd.f32 %v11635_v57, %v681_v60 }
 0x841   :  { %v3733_v4 = vunpack.c.l.b16 %v3697_v0  ;;  %v9191_v58 = vpack.c.bf16 %v9357_v38, %v9357_v38  ;;  %v9192_v0 = vpack.c.bf16 %v9359_v56, %v9359_v56 }
 0x843   :  { %v3735_v48 = vsel %vm3734_vm3, %v3733_v4, %v3732_v42 }
 0x844   :  { %v3736_v2 = vpack.c.b16 %v3735_v48, %v3735_v48 }
 0x846   :  { %3931 = vmatmul.mubr.bf16.vlgmr.msra.gmra.mrb[20].mxu0 %v3736_v2  ;;  %3972 = vmatmul.mubr.bf16.vlgmr.msra.gmra.mrb[36].mxu1 %v3736_v2 }
 0x847   :  { %4148 = vmatpush1.bf16.msra.mxu0 %v10065_v44  ;;  %4189 = vmatpush1.bf16.msra.mxu1 %v10068_v1 }
 0x848   :  { %4149 = vmatprep.subr.bf16.mxu0 %v10073_v25  ;;  %4190 = vmatprep.subr.bf16.mxu1 %v10076_v45 }
 0x849   :  { %4179 = vmatprep.mubr.bf16.mxu0 %v11232_v24  ;;  %4220 = vmatprep.mubr.bf16.mxu1 %v11232_v24 }
 0x84b   :  { %4150 = vmatpush1.bf16.msra.mxu0 %v10071_v5  ;;  %4191 = vmatpush1.bf16.msra.mxu1 %v10074_v7 }
 0x84c   :  { %4151 = vmatprep.subr.bf16.mxu0 %v10079_v8  ;;  %4192 = vmatprep.subr.bf16.mxu1 %v10082_v10 }
 0x84f   :  { %4152 = vmatpush1.bf16.msra.mxu0 %v10077_v11  ;;  %4193 = vmatpush1.bf16.msra.mxu1 %v10080_v12 }
 0x850   :  { %4153 = vmatprep.subr.bf16.mxu0 %v10085_v13  ;;  %4194 = vmatprep.subr.bf16.mxu1 %v10088_v14 }
 0x853   :  { %4154 = vmatpush1.bf16.msra.mxu0 %v10083_v15  ;;  %4195 = vmatpush1.bf16.msra.mxu1 %v10086_v16 }
 0x854   :  { %4155 = vmatprep.subr.bf16.mxu0 %v10091_v17  ;;  %4196 = vmatprep.subr.bf16.mxu1 %v10094_v18 }
 0x857   :  { %4156 = vmatpush1.bf16.msra.mxu0 %v10089_v19  ;;  %4197 = vmatpush1.bf16.msra.mxu1 %v10092_v20 }
 0x858   :  { %4157 = vmatprep.subr.bf16.mxu0 %v10097_v3  ;;  %4198 = vmatprep.subr.bf16.mxu1 %v10100_v23 }
 0x85b   :  { %4158 = vmatpush1.bf16.msra.mxu0 %v10095_v39  ;;  %4199 = vmatpush1.bf16.msra.mxu1 %v10098_v28 }
 0x85c   :  { %4159 = vmatprep.subr.bf16.mxu0 %v10103_v63  ;;  %4200 = vmatprep.subr.bf16.mxu1 %v10106_v29 }
 0x85f   :  { %4160 = vmatpush1.bf16.msra.mxu0 %v10101_v21  ;;  %4201 = vmatpush1.bf16.msra.mxu1 %v10104_v32 }
 0x860   :  { %4161 = vmatprep.subr.bf16.mxu0 %v10109_v35  ;;  %4202 = vmatprep.subr.bf16.mxu1 %v10112_v40 }
 0x863   :  { %4162 = vmatpush1.bf16.msra.mxu0 %v10107_v46  ;;  %4203 = vmatpush1.bf16.msra.mxu1 %v10110_v50 }
 0x864   :  { %9305 = vmatprep.subr.bf16.mxu0 %v11230_v27  ;;  %9311 = vmatprep.subr.bf16.mxu1 %v11230_v27 }
 0x866   :  { %4180 = vmatmul.mubr.bf16.vlgmr.msra.gmra.mrb[24].mxu0 %v3985_v51  ;;  %4221 = vmatmul.mubr.bf16.vlgmr.msra.gmra.mrb[40].mxu1 %v3985_v51  ;;  %v10115_v51 = vld [vmem:[#allocation7 + $0x204] ss:$16 sps:$4 sm:$0xff]  }
 0x867   :  { %9307 = vmatprep.mubr.msk.bf16.mxu0 %vm11231_vm0, %v11230_v27  ;;  %9313 = vmatprep.mubr.msk.bf16.mxu1 %vm11231_vm0, %v11230_v27 }
 0x86c   :  { %9306 = vmatpush3.bf16.xpose.msra.mxu0 %v9193_v26  ;;  %9312 = vmatpush3.bf16.xpose.msra.mxu1 %v9194_v62 }
 0x86d   :  { %9317 = vmatprep.subr.bf16.mxu0 %v11230_v27  ;;  %9323 = vmatprep.subr.bf16.mxu1 %v11230_v27 }
 0x873   :  { %9308 = vmatmul.mubr.bf16.vlgmr.msra.gmra.mrb[28].mxu0 %v9191_v58  ;;  %9314 = vmatmul.mubr.bf16.vlgmr.msra.gmra.mrb[44].mxu1 %v9192_v0  ;;  %v10113_v58 = vld [vmem:[#allocation7 + $0x200] ss:$16 sps:$4 sm:$0xff]  }
 0x874   :  { %9318 = vmatpush3.bf16.msra.mxu0 %v11700_v33  ;;  %9324 = vmatpush3.bf16.msra.mxu1 %v11706_v41 }
 0x875   :  { %9319 = vmatprep.mubr.msk.bf16.mxu0 %vm11231_vm0, %v11230_v27  ;;  %9325 = vmatprep.mubr.msk.bf16.mxu1 %vm11231_vm0, %v11230_v27 }
 0x876   :  { %4661 = vmatprep.subr.bf16.mxu0 %v10115_v51  ;;  %4702 = vmatprep.subr.bf16.mxu1 %v10118_v53 }
 0x919   :  { %v3932_v52 = vpop.f32.mrb[20].mxu0  ;;  %v3973_v57 = vpop.f32.mrb[36].mxu1 }
 0x91a   :  { %v3934_v42 = vpop.f32.mrb[21].mxu0  ;;  %v3975_v4 = vpop.f32.mrb[37].mxu1 }
 0x91b   :  { %v3936_v44 = vpop.f32.mrb[22].mxu0  ;;  %v3977_v1 = vpop.f32.mrb[38].mxu1 }
 0x91c   :  { %v3937_v48 = vpop.f32.mrb[23].mxu0  ;;  %v3978_v2 = vpop.f32.mrb[39].mxu1  ;;  %v10119_v44 = vld [vmem:[#allocation7 + $0x220] ss:$16 sps:$4 sm:$0xff]   ;;  %v10122_v1 = vld [vmem:[#allocation7 + $0x228] ss:$16 sps:$4 sm:$0xff]  }
 0x91d   :  { %v10127_v48 = vld [vmem:[#allocation7 + $0x244] ss:$16 sps:$4 sm:$0xff]   ;;  %v10130_v2 = vld [vmem:[#allocation7 + $0x24c] ss:$16 sps:$4 sm:$0xff]  }
 0x939   :  { %v4181_v25 = vpop.f32.mrb[24].mxu0  ;;  %v4222_v45 = vpop.f32.mrb[40].mxu1 }
 0x93a   :  { %v11775_v5 = vadd.f32 %v4181_v25, %v3932_v52  ;;  %v11777_v33 = vadd.f32 %v4222_v45, %v3973_v57  ;;  %v4183_v41 = vpop.f32.mrb[25].mxu0  ;;  %v4224_v7 = vpop.f32.mrb[41].mxu1  ;;  %v10116_v52 = vld [vmem:[#allocation7 + $0x208] ss:$16 sps:$4 sm:$0xff]   ;;  %v10121_v57 = vld [vmem:[#allocation7 + $0x224] ss:$16 sps:$4 sm:$0xff]  }
 0x93b   :  { %v11779_v8 = vadd.f32 %v4183_v41, %v3934_v42  ;;  %v11781_v10 = vadd.f32 %v4224_v7, %v3975_v4  ;;  %v4185_v11 = vpop.f32.mrb[26].mxu0  ;;  %v4226_v12 = vpop.f32.mrb[42].mxu1  ;;  %v10124_v4 = vld [vmem:[#allocation7 + $0x22c] ss:$16 sps:$4 sm:$0xff]   ;;  %v10125_v25 = vld [vmem:[#allocation7 + $0x240] ss:$16 sps:$4 sm:$0xff]  }
 0x93c   :  { %v4186_v13 = vpop.f32.mrb[27].mxu0  ;;  %v4227_v14 = vpop.f32.mrb[43].mxu1  ;;  %v10128_v45 = vld [vmem:[#allocation7 + $0x248] ss:$16 sps:$4 sm:$0xff]   ;;  %v10133_v41 = vld [vmem:[#allocation7 + $0x264] ss:$16 sps:$4 sm:$0xff]  }
 0x93d   :  { %v10136_v7 = vld [vmem:[#allocation7 + $0x26c] ss:$16 sps:$4 sm:$0xff]   ;;  %v10131_v11 = vld [vmem:[#allocation7 + $0x260] ss:$16 sps:$4 sm:$0xff]   ;;  %v10134_v12 = vld [vmem:[#allocation7 + $0x268] ss:$16 sps:$4 sm:$0xff]  }
 0x93e   :  { %v10139_v13 = vld [vmem:[#allocation7 + $0x284] ss:$16 sps:$4 sm:$0xff]   ;;  %v10142_v14 = vld [vmem:[#allocation7 + $0x28c] ss:$16 sps:$4 sm:$0xff]  }
 0x946   :  { %v4282_v15 = vpop.f32.mrb[28].mxu0  ;;  %v4322_v16 = vpop.f32.mrb[44].mxu1 }
 0x947   :  { %v9309_v17 = vpop.f32.mrb[29].mxu0  ;;  %v9315_v18 = vpop.f32.mrb[45].mxu1  ;;  %v4328_v19 = vsel %vm3297_vm2, %v4282_v15, -inf  ;;  %v4331_v20 = vsel %vm3297_vm2, %v4322_v16, -inf }
 0x948   :  { %4329 = vmax.xlane.f32.xlu0 %v4328_v19  ;;  %v4285_v3 = vpop.f32.mrb[30].mxu0  ;;  %4332 = vmax.xlane.f32.xlu1 %v4331_v20  ;;  %v4325_v23 = vpop.f32.mrb[46].mxu1  ;;  %v10145_v17 = vld [vmem:[#allocation7 + $0x2a4] ss:$16 sps:$4 sm:$0xff]   ;;  %v10148_v18 = vld [vmem:[#allocation7 + $0x2ac] ss:$16 sps:$4 sm:$0xff]  }
 0x949   :  { %v9310_v39 = vpop.f32.mrb[31].mxu0  ;;  %v9316_v28 = vpop.f32.mrb[47].mxu1  ;;  %v10143_v19 = vld [vmem:[#allocation7 + $0x2a0] ss:$16 sps:$4 sm:$0xff]   ;;  %v10146_v20 = vld [vmem:[#allocation7 + $0x2a8] ss:$16 sps:$4 sm:$0xff]  }
 0x94a   :  { %v10151_v3 = vld [vmem:[#allocation7 + $0x2c4] ss:$16 sps:$4 sm:$0xff]   ;;  %v10154_v23 = vld [vmem:[#allocation7 + $0x2cc] ss:$16 sps:$4 sm:$0xff]   ;;  %v10149_v39 = vld [vmem:[#allocation7 + $0x2c0] ss:$16 sps:$4 sm:$0xff]  }
 0x94b   :  { %v10152_v28 = vld [vmem:[#allocation7 + $0x2c8] ss:$16 sps:$4 sm:$0xff]  }
 0x9d5   :  { %v4330_v63 = vpop.xlane.xlu0 %4329  ;;  %v4333_v29 = vpop.xlane.xlu1 %4332 }
 0x9d6   :  { %v4334_v21 = vsub.f32 %v4282_v15, %v4330_v63  ;;  %v4335_v32 = vsub.f32 %v4322_v16, %v4333_v29  ;;  %v10137_v15 = vld [vmem:[#allocation7 + $0x280] ss:$16 sps:$4 sm:$0xff]   ;;  %v10140_v16 = vld [vmem:[#allocation7 + $0x288] ss:$16 sps:$4 sm:$0xff]   ;;  %v10157_v63 = vld [vmem:[#allocation7 + $0x2e4] ss:$16 sps:$4 sm:$0xff]  }
 0x9d7   :  { %v10160_v29 = vld [vmem:[#allocation7 + $0x2ec] ss:$16 sps:$4 sm:$0xff]  }
 0x9d8   :  { %v4336_v35 = vmul.f32 1.442695, %v4334_v21  ;;  %v4338_v40 = vmul.f32 1.442695, %v4335_v32  ;;  %v10155_v21 = vld [vmem:[#allocation7 + $0x2e0] ss:$16 sps:$4 sm:$0xff]  }
 0x9d9   :  { %v10158_v32 = vld [vmem:[#allocation7 + $0x2e8] ss:$16 sps:$4 sm:$0xff]  }
 0x9da   :  { %10769 = vpow2.f32 %v4336_v35 }
 0x9db   :  { %10771 = vpow2.f32 %v4338_v40 }
 0x9e4   :  { %v10770_v22 = vpop.eup %10769 }
 0x9e5   :  { %v10772_v46 = vpop.eup %10771  ;;  %v4340_v50 = vsel %vm3297_vm2, %v10770_v22, 0.0 }
 0x9e6   :  { %4341 = vadd.xlane.f32.xlu0 %v4340_v50  ;;  %v4343_v49 = vsel %vm3297_vm2, %v10772_v46, 0.0 }
 0x9e7   :  { %4344 = vadd.xlane.f32.xlu1 %v4343_v49 }
 0xa73   :  { %v4342_v55 = vpop.xlane.xlu0 %4341 }
 0xa74   :  { %10773 = vrcp.f32 %v4342_v55  ;;  %v4345_v60 = vpop.xlane.xlu1 %4344 }
 0xa75   :  { %10775 = vrcp.f32 %v4345_v60 }
 0xa7e   :  { %v10774_v26 = vpop.eup %10773 }
 0xa7f   :  { %v10776_v62 = vpop.eup %10775  ;;  %v4350_v38 = vmul.f32 %v10774_v26, %v10770_v22 }
 0xa80   :  { %v4351_v56 = vmul.f32 %v10776_v62, %v10772_v46 }
 0xa81   :  { %v4352_v0 = vpack.c.bf16 %v4350_v38, %v4350_v38 }
 0xa82   :  { %v4353_v42 = vpack.c.bf16 %v4351_v56, %v4351_v56 }
 0xa83   :  { %9320 = vmatmul.mubr.msk.bf16.vlgmr.msra.gmra.mrb[32].mxu0 %vm3297_vm2, %v4352_v0 }
 0xa84   :  { %9326 = vmatmul.mubr.msk.bf16.vlgmr.msra.gmra.mrb[48].mxu1 %vm3297_vm2, %v4353_v42  ;;  %4662 = vmatpush1.bf16.msra.mxu0 %v10113_v58 }
 0xa85   :  { %4703 = vmatpush1.bf16.msra.mxu1 %v10116_v52  ;;  %4663 = vmatprep.subr.bf16.mxu0 %v10121_v57  ;;  %v700_v57 = vsub.s32 7, %v11611_v30 }
 0xa86   :  { %4704 = vmatprep.subr.bf16.mxu1 %v10124_v4  ;;  %4693 = vmatprep.mubr.bf16.mxu0 %v11232_v24 }
 0xa87   :  { %4734 = vmatprep.mubr.bf16.mxu1 %v11232_v24 }
 0xa88   :  { %4664 = vmatpush1.bf16.msra.mxu0 %v10119_v44 }
 0xa89   :  { %4705 = vmatpush1.bf16.msra.mxu1 %v10122_v1  ;;  %4665 = vmatprep.subr.bf16.mxu0 %v10127_v48  ;;  %v701_v48 = vrot.slane %v11750_v47, %v700_v57 }
 0xa8a   :  { %4706 = vmatprep.subr.bf16.mxu1 %v10130_v2 }
 0xa8c   :  { %4666 = vmatpush1.bf16.msra.mxu0 %v10125_v25 }
 0xa8d   :  { %4707 = vmatpush1.bf16.msra.mxu1 %v10128_v45  ;;  %4667 = vmatprep.subr.bf16.mxu0 %v10133_v41 }
 0xa8e   :  { %4708 = vmatprep.subr.bf16.mxu1 %v10136_v7  ;;  %v9366_v7 = vadd.f32 %v11666_v34, %v701_v48 }
 0xa90   :  { %4668 = vmatpush1.bf16.msra.mxu0 %v10131_v11  ;;  %v9368_v11 = vadd.f32 %v11670_v61, %v701_v48 }
 0xa91   :  { %4709 = vmatpush1.bf16.msra.mxu1 %v10134_v12  ;;  %4669 = vmatprep.subr.bf16.mxu0 %v10139_v13 }
 0xa92   :  { %4710 = vmatprep.subr.bf16.mxu1 %v10142_v14  ;;  %v685_v14 = vrot.slane %v11750_v47, %v11686_v9 }
 0xa94   :  { %4670 = vmatpush1.bf16.msra.mxu0 %v10137_v15 }
 0xa95   :  { %4711 = vmatpush1.bf16.msra.mxu1 %v10140_v16  ;;  %4671 = vmatprep.subr.bf16.mxu0 %v10145_v17  ;;  %v9199_v16 = vpack.c.bf16 %v9366_v7, %v9366_v7  ;;  %v9200_v17 = vpack.c.bf16 %v9368_v11, %v9368_v11  ;;  %v10167_v7 = vld [vmem:[#allocation7 + $0x320] ss:$16 sps:$4 sm:$0xff]   ;;  %v10170_v11 = vld [vmem:[#allocation7 + $0x328] ss:$16 sps:$4 sm:$0xff]  }
 0xa96   :  { %4712 = vmatprep.subr.bf16.mxu1 %v10148_v18  ;;  %v9358_v18 = vadd.f32 %v11633_v54, %v685_v14 }
 0xa98   :  { %4672 = vmatpush1.bf16.msra.mxu0 %v10143_v19  ;;  %v9360_v19 = vadd.f32 %v11637_v59, %v685_v14  ;;  %v9197_v34 = vpack.c.bf16 %v9358_v18, %v9358_v18  ;;  %v10173_v14 = vld [vmem:[#allocation7 + $0x340] ss:$16 sps:$4 sm:$0xff]  }
 0xa99   :  { %4713 = vmatpush1.bf16.msra.mxu1 %v10146_v20  ;;  %4673 = vmatprep.subr.bf16.mxu0 %v10151_v3  ;;  %v10179_v18 = vld [vmem:[#allocation7 + $0x360] ss:$16 sps:$4 sm:$0xff]  }
 0xa9a   :  { %4714 = vmatprep.subr.bf16.mxu1 %v10154_v23  ;;  %v9198_v61 = vpack.c.bf16 %v9360_v19, %v9360_v19  ;;  %v10182_v19 = vld [vmem:[#allocation7 + $0x368] ss:$16 sps:$4 sm:$0xff]  }
 0xa9c   :  { %4674 = vmatpush1.bf16.msra.mxu0 %v10149_v39 }
 0xa9d   :  { %4715 = vmatpush1.bf16.msra.mxu1 %v10152_v28  ;;  %4675 = vmatprep.subr.bf16.mxu0 %v10157_v63 }
 0xa9e   :  { %4716 = vmatprep.subr.bf16.mxu1 %v10160_v29 }
 0xaa0   :  { %4676 = vmatpush1.bf16.msra.mxu0 %v10155_v21 }
 0xaa1   :  { %4717 = vmatpush1.bf16.msra.mxu1 %v10158_v32  ;;  %9329 = vmatprep.subr.bf16.mxu0 %v11230_v27 }
 0xaa2   :  { %9335 = vmatprep.subr.bf16.mxu1 %v11230_v27 }
 0xb56   :  { %v4394_v35 = vpop.f32.mrb[32].mxu0 }
 0xb57   :  { %v4446_v40 = vrot.slane %v4394_v35, 4  ;;  %v4440_v22 = vpop.f32.mrb[48].mxu1  ;;  %v9321_v46 = vpop.f32.mrb[33].mxu0 }
 0xb58   :  { %v4452_v50 = vrot.slane %v4440_v22, 4  ;;  %v9327_v49 = vpop.f32.mrb[49].mxu1  ;;  %v4397_v51 = vpop.f32.mrb[34].mxu0 }
 0xb59   :  { %v4447_v53 = vadd.f32 %v4446_v40, %v4394_v35  ;;  %v4443_v55 = vpop.f32.mrb[50].mxu1  ;;  %v9322_v60 = vpop.f32.mrb[35].mxu0 }
 0xb5a   :  { %v4453_v26 = vadd.f32 %v4452_v50, %v4440_v22  ;;  %v9328_v62 = vpop.f32.mrb[51].mxu1 }
 0xb5b   :  { %v4448_v38 = vrot.slane %v4447_v53, 2 }
 0xb5c   :  { %v4454_v56 = vrot.slane %v4453_v26, 2 }
 0xb5d   :  { %v4449_v58 = vadd.f32 %v4448_v38, %v4447_v53 }
 0xb5e   :  { %v4455_v0 = vadd.f32 %v4454_v56, %v4453_v26  ;;  %v10163_v56 = vld [vmem:[#allocation7 + $0x304] ss:$16 sps:$4 sm:$0xff]  }
 0xb5f   :  { %v4450_v52 = vrot.slane %v4449_v58, 1 }
 0xb60   :  { %v4456_v42 = vrot.slane %v4455_v0, 1 }
 0xb61   :  { %v4451_v4 = vadd.f32 %v4450_v52, %v4449_v58  ;;  %v10166_v58 = vld [vmem:[#allocation7 + $0x30c] ss:$16 sps:$4 sm:$0xff]  }
 0xb62   :  { %v4457_v44 = vadd.f32 %v4456_v42, %v4455_v0 }
 0xb63   :  { %v4458_v1 = vmul.f32 0.125, %v4451_v4 }
 0xb64   :  { %v4459_v2 = vmul.f32 0.125, %v4457_v44 }
 0xb65   :  { %v4460_v25 = vpack.c.bf16 %v4458_v1, %v4458_v1  ;;  %v10161_v1 = vld [vmem:[#allocation7 + $0x300] ss:$16 sps:$4 sm:$0xff]  }
 0xb66   :  { %v4461_v45 = vpack.c.bf16 %v4459_v2, %v4459_v2  ;;  %v10164_v2 = vld [vmem:[#allocation7 + $0x308] ss:$16 sps:$4 sm:$0xff]  }
 0xb67   :  { %v4496_v41 = vunpack.c.l.b16 %v4460_v25  ;;  %v10169_v25 = vld [vmem:[#allocation7 + $0x324] ss:$16 sps:$4 sm:$0xff]  }
 0xb68   :  { %v4497_v12 = vunpack.c.l.b16 %v4461_v45 }
 0xb6a   :  { %v4498_v13 = vsel %vm3734_vm3, %v4497_v12, %v4496_v41  ;;  %v10172_v41 = vld [vmem:[#allocation7 + $0x32c] ss:$16 sps:$4 sm:$0xff]   ;;  %v10175_v12 = vld [vmem:[#allocation7 + $0x344] ss:$16 sps:$4 sm:$0xff]  }
 0xb6b   :  { %v4499_v15 = vpack.c.b16 %v4498_v13, %v4498_v13  ;;  %v10178_v13 = vld [vmem:[#allocation7 + $0x34c] ss:$16 sps:$4 sm:$0xff]  }
 0xb6d   :  { %4694 = vmatmul.mubr.bf16.vlgmr.msra.gmra.mrb[36].mxu0 %v4499_v15  ;;  %4735 = vmatmul.mubr.bf16.vlgmr.msra.gmra.mrb[52].mxu1 %v4499_v15  ;;  %v10176_v15 = vld [vmem:[#allocation7 + $0x348] ss:$16 sps:$4 sm:$0xff]  }
 0xb6e   :  { %9330 = vmatpush3.bf16.xpose.msra.mxu0 %v9199_v16  ;;  %9336 = vmatpush3.bf16.xpose.msra.mxu1 %v9200_v17  ;;  %v10181_v16 = vld [vmem:[#allocation7 + $0x364] ss:$16 sps:$4 sm:$0xff]   ;;  %v10184_v17 = vld [vmem:[#allocation7 + $0x36c] ss:$16 sps:$4 sm:$0xff]  }
 0xb6f   :  { %9331 = vmatprep.mubr.msk.bf16.mxu0 %vm11231_vm0, %v11230_v27  ;;  %9337 = vmatprep.mubr.msk.bf16.mxu1 %vm11231_vm0, %v11230_v27 }
 0xb70   :  { %9341 = vmatprep.subr.bf16.mxu0 %v11230_v27  ;;  %9347 = vmatprep.subr.bf16.mxu1 %v11230_v27 }
 0xb75   :  { %9332 = vmatmul.mubr.bf16.vlgmr.msra.gmra.mrb[40].mxu0 %v9197_v34  ;;  %9338 = vmatmul.mubr.bf16.vlgmr.msra.gmra.mrb[56].mxu1 %v9198_v61  ;;  %v10187_v34 = vld [vmem:[#allocation7 + $0x384] ss:$16 sps:$4 sm:$0xff]   ;;  %v10190_v61 = vld [vmem:[#allocation7 + $0x38c] ss:$16 sps:$4 sm:$0xff]  }
 0xb76   :  { %9342 = vmatpush3.bf16.msra.mxu0 %v11703_v37  ;;  %9348 = vmatpush3.bf16.msra.mxu1 %v11709_v43 }
 0xb77   :  { %9343 = vmatprep.mubr.msk.bf16.mxu0 %vm11231_vm0, %v11230_v27  ;;  %9349 = vmatprep.mubr.msk.bf16.mxu1 %vm11231_vm0, %v11230_v27 }
 0xb78   :  { %5179 = vmatprep.subr.bf16.mxu0 %v10163_v56  ;;  %5220 = vmatprep.subr.bf16.mxu1 %v10166_v58 }
 0xc40   :  { %v4695_v54 = vpop.f32.mrb[36].mxu0  ;;  %v4736_v59 = vpop.f32.mrb[52].mxu1 }
 0xc41   :  { %v11815_v47 = vadd.f32 %v4695_v54, %v11775_v5  ;;  %v11818_v20 = vadd.f32 %v4736_v59, %v11777_v33  ;;  %v4697_v3 = vpop.f32.mrb[37].mxu0  ;;  %v4738_v23 = vpop.f32.mrb[53].mxu1  ;;  %v10185_v54 = vld [vmem:[#allocation7 + $0x380] ss:$16 sps:$4 sm:$0xff]   ;;  %v10193_v59 = vld [vmem:[#allocation7 + $0x3a4] ss:$16 sps:$4 sm:$0xff]  }
 0xc42   :  { %v11821_v37 = vadd.f32 %v4697_v3, %v11779_v8  ;;  %v11824_v43 = vadd.f32 %v4738_v23, %v11781_v10  ;;  %v4699_v39 = vpop.f32.mrb[38].mxu0  ;;  %v4740_v28 = vpop.f32.mrb[54].mxu1  ;;  %v10196_v3 = vld [vmem:[#allocation7 + $0x3ac] ss:$16 sps:$4 sm:$0xff]   ;;  %v10191_v23 = vld [vmem:[#allocation7 + $0x3a0] ss:$16 sps:$4 sm:$0xff]  }
 0xc43   :  { %v4700_v63 = vpop.f32.mrb[39].mxu0  ;;  %v4741_v27 = vpop.f32.mrb[55].mxu1  ;;  %v10194_v39 = vld [vmem:[#allocation7 + $0x3a8] ss:$16 sps:$4 sm:$0xff]   ;;  %v10199_v28 = vld [vmem:[#allocation7 + $0x3c4] ss:$16 sps:$4 sm:$0xff]  }
 0xc44   :  { %v10202_v63 = vld [vmem:[#allocation7 + $0x3cc] ss:$16 sps:$4 sm:$0xff]   ;;  %v10197_v27 = vld [vmem:[#allocation7 + $0x3c0] ss:$16 sps:$4 sm:$0xff]  }
 0xc48   :  { %v4800_v29 = vpop.f32.mrb[40].mxu0  ;;  %v4840_v21 = vpop.f32.mrb[56].mxu1 }
 0xc49   :  { %v9333_v32 = vpop.f32.mrb[41].mxu0  ;;  %v9339_v5 = vpop.f32.mrb[57].mxu1  ;;  %v4846_v35 = vsel %vm3297_vm2, %v4800_v29, -inf  ;;  %v4849_v33 = vsel %vm3297_vm2, %v4840_v21, -inf }
 0xc4a   :  { %4847 = vmax.xlane.f32.xlu0 %v4846_v35  ;;  %v4803_v40 = vpop.f32.mrb[42].mxu0  ;;  %4850 = vmax.xlane.f32.xlu1 %v4849_v33  ;;  %v4843_v8 = vpop.f32.mrb[58].mxu1  ;;  %v10208_v32 = vld [vmem:[#allocation7 + $0x3ec] ss:$16 sps:$4 sm:$0xff]   ;;  %v10203_v5 = vld [vmem:[#allocation7 + $0x3e0] ss:$16 sps:$4 sm:$0xff]  }
 0xc4b   :  { %v9334_v22 = vpop.f32.mrb[43].mxu0  ;;  %v9340_v46 = vpop.f32.mrb[59].mxu1  ;;  %v10206_v35 = vld [vmem:[#allocation7 + $0x3e8] ss:$16 sps:$4 sm:$0xff]  }
 0xc4c   :  { %v10211_v33 = vld [vmem:[#allocation11 + $0x4] ss:$16 sps:$4 sm:$0xff]  }
 0xc4d   :  { %v10214_v40 = vld [vmem:[#allocation11 + $0x204] ss:$16 sps:$4 sm:$0xff]  }
 0xcd7   :  { %v4848_v10 = vpop.xlane.xlu0 %4847  ;;  %v4851_v50 = vpop.xlane.xlu1 %4850 }
 0xcd8   :  { %v4852_v49 = vsub.f32 %v4800_v29, %v4848_v10  ;;  %v4853_v51 = vsub.f32 %v4840_v21, %v4851_v50  ;;  %v10200_v29 = vld [vmem:[#allocation7 + $0x3c8] ss:$16 sps:$4 sm:$0xff]   ;;  %v10205_v21 = vld [vmem:[#allocation7 + $0x3e4] ss:$16 sps:$4 sm:$0xff]  }
 0xcda   :  { %v4854_v53 = vmul.f32 1.442695, %v4852_v49  ;;  %v4856_v55 = vmul.f32 1.442695, %v4853_v51 }
 0xcdc   :  { %10777 = vpow2.f32 %v4854_v53 }
 0xcdd   :  { %10779 = vpow2.f32 %v4856_v55 }
 0xce6   :  { %v10778_v60 = vpop.eup %10777 }
 0xce7   :  { %v10780_v26 = vpop.eup %10779  ;;  %v4858_v62 = vsel %vm3297_vm2, %v10778_v60, 0.0 }
 0xce8   :  { %4859 = vadd.xlane.f32.xlu0 %v4858_v62  ;;  %v4861_v38 = vsel %vm3297_vm2, %v10780_v26, 0.0 }
 0xce9   :  { %4862 = vadd.xlane.f32.xlu1 %v4861_v38 }
 0xd75   :  { %v4860_v0 = vpop.xlane.xlu0 %4859 }
 0xd76   :  { %10781 = vrcp.f32 %v4860_v0  ;;  %v4863_v52 = vpop.xlane.xlu1 %4862 }
 0xd77   :  { %10783 = vrcp.f32 %v4863_v52 }
 0xd80   :  { %v10782_v57 = vpop.eup %10781 }
 0xd81   :  { %v10784_v42 = vpop.eup %10783  ;;  %v4868_v4 = vmul.f32 %v10782_v57, %v10778_v60 }
 0xd82   :  { %v4869_v44 = vmul.f32 %v10784_v42, %v10780_v26 }
 0xd83   :  { %v4870_v48 = vpack.c.bf16 %v4868_v4, %v4868_v4 }
 0xd84   :  { %v4871_v45 = vpack.c.bf16 %v4869_v44, %v4869_v44 }
 0xd85   :  { %9344 = vmatmul.mubr.msk.bf16.vlgmr.msra.gmra.mrb[44].mxu0 %vm3297_vm2, %v4870_v48 }
 0xd86   :  { %9350 = vmatmul.mubr.msk.bf16.vlgmr.msra.gmra.mrb[60].mxu1 %vm3297_vm2, %v4871_v45  ;;  %5180 = vmatpush1.bf16.msra.mxu0 %v10161_v1 }
 0xd87   :  { %5221 = vmatpush1.bf16.msra.mxu1 %v10164_v2  ;;  %5181 = vmatprep.subr.bf16.mxu0 %v10169_v25 }
 0xd88   :  { %5222 = vmatprep.subr.bf16.mxu1 %v10172_v41  ;;  %5211 = vmatprep.mubr.bf16.mxu0 %v11232_v24 }
 0xd89   :  { %5252 = vmatprep.mubr.bf16.mxu1 %v11232_v24  ;;  %v10188_v24 = vld [vmem:[#allocation7 + $0x388] ss:$16 sps:$4 sm:$0xff]  }
 0xd8a   :  { %5182 = vmatpush1.bf16.msra.mxu0 %v10167_v7  ;;  %v10209_v7 = vld [vmem:[#allocation11] ss:$16 sps:$4 sm:$0xff]  }
 0xd8b   :  { %5223 = vmatpush1.bf16.msra.mxu1 %v10170_v11  ;;  %5183 = vmatprep.subr.bf16.mxu0 %v10175_v12  ;;  %v10212_v11 = vld [vmem:[#allocation11 + $0x200] ss:$16 sps:$4 sm:$0xff]  }
 0xd8c   :  { %5224 = vmatprep.subr.bf16.mxu1 %v10178_v13  ;;  %v10217_v13 = vld [vmem:[#allocation11 + $0x24] ss:$16 sps:$4 sm:$0xff]  }
 0xd8e   :  { %5184 = vmatpush1.bf16.msra.mxu0 %v10173_v14  ;;  %v10220_v14 = vld [vmem:[#allocation11 + $0x224] ss:$16 sps:$4 sm:$0xff]  }
 0xd8f   :  { %5225 = vmatpush1.bf16.msra.mxu1 %v10176_v15  ;;  %5185 = vmatprep.subr.bf16.mxu0 %v10181_v16  ;;  %v10215_v15 = vld [vmem:[#allocation11 + $0x20] ss:$16 sps:$4 sm:$0xff]  }
 0xd90   :  { %5226 = vmatprep.subr.bf16.mxu1 %v10184_v17  ;;  %v10218_v16 = vld [vmem:[#allocation11 + $0x220] ss:$16 sps:$4 sm:$0xff]   ;;  %v10223_v17 = vld [vmem:[#allocation11 + $0x44] ss:$16 sps:$4 sm:$0xff]  }
 0xd92   :  { %5186 = vmatpush1.bf16.msra.mxu0 %v10179_v18  ;;  %v10226_v18 = vld [vmem:[#allocation11 + $0x244] ss:$16 sps:$4 sm:$0xff]  }
 0xd93   :  { %5227 = vmatpush1.bf16.msra.mxu1 %v10182_v19  ;;  %5187 = vmatprep.subr.bf16.mxu0 %v10187_v34  ;;  %v10221_v19 = vld [vmem:[#allocation11 + $0x40] ss:$16 sps:$4 sm:$0xff]  }
 0xd94   :  { %5228 = vmatprep.subr.bf16.mxu1 %v10190_v61  ;;  %v10224_v34 = vld [vmem:[#allocation11 + $0x240] ss:$16 sps:$4 sm:$0xff]   ;;  %v10229_v61 = vld [vmem:[#allocation11 + $0x64] ss:$16 sps:$4 sm:$0xff]  }
 0xd96   :  { %5188 = vmatpush1.bf16.msra.mxu0 %v10185_v54  ;;  %v10232_v54 = vld [vmem:[#allocation11 + $0x264] ss:$16 sps:$4 sm:$0xff]  }
 0xd97   :  { %5229 = vmatpush1.bf16.msra.mxu1 %v10188_v24  ;;  %5189 = vmatprep.subr.bf16.mxu0 %v10193_v59  ;;  %v10227_v24 = vld [vmem:[#allocation11 + $0x60] ss:$16 sps:$4 sm:$0xff]  }
 0xd98   :  { %5230 = vmatprep.subr.bf16.mxu1 %v10196_v3  ;;  %v10230_v59 = vld [vmem:[#allocation11 + $0x260] ss:$16 sps:$4 sm:$0xff]   ;;  %v10235_v3 = vld [vmem:[#allocation11 + $0x84] ss:$16 sps:$4 sm:$0xff]  }
 0xd9a   :  { %5190 = vmatpush1.bf16.msra.mxu0 %v10191_v23  ;;  %v10238_v23 = vld [vmem:[#allocation11 + $0x284] ss:$16 sps:$4 sm:$0xff]  }
 0xd9b   :  { %5231 = vmatpush1.bf16.msra.mxu1 %v10194_v39  ;;  %5191 = vmatprep.subr.bf16.mxu0 %v10199_v28  ;;  %v10233_v39 = vld [vmem:[#allocation11 + $0x80] ss:$16 sps:$4 sm:$0xff]  }
 0xd9c   :  { %5232 = vmatprep.subr.bf16.mxu1 %v10202_v63  ;;  %v10236_v28 = vld [vmem:[#allocation11 + $0x280] ss:$16 sps:$4 sm:$0xff]   ;;  %v10241_v63 = vld [vmem:[#allocation11 + $0xa4] ss:$16 sps:$4 sm:$0xff]  }
 0xd9e   :  { %5192 = vmatpush1.bf16.msra.mxu0 %v10197_v27  ;;  %v10244_v27 = vld [vmem:[#allocation11 + $0x2a4] ss:$16 sps:$4 sm:$0xff]  }
 0xd9f   :  { %5233 = vmatpush1.bf16.msra.mxu1 %v10200_v29  ;;  %5193 = vmatprep.subr.bf16.mxu0 %v10205_v21  ;;  %v10239_v29 = vld [vmem:[#allocation11 + $0xa0] ss:$16 sps:$4 sm:$0xff]  }
 0xda0   :  { %5234 = vmatprep.subr.bf16.mxu1 %v10208_v32  ;;  %v10242_v21 = vld [vmem:[#allocation11 + $0x2a0] ss:$16 sps:$4 sm:$0xff]   ;;  %v10247_v32 = vld [vmem:[#allocation11 + $0xc4] ss:$16 sps:$4 sm:$0xff]  }
 0xda2   :  { %5194 = vmatpush1.bf16.msra.mxu0 %v10203_v5  ;;  %v10250_v5 = vld [vmem:[#allocation11 + $0x2c4] ss:$16 sps:$4 sm:$0xff]  }
 0xda3   :  { %5235 = vmatpush1.bf16.msra.mxu1 %v10206_v35  ;;  %6192 = vmatprep.subr.bf16.mxu0 %v10211_v33  ;;  %v10245_v35 = vld [vmem:[#allocation11 + $0xc0] ss:$16 sps:$4 sm:$0xff]  }
 0xda4   :  { %6233 = vmatprep.subr.bf16.mxu1 %v10214_v40  ;;  %v10248_v33 = vld [vmem:[#allocation11 + $0x2c0] ss:$16 sps:$4 sm:$0xff]   ;;  %v10253_v40 = vld [vmem:[#allocation11 + $0xe4] ss:$16 sps:$4 sm:$0xff]  }
 0xe58   :  { %v4912_v8 = vpop.f32.mrb[44].mxu0 }
 0xe59   :  { %v4964_v22 = vrot.slane %v4912_v8, 4  ;;  %v4958_v46 = vpop.f32.mrb[60].mxu1  ;;  %v9345_v10 = vpop.f32.mrb[45].mxu0 }
 0xe5a   :  { %v4970_v50 = vrot.slane %v4958_v46, 4  ;;  %v9351_v49 = vpop.f32.mrb[61].mxu1  ;;  %v4915_v51 = vpop.f32.mrb[46].mxu0  ;;  %v10259_v10 = vld [vmem:[#allocation11 + $0x104] ss:$16 sps:$4 sm:$0xff]  }
 0xe5b   :  { %v4965_v53 = vadd.f32 %v4964_v22, %v4912_v8  ;;  %v4961_v55 = vpop.f32.mrb[62].mxu1  ;;  %v9346_v60 = vpop.f32.mrb[47].mxu0  ;;  %v10256_v8 = vld [vmem:[#allocation11 + $0x2e4] ss:$16 sps:$4 sm:$0xff]   ;;  %v10251_v22 = vld [vmem:[#allocation11 + $0xe0] ss:$16 sps:$4 sm:$0xff]  }
 0xe5c   :  { %v4971_v26 = vadd.f32 %v4970_v50, %v4958_v46  ;;  %v9352_v62 = vpop.f32.mrb[63].mxu1  ;;  %v10254_v46 = vld [vmem:[#allocation11 + $0x2e0] ss:$16 sps:$4 sm:$0xff]   ;;  %v10262_v50 = vld [vmem:[#allocation11 + $0x304] ss:$16 sps:$4 sm:$0xff]  }
 0xe5d   :  { %v4966_v38 = vrot.slane %v4965_v53, 2  ;;  %v10257_v49 = vld [vmem:[#allocation11 + $0x100] ss:$16 sps:$4 sm:$0xff]   ;;  %v10268_v55 = vld [vmem:[#allocation11 + $0x324] ss:$16 sps:$4 sm:$0xff]  }
 0xe5e   :  { %v4972_v56 = vrot.slane %v4971_v26, 2  ;;  %v10260_v51 = vld [vmem:[#allocation11 + $0x300] ss:$16 sps:$4 sm:$0xff]   ;;  %v10271_v62 = vld [vmem:[#allocation11 + $0x144] ss:$16 sps:$4 sm:$0xff]  }
 0xe5f   :  { %v4967_v58 = vadd.f32 %v4966_v38, %v4965_v53  ;;  %v10265_v53 = vld [vmem:[#allocation11 + $0x124] ss:$16 sps:$4 sm:$0xff]   ;;  %v10263_v60 = vld [vmem:[#allocation11 + $0x120] ss:$16 sps:$4 sm:$0xff]  }
 0xe60   :  { %v4973_v0 = vadd.f32 %v4972_v56, %v4971_v26  ;;  %v10266_v26 = vld [vmem:[#allocation11 + $0x320] ss:$16 sps:$4 sm:$0xff]   ;;  %v10274_v38 = vld [vmem:[#allocation11 + $0x344] ss:$16 sps:$4 sm:$0xff]  }
 0xe61   :  { %v4968_v52 = vrot.slane %v4967_v58, 1  ;;  %v10269_v56 = vld [vmem:[#allocation11 + $0x140] ss:$16 sps:$4 sm:$0xff]  }
 0xe62   :  { %v4974_v57 = vrot.slane %v4973_v0, 1 }
 0xe63   :  { %v4969_v42 = vadd.f32 %v4968_v52, %v4967_v58  ;;  %v10272_v58 = vld [vmem:[#allocation11 + $0x340] ss:$16 sps:$4 sm:$0xff]   ;;  %v10280_v52 = vld [vmem:[#allocation11 + $0x364] ss:$16 sps:$4 sm:$0xff]  }
 0xe64   :  { %v4975_v4 = vadd.f32 %v4974_v57, %v4973_v0  ;;  %v10277_v0 = vld [vmem:[#allocation11 + $0x164] ss:$16 sps:$4 sm:$0xff]   ;;  %v10275_v57 = vld [vmem:[#allocation11 + $0x160] ss:$16 sps:$4 sm:$0xff]  }
 0xe65   :  { %v4976_v44 = vmul.f32 0.125, %v4969_v42  ;;  %v10278_v42 = vld [vmem:[#allocation11 + $0x360] ss:$16 sps:$4 sm:$0xff]  }
 0xe66   :  { %v4977_v1 = vmul.f32 0.125, %v4975_v4  ;;  %v10283_v4 = vld [vmem:[#allocation11 + $0x184] ss:$16 sps:$4 sm:$0xff]  }
 0xe67   :  { %v4978_v48 = vpack.c.bf16 %v4976_v44, %v4976_v44  ;;  %v10286_v44 = vld [vmem:[#allocation11 + $0x384] ss:$16 sps:$4 sm:$0xff]  }
 0xe68   :  { %v4979_v2 = vpack.c.bf16 %v4977_v1, %v4977_v1  ;;  %v10281_v1 = vld [vmem:[#allocation11 + $0x180] ss:$16 sps:$4 sm:$0xff]  }
 0xe69   :  { %v5014_v25 = vunpack.c.l.b16 %v4978_v48  ;;  %v10284_v48 = vld [vmem:[#allocation11 + $0x380] ss:$16 sps:$4 sm:$0xff]  }
 0xe6a   :  { %v5015_v45 = vunpack.c.l.b16 %v4979_v2  ;;  %v10289_v2 = vld [vmem:[#allocation11 + $0x1a4] ss:$16 sps:$4 sm:$0xff]  }
 0xe6c   :  { %v5016_v41 = vsel %vm3734_vm3, %v5015_v45, %v5014_v25  ;;  %v10292_v25 = vld [vmem:[#allocation11 + $0x3a4] ss:$16 sps:$4 sm:$0xff]   ;;  %v10287_v45 = vld [vmem:[#allocation11 + $0x1a0] ss:$16 sps:$4 sm:$0xff]  }
 0xe6d   :  { %v5017_v12 = vpack.c.b16 %v5016_v41, %v5016_v41  ;;  %v10290_v41 = vld [vmem:[#allocation11 + $0x3a0] ss:$16 sps:$4 sm:$0xff]  }
 0xe6f   :  { %5212 = vmatmul.mubr.bf16.vlgmr.msra.gmra.mrb[48].mxu0 %v5017_v12  ;;  %5253 = vmatmul.mubr.bf16.vlgmr.msra.gmra.mrb[64].mxu1 %v5017_v12  ;;  %v10293_v12 = vld [vmem:[#allocation11 + $0x1c0] ss:$16 sps:$4 sm:$0xff]  }
 0xe70   :  { %6193 = vmatpush1.bf16.msra.mxu0 %v10209_v7  ;;  %6234 = vmatpush1.bf16.msra.mxu1 %v10212_v11  ;;  %v10295_v7 = vld [vmem:[#allocation11 + $0x1c4] ss:$16 sps:$4 sm:$0xff]  }
 0xe71   :  { %6194 = vmatprep.subr.bf16.mxu0 %v10217_v13  ;;  %6235 = vmatprep.subr.bf16.mxu1 %v10220_v14  ;;  %v10298_v11 = vld [vmem:[#allocation11 + $0x3c4] ss:$16 sps:$4 sm:$0xff]   ;;  %v10296_v13 = vld [vmem:[#allocation11 + $0x3c0] ss:$16 sps:$4 sm:$0xff]  }
 0xe72   :  { %v10301_v14 = vld [vmem:[#allocation11 + $0x1e4] ss:$16 sps:$4 sm:$0xff]  }
 0xe74   :  { %6195 = vmatpush1.bf16.msra.mxu0 %v10215_v15  ;;  %6236 = vmatpush1.bf16.msra.mxu1 %v10218_v16  ;;  %v10304_v15 = vld [vmem:[#allocation11 + $0x3e4] ss:$16 sps:$4 sm:$0xff]   ;;  %v10299_v16 = vld [vmem:[#allocation11 + $0x1e0] ss:$16 sps:$4 sm:$0xff]  }
 0xe75   :  { %6196 = vmatprep.subr.bf16.mxu0 %v10223_v17  ;;  %6237 = vmatprep.subr.bf16.mxu1 %v10226_v18  ;;  %v10302_v17 = vld [vmem:[#allocation11 + $0x3e0] ss:$16 sps:$4 sm:$0xff]   ;;  %v10307_v18 = vld [vmem:[#allocation11 + $0xc] ss:$16 sps:$4 sm:$0xff]  }
 0xe78   :  { %6197 = vmatpush1.bf16.msra.mxu0 %v10221_v19  ;;  %6238 = vmatpush1.bf16.msra.mxu1 %v10224_v34  ;;  %v10310_v19 = vld [vmem:[#allocation11 + $0x20c] ss:$16 sps:$4 sm:$0xff]  }
 0xe79   :  { %6198 = vmatprep.subr.bf16.mxu0 %v10229_v61  ;;  %6239 = vmatprep.subr.bf16.mxu1 %v10232_v54  ;;  %v5265_v34 = vld [vmem:[#allocation8] sm:$0xf] }
 0xe7a   :  { %v5270_v61 = vrot.slane %v5265_v34, %v11652_v31  ;;  %v5278_v54 = vrot.slane %v5265_v34, %v11683_v6 }
 0xe7c   :  { %6199 = vmatpush1.bf16.msra.mxu0 %v10227_v24  ;;  %6240 = vmatpush1.bf16.msra.mxu1 %v10230_v59 }
 0xe7d   :  { %6200 = vmatprep.subr.bf16.mxu0 %v10235_v3  ;;  %6241 = vmatprep.subr.bf16.mxu1 %v10238_v23  ;;  %v5274_v3 = vrot.slane %v5265_v34, %v11616_v36  ;;  %v5282_v23 = vrot.slane %v5265_v34, %v11686_v9  ;;  %v10361_v34 = vld [vmem:[#allocation11 + $0x12c] ss:$16 sps:$4 sm:$0xff]  }
 0xe80   :  { %6201 = vmatpush1.bf16.msra.mxu0 %v10233_v39  ;;  %6242 = vmatpush1.bf16.msra.mxu1 %v10236_v28 }
 0xe81   :  { %6202 = vmatprep.subr.bf16.mxu0 %v10241_v63  ;;  %6243 = vmatprep.subr.bf16.mxu1 %v10244_v27 }
 0xe84   :  { %6203 = vmatpush1.bf16.msra.mxu0 %v10239_v29  ;;  %6244 = vmatpush1.bf16.msra.mxu1 %v10242_v21 }
 0xe85   :  { %6204 = vmatprep.subr.bf16.mxu0 %v10247_v32  ;;  %6245 = vmatprep.subr.bf16.mxu1 %v10250_v5 }
 0xe88   :  { %6205 = vmatpush1.bf16.msra.mxu0 %v10245_v35  ;;  %6246 = vmatpush1.bf16.msra.mxu1 %v10248_v33 }
 0xe89   :  { %6206 = vmatprep.subr.bf16.mxu0 %v10253_v40  ;;  %6247 = vmatprep.subr.bf16.mxu1 %v10256_v8 }
 0xe8c   :  { %6207 = vmatpush1.bf16.msra.mxu0 %v10251_v22  ;;  %6248 = vmatpush1.bf16.msra.mxu1 %v10254_v46 }
 0xe8d   :  { %6208 = vmatprep.subr.bf16.mxu0 %v10259_v10  ;;  %6249 = vmatprep.subr.bf16.mxu1 %v10262_v50 }
 0xe90   :  { %6209 = vmatpush1.bf16.msra.mxu0 %v10257_v49  ;;  %6250 = vmatpush1.bf16.msra.mxu1 %v10260_v51  ;;  %v10305_v49 = vld [vmem:[#allocation11 + $0x8] ss:$16 sps:$4 sm:$0xff]  }
 0xe91   :  { %6210 = vmatprep.subr.bf16.mxu0 %v10265_v53  ;;  %6251 = vmatprep.subr.bf16.mxu1 %v10268_v55  ;;  %v10311_v53 = vld [vmem:[#allocation11 + $0x28] ss:$16 sps:$4 sm:$0xff]  }
 0xe92   :  { %v10314_v55 = vld [vmem:[#allocation11 + $0x228] ss:$16 sps:$4 sm:$0xff]  }
 0xe94   :  { %6211 = vmatpush1.bf16.msra.mxu0 %v10263_v60  ;;  %6252 = vmatpush1.bf16.msra.mxu1 %v10266_v26  ;;  %v10319_v60 = vld [vmem:[#allocation11 + $0x4c] ss:$16 sps:$4 sm:$0xff]  }
 0xe95   :  { %6212 = vmatprep.subr.bf16.mxu0 %v10271_v62  ;;  %6253 = vmatprep.subr.bf16.mxu1 %v10274_v38  ;;  %v10322_v26 = vld [vmem:[#allocation11 + $0x24c] ss:$16 sps:$4 sm:$0xff]   ;;  %v10317_v62 = vld [vmem:[#allocation11 + $0x48] ss:$16 sps:$4 sm:$0xff]  }
 0xe96   :  { %v10320_v38 = vld [vmem:[#allocation11 + $0x248] ss:$16 sps:$4 sm:$0xff]  }
 0xe98   :  { %6213 = vmatpush1.bf16.msra.mxu0 %v10269_v56  ;;  %6254 = vmatpush1.bf16.msra.mxu1 %v10272_v58  ;;  %v10325_v56 = vld [vmem:[#allocation11 + $0x6c] ss:$16 sps:$4 sm:$0xff]  }
 0xe99   :  { %6214 = vmatprep.subr.bf16.mxu0 %v10277_v0  ;;  %6255 = vmatprep.subr.bf16.mxu1 %v10280_v52  ;;  %v10328_v58 = vld [vmem:[#allocation11 + $0x26c] ss:$16 sps:$4 sm:$0xff]   ;;  %v10323_v0 = vld [vmem:[#allocation11 + $0x68] ss:$16 sps:$4 sm:$0xff]  }
 0xe9a   :  { %v10326_v52 = vld [vmem:[#allocation11 + $0x268] ss:$16 sps:$4 sm:$0xff]  }
 0xe9c   :  { %6215 = vmatpush1.bf16.msra.mxu0 %v10275_v57  ;;  %6256 = vmatpush1.bf16.msra.mxu1 %v10278_v42  ;;  %v10331_v57 = vld [vmem:[#allocation11 + $0x8c] ss:$16 sps:$4 sm:$0xff]  }
 0xe9d   :  { %6216 = vmatprep.subr.bf16.mxu0 %v10283_v4  ;;  %6257 = vmatprep.subr.bf16.mxu1 %v10286_v44  ;;  %v10334_v42 = vld [vmem:[#allocation11 + $0x28c] ss:$16 sps:$4 sm:$0xff]   ;;  %v10329_v4 = vld [vmem:[#allocation11 + $0x88] ss:$16 sps:$4 sm:$0xff]  }
 0xe9e   :  { %v10332_v44 = vld [vmem:[#allocation11 + $0x288] ss:$16 sps:$4 sm:$0xff]  }
 0xea0   :  { %6217 = vmatpush1.bf16.msra.mxu0 %v10281_v1  ;;  %6258 = vmatpush1.bf16.msra.mxu1 %v10284_v48  ;;  %v10337_v1 = vld [vmem:[#allocation11 + $0xac] ss:$16 sps:$4 sm:$0xff]  }
 0xea1   :  { %6218 = vmatprep.subr.bf16.mxu0 %v10289_v2  ;;  %6259 = vmatprep.subr.bf16.mxu1 %v10292_v25  ;;  %v10340_v48 = vld [vmem:[#allocation11 + $0x2ac] ss:$16 sps:$4 sm:$0xff]   ;;  %v10335_v2 = vld [vmem:[#allocation11 + $0xa8] ss:$16 sps:$4 sm:$0xff]  }
 0xea2   :  { %v10338_v25 = vld [vmem:[#allocation11 + $0x2a8] ss:$16 sps:$4 sm:$0xff]  }
 0xea4   :  { %6219 = vmatpush1.bf16.msra.mxu0 %v10287_v45  ;;  %6260 = vmatpush1.bf16.msra.mxu1 %v10290_v41  ;;  %v10343_v45 = vld [vmem:[#allocation11 + $0xcc] ss:$16 sps:$4 sm:$0xff]  }
 0xea5   :  { %6220 = vmatprep.subr.bf16.mxu0 %v10295_v7  ;;  %6261 = vmatprep.subr.bf16.mxu1 %v10298_v11  ;;  %v10346_v41 = vld [vmem:[#allocation11 + $0x2cc] ss:$16 sps:$4 sm:$0xff]   ;;  %v10341_v7 = vld [vmem:[#allocation11 + $0xc8] ss:$16 sps:$4 sm:$0xff]  }
 0xea6   :  { %v10344_v11 = vld [vmem:[#allocation11 + $0x2c8] ss:$16 sps:$4 sm:$0xff]  }
 0xea8   :  { %6221 = vmatpush1.bf16.msra.mxu0 %v10293_v12  ;;  %6262 = vmatpush1.bf16.msra.mxu1 %v10296_v13  ;;  %v10349_v12 = vld [vmem:[#allocation11 + $0xec] ss:$16 sps:$4 sm:$0xff]  }
 0xea9   :  { %6222 = vmatprep.subr.bf16.mxu0 %v10301_v14  ;;  %6263 = vmatprep.subr.bf16.mxu1 %v10304_v15  ;;  %v10352_v13 = vld [vmem:[#allocation11 + $0x2ec] ss:$16 sps:$4 sm:$0xff]   ;;  %v10347_v14 = vld [vmem:[#allocation11 + $0xe8] ss:$16 sps:$4 sm:$0xff]  }
 0xeaa   :  { %v10350_v15 = vld [vmem:[#allocation11 + $0x2e8] ss:$16 sps:$4 sm:$0xff]  }
 0xeac   :  { %6223 = vmatpush1.bf16.msra.mxu0 %v10299_v16  ;;  %6264 = vmatpush1.bf16.msra.mxu1 %v10302_v17  ;;  %v10355_v16 = vld [vmem:[#allocation11 + $0x10c] ss:$16 sps:$4 sm:$0xff]  }
 0xead   :  { %6274 = vmatprep.subr.bf16.mxu0 %v10307_v18  ;;  %6315 = vmatprep.subr.bf16.mxu1 %v10310_v19  ;;  %v10358_v17 = vld [vmem:[#allocation11 + $0x30c] ss:$16 sps:$4 sm:$0xff]   ;;  %v10353_v18 = vld [vmem:[#allocation11 + $0x108] ss:$16 sps:$4 sm:$0xff]  }
 0xeae   :  { %v10356_v19 = vld [vmem:[#allocation11 + $0x308] ss:$16 sps:$4 sm:$0xff]  }
 0xf42   :  { %v5213_v24 = vpop.f32.mrb[48].mxu0  ;;  %v5254_v59 = vpop.f32.mrb[64].mxu1 }
 0xf43   :  { %v5261_v39 = vadd.f32 %v5213_v24, %v11815_v47  ;;  %v5263_v28 = vadd.f32 %v5254_v59, %v11818_v20  ;;  %v5215_v63 = vpop.f32.mrb[49].mxu0  ;;  %v5256_v27 = vpop.f32.mrb[65].mxu1  ;;  %v10308_v47 = vld [vmem:[#allocation11 + $0x208] ss:$16 sps:$4 sm:$0xff]   ;;  %v10367_v59 = vld [vmem:[#allocation11 + $0x14c] ss:$16 sps:$4 sm:$0xff]  }
 0xf44   :  { %v5262_v29 = vadd.f32 %v5215_v63, %v11821_v37  ;;  %v5264_v21 = vadd.f32 %v5256_v27, %v11824_v43  ;;  %v5217_v32 = vpop.f32.mrb[50].mxu0  ;;  %v5258_v5 = vpop.f32.mrb[66].mxu1  ;;  %v10313_v37 = vld [vmem:[#allocation11 + $0x2c] ss:$16 sps:$4 sm:$0xff]   ;;  %v10362_v24 = vld [vmem:[#allocation11 + $0x328] ss:$16 sps:$4 sm:$0xff]  }
 0xf45   :  { %v5287_v35 = vadd.f32 %v5270_v61, %v5261_v39  ;;  %v5289_v33 = vadd.f32 %v5278_v54, %v5263_v28  ;;  %v5218_v40 = vpop.f32.mrb[51].mxu0  ;;  %v5259_v8 = vpop.f32.mrb[67].mxu1  ;;  %v10316_v43 = vld [vmem:[#allocation11 + $0x22c] ss:$16 sps:$4 sm:$0xff]   ;;  %v10359_v54 = vld [vmem:[#allocation11 + $0x128] ss:$16 sps:$4 sm:$0xff]  }
 0xf46   :  { %v5288_v22 = vadd.f32 %v5274_v3, %v5262_v29  ;;  %v5290_v46 = vadd.f32 %v5282_v23, %v5264_v21  ;;  %v10364_v61 = vld [vmem:[#allocation11 + $0x32c] ss:$16 sps:$4 sm:$0xff]   ;;  %v10365_v23 = vld [vmem:[#allocation11 + $0x148] ss:$16 sps:$4 sm:$0xff]   ;;  %v11233_v8 = vmov 1966171168  }
 0xf47   :  { %v11843_v51 = vpack.c.bf16 %v5287_v35, %v5287_v35  ;;  %v11845_v20 = vpack.c.bf16 %v5289_v33, %v5289_v33  ;;  %v10370_v3 = vld [vmem:[#allocation11 + $0x34c] ss:$16 sps:$4 sm:$0xff]   ;;  %v10368_v39 = vld [vmem:[#allocation11 + $0x348] ss:$16 sps:$4 sm:$0xff]  }
 0xf48   :  { %v5421_v10 = vpack.c.bf16 %v5288_v22, %v5288_v22  ;;  %v5423_v50 = vpack.c.bf16 %v5290_v46, %v5290_v46  ;;  %v10373_v28 = vld [vmem:[#allocation11 + $0x16c] ss:$16 sps:$4 sm:$0xff]   ;;  %v10371_v27 = vld [vmem:[#allocation11 + $0x168] ss:$16 sps:$4 sm:$0xff]   ;;  %v6366_v22 = vunpack.c.l.s4 %v11233_v8  ;;  %v10461_v8 = vld [vmem:[#allocation10 + $0x140] ss:$16 sps:$4 sm:$0xff]  }
 0xf49   :  { %v10376_v63 = vld [vmem:[#allocation11 + $0x36c] ss:$16 sps:$4 sm:$0xff]   ;;  %v10374_v29 = vld [vmem:[#allocation11 + $0x368] ss:$16 sps:$4 sm:$0xff]  }
 0xf4a   :  { %6224 = vmatprep.mubr.bf16.mxu0 %v5421_v10  ;;  %6265 = vmatprep.mubr.bf16.mxu1 %v5423_v50  ;;  %v10379_v21 = vld [vmem:[#allocation11 + $0x18c] ss:$16 sps:$4 sm:$0xff]   ;;  %v10377_v5 = vld [vmem:[#allocation11 + $0x188] ss:$16 sps:$4 sm:$0xff]  }
 0xf4b   :  { %6225 = vmatmul.mubr.bf16.vlgmr.msra.gmra.mrb[52].mxu0 %v11843_v51  ;;  %6266 = vmatmul.mubr.bf16.vlgmr.msra.gmra.mrb[68].mxu1 %v11845_v20  ;;  %v10382_v32 = vld [vmem:[#allocation11 + $0x38c] ss:$16 sps:$4 sm:$0xff]   ;;  %v10380_v35 = vld [vmem:[#allocation11 + $0x388] ss:$16 sps:$4 sm:$0xff]  }
 0xf4c   :  { %6275 = vmatpush1.bf16.msra.mxu0 %v10305_v49  ;;  %6316 = vmatpush1.bf16.msra.mxu1 %v10308_v47  ;;  %v10385_v33 = vld [vmem:[#allocation11 + $0x1ac] ss:$16 sps:$4 sm:$0xff]   ;;  %v10383_v46 = vld [vmem:[#allocation11 + $0x1a8] ss:$16 sps:$4 sm:$0xff]   ;;  %v6367_v47 = vunpack.c.0.s8 %v6366_v22  ;;  %v10464_v22 = vld [vmem:[#allocation10 + $0x340] ss:$16 sps:$4 sm:$0xff]  }
 0xf4d   :  { %6306 = vmatprep.mubr.bf16.mxu0 %v5421_v10  ;;  %6347 = vmatprep.mubr.bf16.mxu1 %v5423_v50  ;;  %v10388_v40 = vld [vmem:[#allocation11 + $0x3ac] ss:$16 sps:$4 sm:$0xff]   ;;  %v10386_v10 = vld [vmem:[#allocation11 + $0x3a8] ss:$16 sps:$4 sm:$0xff]  }
 0xf4e   :  { %6276 = vmatprep.subr.bf16.mxu0 %v10313_v37  ;;  %6317 = vmatprep.subr.bf16.mxu1 %v10316_v43  ;;  %v10391_v50 = vld [vmem:[#allocation11 + $0x1cc] ss:$16 sps:$4 sm:$0xff]   ;;  %v11852_v37 = vld.sshfl [vmem:[%s12042_s23] sm:$0x33 pattern:$0x75316420] }
 0xf4f   :  { %v10394_v49 = vld [vmem:[#allocation11 + $0x3cc] ss:$16 sps:$4 sm:$0xff]   ;;  %v10389_v43 = vld [vmem:[#allocation11 + $0x1c8] ss:$16 sps:$4 sm:$0xff]  }
 0xf50   :  { %6277 = vmatpush1.bf16.msra.mxu0 %v10311_v53  ;;  %6318 = vmatpush1.bf16.msra.mxu1 %v10314_v55  ;;  %v10392_v53 = vld [vmem:[#allocation11 + $0x3c8] ss:$16 sps:$4 sm:$0xff]   ;;  %v10397_v55 = vld [vmem:[#allocation11 + $0x1ec] ss:$16 sps:$4 sm:$0xff]  }
 0xf51   :  { %6278 = vmatprep.subr.bf16.mxu0 %v10319_v60  ;;  %6319 = vmatprep.subr.bf16.mxu1 %v10322_v26  ;;  %v10400_v60 = vld [vmem:[#allocation11 + $0x3ec] ss:$16 sps:$4 sm:$0xff]   ;;  %v6364_v26 = vcombine.high %v11852_v37, %v11852_v37 }
 0xf54   :  { %6279 = vmatpush1.bf16.msra.mxu0 %v10317_v62  ;;  %6320 = vmatpush1.bf16.msra.mxu1 %v10320_v38  ;;  %v11857_v62 = vsub.s32 %v6367_v47, %v11611_v30  ;;  %v10395_v38 = vld [vmem:[#allocation11 + $0x1e8] ss:$16 sps:$4 sm:$0xff]   ;;  %v10412_v30 = vld [vmem:[#allocation10 + $0x224] ss:$16 sps:$4 sm:$0xff]  }
 0xf55   :  { %6280 = vmatprep.subr.bf16.mxu0 %v10325_v56  ;;  %6321 = vmatprep.subr.bf16.mxu1 %v10328_v58  ;;  %v10398_v56 = vld [vmem:[#allocation11 + $0x3e8] ss:$16 sps:$4 sm:$0xff]   ;;  %v10403_v58 = vld [vmem:[#allocation10 + $0x4] ss:$16 sps:$4 sm:$0xff]  }
 0xf56   :  { %v10475_v47 = vld [vmem:[#allocation10 + $0x184] ss:$16 sps:$4 sm:$0xff]  }
 0xf58   :  { %6281 = vmatpush1.bf16.msra.mxu0 %v10323_v0  ;;  %6322 = vmatpush1.bf16.msra.mxu1 %v10326_v52  ;;  %v10406_v0 = vld [vmem:[#allocation10 + $0x204] ss:$16 sps:$4 sm:$0xff]   ;;  %v11860_v52 = vrot.slane %v6364_v26, %v11857_v62 }
 0xf59   :  { %6282 = vmatprep.subr.bf16.mxu0 %v10331_v57  ;;  %6323 = vmatprep.subr.bf16.mxu1 %v10334_v42  ;;  %v10401_v57 = vld [vmem:[#allocation10] ss:$16 sps:$4 sm:$0xff]   ;;  %v10484_v26 = vld [vmem:[#allocation10 + $0x3a4] ss:$16 sps:$4 sm:$0xff]  }
 0xf5a   :  { %v10404_v42 = vld [vmem:[#allocation10 + $0x200] ss:$16 sps:$4 sm:$0xff]  }
 0xf5c   :  { %6283 = vmatpush1.bf16.msra.mxu0 %v10329_v4  ;;  %6324 = vmatpush1.bf16.msra.mxu1 %v10332_v44  ;;  %v10409_v4 = vld [vmem:[#allocation10 + $0x24] ss:$16 sps:$4 sm:$0xff]   ;;  %v11864_v44 = vcombine.high %v11860_v52, %v11860_v52 }
 0xf5d   :  { %6284 = vmatprep.subr.bf16.mxu0 %v10337_v1  ;;  %6325 = vmatprep.subr.bf16.mxu1 %v10340_v48  ;;  %v10407_v1 = vld [vmem:[#allocation10 + $0x20] ss:$16 sps:$4 sm:$0xff]  }
 0xf5e   :  { %v10410_v48 = vld [vmem:[#allocation10 + $0x220] ss:$16 sps:$4 sm:$0xff]  }
 0xf60   :  { %6285 = vmatpush1.bf16.msra.mxu0 %v10335_v2  ;;  %6326 = vmatpush1.bf16.msra.mxu1 %v10338_v25  ;;  %v10415_v2 = vld [vmem:[#allocation10 + $0x44] ss:$16 sps:$4 sm:$0xff]  }
 0xf61   :  { %6286 = vmatprep.subr.bf16.mxu0 %v10343_v45  ;;  %6327 = vmatprep.subr.bf16.mxu1 %v10346_v41  ;;  %v10418_v25 = vld [vmem:[#allocation10 + $0x244] ss:$16 sps:$4 sm:$0xff]   ;;  %v10413_v45 = vld [vmem:[#allocation10 + $0x40] ss:$16 sps:$4 sm:$0xff]  }
 0xf62   :  { %v10416_v41 = vld [vmem:[#allocation10 + $0x240] ss:$16 sps:$4 sm:$0xff]  }
 0xf64   :  { %6287 = vmatpush1.bf16.msra.mxu0 %v10341_v7  ;;  %6328 = vmatpush1.bf16.msra.mxu1 %v10344_v11  ;;  %v10419_v7 = vld [vmem:[#allocation10 + $0x60] ss:$16 sps:$4 sm:$0xff]  }
 0xf65   :  { %6288 = vmatprep.subr.bf16.mxu0 %v10349_v12  ;;  %6329 = vmatprep.subr.bf16.mxu1 %v10352_v13  ;;  %v10422_v11 = vld [vmem:[#allocation10 + $0x260] ss:$16 sps:$4 sm:$0xff]   ;;  %v10427_v12 = vld [vmem:[#allocation10 + $0x84] ss:$16 sps:$4 sm:$0xff]  }
 0xf66   :  { %v10430_v13 = vld [vmem:[#allocation10 + $0x284] ss:$16 sps:$4 sm:$0xff]  }
 0xf68   :  { %6289 = vmatpush1.bf16.msra.mxu0 %v10347_v14  ;;  %6330 = vmatpush1.bf16.msra.mxu1 %v10350_v15  ;;  %v10425_v14 = vld [vmem:[#allocation10 + $0x80] ss:$16 sps:$4 sm:$0xff]  }
 0xf69   :  { %6290 = vmatprep.subr.bf16.mxu0 %v10355_v16  ;;  %6331 = vmatprep.subr.bf16.mxu1 %v10358_v17  ;;  %v10428_v15 = vld [vmem:[#allocation10 + $0x280] ss:$16 sps:$4 sm:$0xff]   ;;  %v10433_v16 = vld [vmem:[#allocation10 + $0xa4] ss:$16 sps:$4 sm:$0xff]  }
 0xf6a   :  { %v10436_v17 = vld [vmem:[#allocation10 + $0x2a4] ss:$16 sps:$4 sm:$0xff]  }
 0xf6c   :  { %6291 = vmatpush1.bf16.msra.mxu0 %v10353_v18  ;;  %6332 = vmatpush1.bf16.msra.mxu1 %v10356_v19  ;;  %v10431_v18 = vld [vmem:[#allocation10 + $0xa0] ss:$16 sps:$4 sm:$0xff]  }
 0xf6d   :  { %6292 = vmatprep.subr.bf16.mxu0 %v10361_v34  ;;  %6333 = vmatprep.subr.bf16.mxu1 %v10364_v61  ;;  %v10434_v19 = vld [vmem:[#allocation10 + $0x2a0] ss:$16 sps:$4 sm:$0xff]   ;;  %v10439_v34 = vld [vmem:[#allocation10 + $0xc4] ss:$16 sps:$4 sm:$0xff]  }
 0xf6e   :  { %v10442_v61 = vld [vmem:[#allocation10 + $0x2c4] ss:$16 sps:$4 sm:$0xff]  }
 0xf70   :  { %6293 = vmatpush1.bf16.msra.mxu0 %v10359_v54  ;;  %6334 = vmatpush1.bf16.msra.mxu1 %v10362_v24  ;;  %v10437_v54 = vld [vmem:[#allocation10 + $0xc0] ss:$16 sps:$4 sm:$0xff]  }
 0xf71   :  { %6294 = vmatprep.subr.bf16.mxu0 %v10367_v59  ;;  %6335 = vmatprep.subr.bf16.mxu1 %v10370_v3  ;;  %v10440_v24 = vld [vmem:[#allocation10 + $0x2c0] ss:$16 sps:$4 sm:$0xff]   ;;  %v10445_v59 = vld [vmem:[#allocation10 + $0xe4] ss:$16 sps:$4 sm:$0xff]  }
 0xf72   :  { %v10448_v3 = vld [vmem:[#allocation10 + $0x2e4] ss:$16 sps:$4 sm:$0xff]  }
 0xf74   :  { %6295 = vmatpush1.bf16.msra.mxu0 %v10365_v23  ;;  %6336 = vmatpush1.bf16.msra.mxu1 %v10368_v39  ;;  %v10443_v23 = vld [vmem:[#allocation10 + $0xe0] ss:$16 sps:$4 sm:$0xff]  }
 0xf75   :  { %6296 = vmatprep.subr.bf16.mxu0 %v10373_v28  ;;  %6337 = vmatprep.subr.bf16.mxu1 %v10376_v63  ;;  %v10446_v39 = vld [vmem:[#allocation10 + $0x2e0] ss:$16 sps:$4 sm:$0xff]   ;;  %v10451_v28 = vld [vmem:[#allocation10 + $0x104] ss:$16 sps:$4 sm:$0xff]  }
 0xf76   :  { %v10454_v63 = vld [vmem:[#allocation10 + $0x304] ss:$16 sps:$4 sm:$0xff]  }
 0xf78   :  { %6297 = vmatpush1.bf16.msra.mxu0 %v10371_v27  ;;  %6338 = vmatpush1.bf16.msra.mxu1 %v10374_v29  ;;  %v10449_v27 = vld [vmem:[#allocation10 + $0x100] ss:$16 sps:$4 sm:$0xff]  }
 0xf79   :  { %6298 = vmatprep.subr.bf16.mxu0 %v10379_v21  ;;  %6339 = vmatprep.subr.bf16.mxu1 %v10382_v32  ;;  %v10452_v29 = vld [vmem:[#allocation10 + $0x300] ss:$16 sps:$4 sm:$0xff]   ;;  %v10457_v21 = vld [vmem:[#allocation10 + $0x124] ss:$16 sps:$4 sm:$0xff]  }
 0xf7a   :  { %v10460_v32 = vld [vmem:[#allocation10 + $0x324] ss:$16 sps:$4 sm:$0xff]  }
 0xf7c   :  { %6299 = vmatpush1.bf16.msra.mxu0 %v10377_v5  ;;  %6340 = vmatpush1.bf16.msra.mxu1 %v10380_v35  ;;  %v10455_v5 = vld [vmem:[#allocation10 + $0x120] ss:$16 sps:$4 sm:$0xff]  }
 0xf7d   :  { %6300 = vmatprep.subr.bf16.mxu0 %v10385_v33  ;;  %6341 = vmatprep.subr.bf16.mxu1 %v10388_v40  ;;  %v10458_v35 = vld [vmem:[#allocation10 + $0x320] ss:$16 sps:$4 sm:$0xff]   ;;  %v10463_v33 = vld [vmem:[#allocation10 + $0x144] ss:$16 sps:$4 sm:$0xff]  }
 0xf7e   :  { %v10466_v40 = vld [vmem:[#allocation10 + $0x344] ss:$16 sps:$4 sm:$0xff]  }
 0xf80   :  { %6301 = vmatpush1.bf16.msra.mxu0 %v10383_v46  ;;  %6342 = vmatpush1.bf16.msra.mxu1 %v10386_v10  ;;  %v10469_v46 = vld [vmem:[#allocation10 + $0x164] ss:$16 sps:$4 sm:$0xff]  }
 0xf81   :  { %6302 = vmatprep.subr.bf16.mxu0 %v10391_v50  ;;  %6343 = vmatprep.subr.bf16.mxu1 %v10394_v49  ;;  %v10472_v10 = vld [vmem:[#allocation10 + $0x364] ss:$16 sps:$4 sm:$0xff]   ;;  %v10467_v50 = vld [vmem:[#allocation10 + $0x160] ss:$16 sps:$4 sm:$0xff]  }
 0xf82   :  { %v10470_v49 = vld [vmem:[#allocation10 + $0x360] ss:$16 sps:$4 sm:$0xff]  }
 0xf84   :  { %6303 = vmatpush1.bf16.msra.mxu0 %v10389_v43  ;;  %6344 = vmatpush1.bf16.msra.mxu1 %v10392_v53  ;;  %v10478_v43 = vld [vmem:[#allocation10 + $0x384] ss:$16 sps:$4 sm:$0xff]   ;;  %v10473_v53 = vld [vmem:[#allocation10 + $0x180] ss:$16 sps:$4 sm:$0xff]  }
 0xf85   :  { %6304 = vmatprep.subr.bf16.mxu0 %v10397_v55  ;;  %6345 = vmatprep.subr.bf16.mxu1 %v10400_v60  ;;  %v10476_v55 = vld [vmem:[#allocation10 + $0x380] ss:$16 sps:$4 sm:$0xff]   ;;  %v10481_v60 = vld [vmem:[#allocation10 + $0x1a4] ss:$16 sps:$4 sm:$0xff]  }
 0xf88   :  { %6305 = vmatpush1.bf16.msra.mxu0 %v10395_v38  ;;  %6346 = vmatpush1.bf16.msra.mxu1 %v10398_v56  ;;  %v10479_v38 = vld [vmem:[#allocation10 + $0x1a0] ss:$16 sps:$4 sm:$0xff]  }
 0xf89   :  { %7025 = vmatprep.subr.bf16.mxu0 %v10403_v58  ;;  %7066 = vmatprep.subr.bf16.mxu1 %v10406_v0  ;;  %v10482_v56 = vld [vmem:[#allocation10 + $0x3a0] ss:$16 sps:$4 sm:$0xff]   ;;  %v10487_v58 = vld [vmem:[#allocation10 + $0x1c4] ss:$16 sps:$4 sm:$0xff]  }
 0xf8a   :  { %v10490_v0 = vld [vmem:[#allocation10 + $0x3c4] ss:$16 sps:$4 sm:$0xff]  }
 0xf8b   :  { %6307 = vmatmul.mubr.bf16.vlgmr.msra.gmra.mrb[56].mxu0 %v11843_v51  ;;  %6348 = vmatmul.mubr.bf16.vlgmr.msra.gmra.mrb[72].mxu1 %v11845_v20  ;;  %v10421_v51 = vld [vmem:[#allocation10 + $0x64] ss:$16 sps:$4 sm:$0xff]  }
 0xf8c   :  { %7026 = vmatpush1.bf16.msra.mxu0 %v10401_v57  ;;  %7067 = vmatpush1.bf16.msra.mxu1 %v10404_v42  ;;  %v10424_v20 = vld [vmem:[#allocation10 + $0x264] ss:$16 sps:$4 sm:$0xff]   ;;  %v10485_v57 = vld [vmem:[#allocation10 + $0x1c0] ss:$16 sps:$4 sm:$0xff]  }
 0xf8d   :  { %7027 = vmatprep.subr.bf16.mxu0 %v10409_v4  ;;  %7068 = vmatprep.subr.bf16.mxu1 %v10412_v30  ;;  %v10488_v42 = vld [vmem:[#allocation10 + $0x3c0] ss:$16 sps:$4 sm:$0xff]   ;;  %v10493_v4 = vld [vmem:[#allocation10 + $0x1e4] ss:$16 sps:$4 sm:$0xff]  }
 0xf8e   :  { %7057 = vmatprep.mubr.bf16.mxu0 %v11860_v52  ;;  %7098 = vmatprep.mubr.bf16.mxu1 %v11864_v44  ;;  %v10496_v30 = vld [vmem:[#allocation10 + $0x3e4] ss:$16 sps:$4 sm:$0xff]  }
 0xf90   :  { %7028 = vmatpush1.bf16.msra.mxu0 %v10407_v1  ;;  %7069 = vmatpush1.bf16.msra.mxu1 %v10410_v48  ;;  %v11872_v1 = vrot.slane %v11852_v37, %v11857_v62  ;;  %v10491_v48 = vld [vmem:[#allocation10 + $0x1e0] ss:$16 sps:$4 sm:$0xff]   ;;  %v10505_v37 = vld [vmem:[#allocation10 + $0x2c] ss:$16 sps:$4 sm:$0xff]  }
 0xf91   :  { %7029 = vmatprep.subr.bf16.mxu0 %v10415_v2  ;;  %7070 = vmatprep.subr.bf16.mxu1 %v10418_v25  ;;  %v10494_v2 = vld [vmem:[#allocation10 + $0x3e0] ss:$16 sps:$4 sm:$0xff]   ;;  %v10499_v25 = vld [vmem:[#allocation10 + $0xc] ss:$16 sps:$4 sm:$0xff]  }
 0xf92   :  { %v10508_v62 = vld [vmem:[#allocation10 + $0x22c] ss:$16 sps:$4 sm:$0xff]  }
 0xf94   :  { %7030 = vmatpush1.bf16.msra.mxu0 %v10413_v45  ;;  %7071 = vmatpush1.bf16.msra.mxu1 %v10416_v41  ;;  %v10502_v45 = vld [vmem:[#allocation10 + $0x20c] ss:$16 sps:$4 sm:$0xff]   ;;  %v11876_v41 = vcombine.high %v11872_v1, %v11872_v1 }
 0xf95   :  { %7031 = vmatprep.subr.bf16.mxu0 %v10421_v51  ;;  %7072 = vmatprep.subr.bf16.mxu1 %v10424_v20  ;;  %v10497_v51 = vld [vmem:[#allocation10 + $0x8] ss:$16 sps:$4 sm:$0xff]  }
 0xf96   :  { %v10500_v20 = vld [vmem:[#allocation10 + $0x208] ss:$16 sps:$4 sm:$0xff]  }
 0xf98   :  { %7032 = vmatpush1.bf16.msra.mxu0 %v10419_v7  ;;  %7073 = vmatpush1.bf16.msra.mxu1 %v10422_v11  ;;  %v10503_v7 = vld [vmem:[#allocation10 + $0x28] ss:$16 sps:$4 sm:$0xff]  }
 0xf99   :  { %7033 = vmatprep.subr.bf16.mxu0 %v10427_v12  ;;  %7074 = vmatprep.subr.bf16.mxu1 %v10430_v13  ;;  %v10506_v11 = vld [vmem:[#allocation10 + $0x228] ss:$16 sps:$4 sm:$0xff]   ;;  %v10511_v12 = vld [vmem:[#allocation10 + $0x4c] ss:$16 sps:$4 sm:$0xff]  }
 0xf9a   :  { %v10514_v13 = vld [vmem:[#allocation10 + $0x24c] ss:$16 sps:$4 sm:$0xff]  }
 0xf9c   :  { %7034 = vmatpush1.bf16.msra.mxu0 %v10425_v14  ;;  %7075 = vmatpush1.bf16.msra.mxu1 %v10428_v15  ;;  %v10509_v14 = vld [vmem:[#allocation10 + $0x48] ss:$16 sps:$4 sm:$0xff]  }
 0xf9d   :  { %7035 = vmatprep.subr.bf16.mxu0 %v10433_v16  ;;  %7076 = vmatprep.subr.bf16.mxu1 %v10436_v17  ;;  %v10512_v15 = vld [vmem:[#allocation10 + $0x248] ss:$16 sps:$4 sm:$0xff]   ;;  %v10517_v16 = vld [vmem:[#allocation10 + $0x6c] ss:$16 sps:$4 sm:$0xff]  }
 0xf9e   :  { %v10520_v17 = vld [vmem:[#allocation10 + $0x26c] ss:$16 sps:$4 sm:$0xff]  }
 0xfa0   :  { %7036 = vmatpush1.bf16.msra.mxu0 %v10431_v18  ;;  %7077 = vmatpush1.bf16.msra.mxu1 %v10434_v19  ;;  %v10515_v18 = vld [vmem:[#allocation10 + $0x68] ss:$16 sps:$4 sm:$0xff]  }
 0xfa1   :  { %7037 = vmatprep.subr.bf16.mxu0 %v10439_v34  ;;  %7078 = vmatprep.subr.bf16.mxu1 %v10442_v61  ;;  %v10518_v19 = vld [vmem:[#allocation10 + $0x268] ss:$16 sps:$4 sm:$0xff]   ;;  %v10523_v34 = vld [vmem:[#allocation10 + $0x8c] ss:$16 sps:$4 sm:$0xff]  }
 0xfa2   :  { %v10526_v61 = vld [vmem:[#allocation10 + $0x28c] ss:$16 sps:$4 sm:$0xff]  }
 0xfa4   :  { %7038 = vmatpush1.bf16.msra.mxu0 %v10437_v54  ;;  %7079 = vmatpush1.bf16.msra.mxu1 %v10440_v24  ;;  %v10529_v54 = vld [vmem:[#allocation10 + $0xac] ss:$16 sps:$4 sm:$0xff]  }
 0xfa5   :  { %7039 = vmatprep.subr.bf16.mxu0 %v10445_v59  ;;  %7080 = vmatprep.subr.bf16.mxu1 %v10448_v3  ;;  %v10532_v24 = vld [vmem:[#allocation10 + $0x2ac] ss:$16 sps:$4 sm:$0xff]   ;;  %v10527_v59 = vld [vmem:[#allocation10 + $0xa8] ss:$16 sps:$4 sm:$0xff]  }
 0xfa6   :  { %v10530_v3 = vld [vmem:[#allocation10 + $0x2a8] ss:$16 sps:$4 sm:$0xff]  }
 0xfa8   :  { %7040 = vmatpush1.bf16.msra.mxu0 %v10443_v23  ;;  %7081 = vmatpush1.bf16.msra.mxu1 %v10446_v39  ;;  %v10535_v23 = vld [vmem:[#allocation10 + $0xcc] ss:$16 sps:$4 sm:$0xff]  }
 0xfa9   :  { %7041 = vmatprep.subr.bf16.mxu0 %v10451_v28  ;;  %7082 = vmatprep.subr.bf16.mxu1 %v10454_v63  ;;  %v10538_v39 = vld [vmem:[#allocation10 + $0x2cc] ss:$16 sps:$4 sm:$0xff]   ;;  %v10533_v28 = vld [vmem:[#allocation10 + $0xc8] ss:$16 sps:$4 sm:$0xff]  }
 0xfaa   :  { %v10536_v63 = vld [vmem:[#allocation10 + $0x2c8] ss:$16 sps:$4 sm:$0xff]  }
 0xfac   :  { %7042 = vmatpush1.bf16.msra.mxu0 %v10449_v27  ;;  %7083 = vmatpush1.bf16.msra.mxu1 %v10452_v29  ;;  %v10541_v27 = vld [vmem:[#allocation10 + $0xec] ss:$16 sps:$4 sm:$0xff]  }
 0xfad   :  { %7043 = vmatprep.subr.bf16.mxu0 %v10457_v21  ;;  %7084 = vmatprep.subr.bf16.mxu1 %v10460_v32  ;;  %v10544_v29 = vld [vmem:[#allocation10 + $0x2ec] ss:$16 sps:$4 sm:$0xff]   ;;  %v10539_v21 = vld [vmem:[#allocation10 + $0xe8] ss:$16 sps:$4 sm:$0xff]  }
 0xfae   :  { %v10542_v32 = vld [vmem:[#allocation10 + $0x2e8] ss:$16 sps:$4 sm:$0xff]  }
 0xfb0   :  { %7044 = vmatpush1.bf16.msra.mxu0 %v10455_v5  ;;  %7085 = vmatpush1.bf16.msra.mxu1 %v10458_v35  ;;  %v10547_v5 = vld [vmem:[#allocation10 + $0x10c] ss:$16 sps:$4 sm:$0xff]  }
 0xfb1   :  { %7045 = vmatprep.subr.bf16.mxu0 %v10463_v33  ;;  %7086 = vmatprep.subr.bf16.mxu1 %v10466_v40  ;;  %v10550_v35 = vld [vmem:[#allocation10 + $0x30c] ss:$16 sps:$4 sm:$0xff]   ;;  %v10545_v33 = vld [vmem:[#allocation10 + $0x108] ss:$16 sps:$4 sm:$0xff]  }
 0xfb2   :  { %v10548_v40 = vld [vmem:[#allocation10 + $0x308] ss:$16 sps:$4 sm:$0xff]  }
 0xfb4   :  { %7046 = vmatpush1.bf16.msra.mxu0 %v10461_v8  ;;  %7087 = vmatpush1.bf16.msra.mxu1 %v10464_v22  ;;  %v10553_v8 = vld [vmem:[#allocation10 + $0x12c] ss:$16 sps:$4 sm:$0xff]  }
 0xfb5   :  { %7047 = vmatprep.subr.bf16.mxu0 %v10469_v46  ;;  %7088 = vmatprep.subr.bf16.mxu1 %v10472_v10  ;;  %v10556_v22 = vld [vmem:[#allocation10 + $0x32c] ss:$16 sps:$4 sm:$0xff]   ;;  %v10551_v46 = vld [vmem:[#allocation10 + $0x128] ss:$16 sps:$4 sm:$0xff]  }
 0xfb6   :  { %v10554_v10 = vld [vmem:[#allocation10 + $0x328] ss:$16 sps:$4 sm:$0xff]  }
 0xfb8   :  { %7048 = vmatpush1.bf16.msra.mxu0 %v10467_v50  ;;  %7089 = vmatpush1.bf16.msra.mxu1 %v10470_v49  ;;  %v10559_v50 = vld [vmem:[#allocation10 + $0x14c] ss:$16 sps:$4 sm:$0xff]  }
 0xfb9   :  { %7049 = vmatprep.subr.bf16.mxu0 %v10475_v47  ;;  %7090 = vmatprep.subr.bf16.mxu1 %v10478_v43  ;;  %v10562_v49 = vld [vmem:[#allocation10 + $0x34c] ss:$16 sps:$4 sm:$0xff]   ;;  %v10557_v47 = vld [vmem:[#allocation10 + $0x148] ss:$16 sps:$4 sm:$0xff]  }
 0xfba   :  { %v10560_v43 = vld [vmem:[#allocation10 + $0x348] ss:$16 sps:$4 sm:$0xff]  }
 0xfbc   :  { %7050 = vmatpush1.bf16.msra.mxu0 %v10473_v53  ;;  %7091 = vmatpush1.bf16.msra.mxu1 %v10476_v55  ;;  %v10565_v53 = vld [vmem:[#allocation10 + $0x16c] ss:$16 sps:$4 sm:$0xff]  }
 0xfbd   :  { %7051 = vmatprep.subr.bf16.mxu0 %v10481_v60  ;;  %7092 = vmatprep.subr.bf16.mxu1 %v10484_v26  ;;  %v10568_v55 = vld [vmem:[#allocation10 + $0x36c] ss:$16 sps:$4 sm:$0xff]   ;;  %v10563_v60 = vld [vmem:[#allocation10 + $0x168] ss:$16 sps:$4 sm:$0xff]  }
 0xfbe   :  { %v10566_v26 = vld [vmem:[#allocation10 + $0x368] ss:$16 sps:$4 sm:$0xff]  }
 0xfc0   :  { %7052 = vmatpush1.bf16.msra.mxu0 %v10479_v38  ;;  %7093 = vmatpush1.bf16.msra.mxu1 %v10482_v56  ;;  %v10571_v38 = vld [vmem:[#allocation10 + $0x18c] ss:$16 sps:$4 sm:$0xff]  }
 0xfc1   :  { %7053 = vmatprep.subr.bf16.mxu0 %v10487_v58  ;;  %7094 = vmatprep.subr.bf16.mxu1 %v10490_v0  ;;  %v10574_v56 = vld [vmem:[#allocation10 + $0x38c] ss:$16 sps:$4 sm:$0xff]   ;;  %v10569_v58 = vld [vmem:[#allocation10 + $0x188] ss:$16 sps:$4 sm:$0xff]  }
 0xfc2   :  { %v10572_v0 = vld [vmem:[#allocation10 + $0x388] ss:$16 sps:$4 sm:$0xff]  }
 0xfc4   :  { %7054 = vmatpush1.bf16.msra.mxu0 %v10485_v57  ;;  %7095 = vmatpush1.bf16.msra.mxu1 %v10488_v42  ;;  %v10577_v57 = vld [vmem:[#allocation10 + $0x1ac] ss:$16 sps:$4 sm:$0xff]  }
 0xfc5   :  { %7055 = vmatprep.subr.bf16.mxu0 %v10493_v4  ;;  %7096 = vmatprep.subr.bf16.mxu1 %v10496_v30  ;;  %v10580_v42 = vld [vmem:[#allocation10 + $0x3ac] ss:$16 sps:$4 sm:$0xff]   ;;  %v10575_v4 = vld [vmem:[#allocation10 + $0x1a8] ss:$16 sps:$4 sm:$0xff]  }
 0xfc6   :  { %v10578_v30 = vld [vmem:[#allocation10 + $0x3a8] ss:$16 sps:$4 sm:$0xff]  }
 0xfc8   :  { %7056 = vmatpush1.bf16.msra.mxu0 %v10491_v48  ;;  %7097 = vmatpush1.bf16.msra.mxu1 %v10494_v2  ;;  %v10583_v48 = vld [vmem:[#allocation10 + $0x1cc] ss:$16 sps:$4 sm:$0xff]  }
 0xfc9   :  { %7107 = vmatprep.subr.bf16.mxu0 %v10499_v25  ;;  %7148 = vmatprep.subr.bf16.mxu1 %v10502_v45  ;;  %v10586_v2 = vld [vmem:[#allocation10 + $0x3cc] ss:$16 sps:$4 sm:$0xff]   ;;  %v10581_v25 = vld [vmem:[#allocation10 + $0x1c8] ss:$16 sps:$4 sm:$0xff]  }
 0xfca   :  { %v10584_v45 = vld [vmem:[#allocation10 + $0x3c8] ss:$16 sps:$4 sm:$0xff]  }
 0xfcb   :  { %7058 = vmatmul.mubr.bf16.vlgmr.msra.gmra.mrb[60].mxu0 %v11872_v1  ;;  %7099 = vmatmul.mubr.bf16.vlgmr.msra.gmra.mrb[76].mxu1 %v11876_v41 }
 0xfcc   :  { %7108 = vmatpush1.bf16.msra.mxu0 %v10497_v51  ;;  %7149 = vmatpush1.bf16.msra.mxu1 %v10500_v20  ;;  %v10589_v51 = vld [vmem:[#allocation10 + $0x1ec] ss:$16 sps:$4 sm:$0xff]  }
 0xfcd   :  { %7109 = vmatprep.subr.bf16.mxu0 %v10505_v37  ;;  %7150 = vmatprep.subr.bf16.mxu1 %v10508_v62  ;;  %v10592_v20 = vld [vmem:[#allocation10 + $0x3ec] ss:$16 sps:$4 sm:$0xff]   ;;  %v10587_v37 = vld [vmem:[#allocation10 + $0x1e8] ss:$16 sps:$4 sm:$0xff]  }
 0xfce   :  { %7139 = vmatprep.mubr.bf16.mxu0 %v11860_v52  ;;  %7180 = vmatprep.mubr.bf16.mxu1 %v11864_v44  ;;  %v10521_v52 = vld [vmem:[#allocation10 + $0x88] ss:$16 sps:$4 sm:$0xff]  }
 0xfcf   :  { %v10524_v44 = vld [vmem:[#allocation10 + $0x288] ss:$16 sps:$4 sm:$0xff]  }
 0xfd0   :  { %7110 = vmatpush1.bf16.msra.mxu0 %v10503_v7  ;;  %7151 = vmatpush1.bf16.msra.mxu1 %v10506_v11  ;;  %v10590_v62 = vld [vmem:[#allocation10 + $0x3e8] ss:$16 sps:$4 sm:$0xff]   ;;  %v10593_v11 = vld [vmem:[#allocation17] ss:$8 sps:$4 sm:$0xff]  }
 0xfd1   :  { %7111 = vmatprep.subr.bf16.mxu0 %v10511_v12  ;;  %7152 = vmatprep.subr.bf16.mxu1 %v10514_v13  ;;  %v10595_v7 = vld [vmem:[#allocation17 + $0x4] ss:$8 sps:$4 sm:$0xff]   ;;  %v10598_v12 = vld [vmem:[#allocation17 + $0x14] ss:$8 sps:$4 sm:$0xff]   ;;  %v10596_v13 = vld [vmem:[#allocation17 + $0x10] ss:$8 sps:$4 sm:$0xff]  }
 0xfd4   :  { %7112 = vmatpush1.bf16.msra.mxu0 %v10509_v14  ;;  %7153 = vmatpush1.bf16.msra.mxu1 %v10512_v15  ;;  %v10601_v14 = vld [vmem:[#allocation17 + $0x24] ss:$8 sps:$4 sm:$0xff]   ;;  %v10599_v15 = vld [vmem:[#allocation17 + $0x20] ss:$8 sps:$4 sm:$0xff]  }
 0xfd5   :  { %7113 = vmatprep.subr.bf16.mxu0 %v10517_v16  ;;  %7154 = vmatprep.subr.bf16.mxu1 %v10520_v17  ;;  %v10604_v16 = vld [vmem:[#allocation17 + $0x34] ss:$8 sps:$4 sm:$0xff]   ;;  %v10602_v17 = vld [vmem:[#allocation17 + $0x30] ss:$8 sps:$4 sm:$0xff]  }
 0xfd8   :  { %7114 = vmatpush1.bf16.msra.mxu0 %v10515_v18  ;;  %7155 = vmatpush1.bf16.msra.mxu1 %v10518_v19  ;;  %v10607_v18 = vld [vmem:[#allocation17 + $0x44] ss:$8 sps:$4 sm:$0xff]   ;;  %v10605_v19 = vld [vmem:[#allocation17 + $0x40] ss:$8 sps:$4 sm:$0xff]  }
 0xfd9   :  { %7115 = vmatprep.subr.bf16.mxu0 %v10523_v34  ;;  %7156 = vmatprep.subr.bf16.mxu1 %v10526_v61  ;;  %v10610_v34 = vld [vmem:[#allocation17 + $0x54] ss:$8 sps:$4 sm:$0xff]  }
 0xfdc   :  { %7116 = vmatpush1.bf16.msra.mxu0 %v10521_v52  ;;  %7157 = vmatpush1.bf16.msra.mxu1 %v10524_v44 }
 0xfdd   :  { %7117 = vmatprep.subr.bf16.mxu0 %v10529_v54  ;;  %7158 = vmatprep.subr.bf16.mxu1 %v10532_v24 }
 0xfe0   :  { %7118 = vmatpush1.bf16.msra.mxu0 %v10527_v59  ;;  %7159 = vmatpush1.bf16.msra.mxu1 %v10530_v3 }
 0xfe1   :  { %7119 = vmatprep.subr.bf16.mxu0 %v10535_v23  ;;  %7160 = vmatprep.subr.bf16.mxu1 %v10538_v39  ;;  %v10611_v39 = vld [vmem:[#allocation17 + $0x60] ss:$8 sps:$4 sm:$0xff]  }
 0xfe4   :  { %7120 = vmatpush1.bf16.msra.mxu0 %v10533_v28  ;;  %7161 = vmatpush1.bf16.msra.mxu1 %v10536_v63 }
 0xfe5   :  { %7121 = vmatprep.subr.bf16.mxu0 %v10541_v27  ;;  %7162 = vmatprep.subr.bf16.mxu1 %v10544_v29  ;;  %v10616_v27 = vld [vmem:[#allocation17 + $0x74] ss:$8 sps:$4 sm:$0xff]   ;;  %v10614_v29 = vld [vmem:[#allocation17 + $0x70] ss:$8 sps:$4 sm:$0xff]  }
 0xfe8   :  { %7122 = vmatpush1.bf16.msra.mxu0 %v10539_v21  ;;  %7163 = vmatpush1.bf16.msra.mxu1 %v10542_v32  ;;  %v10619_v21 = vld [vmem:[#allocation17 + $0x84] ss:$8 sps:$4 sm:$0xff]   ;;  %v10617_v32 = vld [vmem:[#allocation17 + $0x80] ss:$8 sps:$4 sm:$0xff]  }
 0xfe9   :  { %7123 = vmatprep.subr.bf16.mxu0 %v10547_v5  ;;  %7164 = vmatprep.subr.bf16.mxu1 %v10550_v35  ;;  %v10622_v5 = vld [vmem:[#allocation17 + $0x94] ss:$8 sps:$4 sm:$0xff]   ;;  %v10620_v35 = vld [vmem:[#allocation17 + $0x90] ss:$8 sps:$4 sm:$0xff]  }
 0xfec   :  { %7124 = vmatpush1.bf16.msra.mxu0 %v10545_v33  ;;  %7165 = vmatpush1.bf16.msra.mxu1 %v10548_v40  ;;  %v10625_v33 = vld [vmem:[#allocation17 + $0xa4] ss:$8 sps:$4 sm:$0xff]   ;;  %v10623_v40 = vld [vmem:[#allocation17 + $0xa0] ss:$8 sps:$4 sm:$0xff]  }
 0xfed   :  { %7125 = vmatprep.subr.bf16.mxu0 %v10553_v8  ;;  %7166 = vmatprep.subr.bf16.mxu1 %v10556_v22  ;;  %v10628_v8 = vld [vmem:[#allocation17 + $0xb4] ss:$8 sps:$4 sm:$0xff]   ;;  %v10626_v22 = vld [vmem:[#allocation17 + $0xb0] ss:$8 sps:$4 sm:$0xff]  }
 0xff0   :  { %7126 = vmatpush1.bf16.msra.mxu0 %v10551_v46  ;;  %7167 = vmatpush1.bf16.msra.mxu1 %v10554_v10  ;;  %v10631_v46 = vld [vmem:[#allocation17 + $0xc4] ss:$8 sps:$4 sm:$0xff]   ;;  %v10629_v10 = vld [vmem:[#allocation17 + $0xc0] ss:$8 sps:$4 sm:$0xff]  }
 0xff1   :  { %7127 = vmatprep.subr.bf16.mxu0 %v10559_v50  ;;  %7168 = vmatprep.subr.bf16.mxu1 %v10562_v49  ;;  %v10634_v50 = vld [vmem:[#allocation17 + $0xd4] ss:$8 sps:$4 sm:$0xff]   ;;  %v10632_v49 = vld [vmem:[#allocation17 + $0xd0] ss:$8 sps:$4 sm:$0xff]  }
 0xff4   :  { %7128 = vmatpush1.bf16.msra.mxu0 %v10557_v47  ;;  %7169 = vmatpush1.bf16.msra.mxu1 %v10560_v43  ;;  %v10637_v47 = vld [vmem:[#allocation17 + $0xe4] ss:$8 sps:$4 sm:$0xff]   ;;  %v10635_v43 = vld [vmem:[#allocation17 + $0xe0] ss:$8 sps:$4 sm:$0xff]  }
 0xff5   :  { %7129 = vmatprep.subr.bf16.mxu0 %v10565_v53  ;;  %7170 = vmatprep.subr.bf16.mxu1 %v10568_v55  ;;  %v10640_v53 = vld [vmem:[#allocation17 + $0xf4] ss:$8 sps:$4 sm:$0xff]   ;;  %v10638_v55 = vld [vmem:[#allocation17 + $0xf0] ss:$8 sps:$4 sm:$0xff]  }
 0xff8   :  { %7130 = vmatpush1.bf16.msra.mxu0 %v10563_v60  ;;  %7171 = vmatpush1.bf16.msra.mxu1 %v10566_v26  ;;  %v10643_v60 = vld [vmem:[#allocation17 + $0x104] ss:$8 sps:$4 sm:$0xff]  }
 0xff9   :  { %7131 = vmatprep.subr.bf16.mxu0 %v10571_v38  ;;  %7172 = vmatprep.subr.bf16.mxu1 %v10574_v56 }
 0xffc   :  { %7132 = vmatpush1.bf16.msra.mxu0 %v10569_v58  ;;  %7173 = vmatpush1.bf16.msra.mxu1 %v10572_v0 }
 0xffd   :  { %7133 = vmatprep.subr.bf16.mxu0 %v10577_v57  ;;  %7174 = vmatprep.subr.bf16.mxu1 %v10580_v42 }
0x1000   :  { %7134 = vmatpush1.bf16.msra.mxu0 %v10575_v4  ;;  %7175 = vmatpush1.bf16.msra.mxu1 %v10578_v30 }
0x1001   :  { %7135 = vmatprep.subr.bf16.mxu0 %v10583_v48  ;;  %7176 = vmatprep.subr.bf16.mxu1 %v10586_v2  ;;  %v10689_v2 = vld [vmem:[#allocation23] ss:$8 sps:$4 sm:$0xff]  }
0x1004   :  { %7136 = vmatpush1.bf16.msra.mxu0 %v10581_v25  ;;  %7177 = vmatpush1.bf16.msra.mxu1 %v10584_v45  ;;  %v10691_v25 = vld [vmem:[#allocation23 + $0x4] ss:$8 sps:$4 sm:$0xff]   ;;  %v10694_v45 = vld [vmem:[#allocation23 + $0x14] ss:$8 sps:$4 sm:$0xff]  }
0x1005   :  { %7137 = vmatprep.subr.bf16.mxu0 %v10589_v51  ;;  %7178 = vmatprep.subr.bf16.mxu1 %v10592_v20  ;;  %v10692_v51 = vld [vmem:[#allocation23 + $0x10] ss:$8 sps:$4 sm:$0xff]   ;;  %v10697_v20 = vld [vmem:[#allocation23 + $0x24] ss:$8 sps:$4 sm:$0xff]  }
0x1008   :  { %7138 = vmatpush1.bf16.msra.mxu0 %v10587_v37  ;;  %7179 = vmatpush1.bf16.msra.mxu1 %v10590_v62  ;;  %v10695_v37 = vld [vmem:[#allocation23 + $0x20] ss:$8 sps:$4 sm:$0xff]   ;;  %v10700_v62 = vld [vmem:[#allocation23 + $0x34] ss:$8 sps:$4 sm:$0xff]  }
0x1009   :  { %7671 = vmatprep.subr.bf16.mxu0 %v10595_v7  ;;  %7989 = vmatprep.subr.bf16.mxu1 %v10691_v25  ;;  %v10698_v7 = vld [vmem:[#allocation23 + $0x30] ss:$8 sps:$4 sm:$0xff]  }
0x100a   :  { %v10644_v25 = vld [vmem:[#allocation17 + $0x110] ss:$8 sps:$4 sm:$0xff]  }
0x100b   :  { %7140 = vmatmul.mubr.bf16.vlgmr.msra.gmra.mrb[64].mxu0 %v11872_v1  ;;  %7181 = vmatmul.mubr.bf16.vlgmr.msra.gmra.mrb[80].mxu1 %v11876_v41  ;;  %v10608_v1 = vld [vmem:[#allocation17 + $0x50] ss:$8 sps:$4 sm:$0xff]   ;;  %v10613_v41 = vld [vmem:[#allocation17 + $0x64] ss:$8 sps:$4 sm:$0xff]  }
0x100c   :  { %7672 = vmatpush1.bf16.msra.mxu0 %v10593_v11  ;;  %7990 = vmatpush1.bf16.msra.mxu1 %v10689_v2  ;;  %v10703_v11 = vld [vmem:[#allocation23 + $0x44] ss:$8 sps:$4 sm:$0xff]  }
0x100d   :  { %7673 = vmatprep.subr.bf16.mxu0 %v10598_v12  ;;  %7991 = vmatprep.subr.bf16.mxu1 %v10694_v45  ;;  %v10701_v12 = vld [vmem:[#allocation23 + $0x40] ss:$8 sps:$4 sm:$0xff]   ;;  %v10646_v2 = vld [vmem:[#allocation17 + $0x114] ss:$8 sps:$4 sm:$0xff]  }
0x100e   :  { %v10649_v45 = vld [vmem:[#allocation17 + $0x124] ss:$8 sps:$4 sm:$0xff]  }
0x1010   :  { %7674 = vmatpush1.bf16.msra.mxu0 %v10596_v13  ;;  %7992 = vmatpush1.bf16.msra.mxu1 %v10692_v51  ;;  %v10706_v13 = vld [vmem:[#allocation23 + $0x54] ss:$8 sps:$4 sm:$0xff]  }
0x1011   :  { %7675 = vmatprep.subr.bf16.mxu0 %v10601_v14  ;;  %7993 = vmatprep.subr.bf16.mxu1 %v10697_v20  ;;  %v10704_v14 = vld [vmem:[#allocation23 + $0x50] ss:$8 sps:$4 sm:$0xff]  }
0x1012   :  { %v10647_v51 = vld [vmem:[#allocation17 + $0x120] ss:$8 sps:$4 sm:$0xff]   ;;  %v10652_v20 = vld [vmem:[#allocation17 + $0x134] ss:$8 sps:$4 sm:$0xff]  }
0x1014   :  { %7676 = vmatpush1.bf16.msra.mxu0 %v10599_v15  ;;  %7994 = vmatpush1.bf16.msra.mxu1 %v10695_v37  ;;  %v10709_v15 = vld [vmem:[#allocation23 + $0x64] ss:$8 sps:$4 sm:$0xff]  }
0x1015   :  { %7677 = vmatprep.subr.bf16.mxu0 %v10604_v16  ;;  %7995 = vmatprep.subr.bf16.mxu1 %v10700_v62  ;;  %v10707_v16 = vld [vmem:[#allocation23 + $0x60] ss:$8 sps:$4 sm:$0xff]  }
0x1016   :  { %v10650_v37 = vld [vmem:[#allocation17 + $0x130] ss:$8 sps:$4 sm:$0xff]   ;;  %v10655_v62 = vld [vmem:[#allocation17 + $0x144] ss:$8 sps:$4 sm:$0xff]  }
0x1018   :  { %7678 = vmatpush1.bf16.msra.mxu0 %v10602_v17  ;;  %7996 = vmatpush1.bf16.msra.mxu1 %v10698_v7  ;;  %v10712_v17 = vld [vmem:[#allocation23 + $0x74] ss:$8 sps:$4 sm:$0xff]  }
0x1019   :  { %7679 = vmatprep.subr.bf16.mxu0 %v10607_v18  ;;  %7997 = vmatprep.subr.bf16.mxu1 %v10703_v11  ;;  %v10710_v18 = vld [vmem:[#allocation23 + $0x70] ss:$8 sps:$4 sm:$0xff]  }
0x101a   :  { %v10653_v7 = vld [vmem:[#allocation17 + $0x140] ss:$8 sps:$4 sm:$0xff]   ;;  %v10658_v11 = vld [vmem:[#allocation17 + $0x154] ss:$8 sps:$4 sm:$0xff]  }
0x101c   :  { %7680 = vmatpush1.bf16.msra.mxu0 %v10605_v19  ;;  %7998 = vmatpush1.bf16.msra.mxu1 %v10701_v12  ;;  %v10715_v19 = vld [vmem:[#allocation23 + $0x84] ss:$8 sps:$4 sm:$0xff]  }
0x101d   :  { %7681 = vmatprep.subr.bf16.mxu0 %v10610_v34  ;;  %7999 = vmatprep.subr.bf16.mxu1 %v10706_v13  ;;  %v10713_v34 = vld [vmem:[#allocation23 + $0x80] ss:$8 sps:$4 sm:$0xff]  }
0x101e   :  { %v6226_v61 = vpop.f32.mrb[52].mxu0  ;;  %v6267_v52 = vpop.f32.mrb[68].mxu1  ;;  %v10656_v12 = vld [vmem:[#allocation17 + $0x150] ss:$8 sps:$4 sm:$0xff]   ;;  %v10661_v13 = vld [vmem:[#allocation17 + $0x164] ss:$8 sps:$4 sm:$0xff]  }
0x101f   :  { %v11884_v44 = vadd.f32 %v6267_v52, %v6226_v61  ;;  %v6228_v54 = vpop.f32.mrb[53].mxu0  ;;  %v6269_v24 = vpop.f32.mrb[69].mxu1  ;;  %v10721_v61 = vld [vmem:[#allocation23 + $0xa4] ss:$8 sps:$4 sm:$0xff]   ;;  %v10719_v52 = vld [vmem:[#allocation23 + $0xa0] ss:$8 sps:$4 sm:$0xff]  }
0x1020   :  { %v11886_v59 = vadd.f32 %v6269_v24, %v6228_v54  ;;  %v6230_v3 = vpop.f32.mrb[54].mxu0  ;;  %v6271_v23 = vpop.f32.mrb[70].mxu1  ;;  %7682 = vmatpush1.bf16.msra.mxu0 %v10608_v1  ;;  %8000 = vmatpush1.bf16.msra.mxu1 %v10704_v14  ;;  %v10718_v1 = vld [vmem:[#allocation23 + $0x94] ss:$8 sps:$4 sm:$0xff]   ;;  %v10722_v24 = vld [vmem:[#allocation23 + $0xb0] ss:$8 sps:$4 sm:$0xff]  }
0x1021   :  { %v6231_v28 = vpop.f32.mrb[55].mxu0  ;;  %v6272_v63 = vpop.f32.mrb[71].mxu1  ;;  %7683 = vmatprep.subr.bf16.mxu0 %v10613_v41  ;;  %8001 = vmatprep.subr.bf16.mxu1 %v10709_v15  ;;  %v10716_v41 = vld [vmem:[#allocation23 + $0x90] ss:$8 sps:$4 sm:$0xff]   ;;  %v10724_v54 = vld [vmem:[#allocation23 + $0xb4] ss:$8 sps:$4 sm:$0xff]  }
0x1022   :  { %v10727_v3 = vld [vmem:[#allocation23 + $0xc4] ss:$8 sps:$4 sm:$0xff]   ;;  %v11894_v63 = vld [vmem:[#allocation14] sm:$0xf] }
0x1023   :  { %v11892_v23 = vld [vmem:[#allocation13] sm:$0xf]  ;;  %v10659_v14 = vld [vmem:[#allocation17 + $0x160] ss:$8 sps:$4 sm:$0xff]  }
0x1024   :  { %7684 = vmatpush1.bf16.msra.mxu0 %v10611_v39  ;;  %8002 = vmatpush1.bf16.msra.mxu1 %v10707_v16  ;;  %v10664_v15 = vld [vmem:[#allocation17 + $0x174] ss:$8 sps:$4 sm:$0xff]   ;;  %v10662_v16 = vld [vmem:[#allocation17 + $0x170] ss:$8 sps:$4 sm:$0xff]  }
0x1025   :  { %7685 = vmatprep.subr.bf16.mxu0 %v10616_v27  ;;  %8003 = vmatprep.subr.bf16.mxu1 %v10712_v17  ;;  %v10725_v27 = vld [vmem:[#allocation23 + $0xc0] ss:$8 sps:$4 sm:$0xff]  }
0x1026   :  { %v10667_v17 = vld [vmem:[#allocation17 + $0x184] ss:$8 sps:$4 sm:$0xff]  }
0x1028   :  { %7686 = vmatpush1.bf16.msra.mxu0 %v10614_v29  ;;  %8004 = vmatpush1.bf16.msra.mxu1 %v10710_v18  ;;  %v10665_v18 = vld [vmem:[#allocation17 + $0x180] ss:$8 sps:$4 sm:$0xff]  }
0x1029   :  { %7687 = vmatprep.subr.bf16.mxu0 %v10619_v21  ;;  %8005 = vmatprep.subr.bf16.mxu1 %v10715_v19  ;;  %v10670_v19 = vld [vmem:[#allocation17 + $0x194] ss:$8 sps:$4 sm:$0xff]  }
0x102c   :  { %7688 = vmatpush1.bf16.msra.mxu0 %v10617_v32  ;;  %8006 = vmatpush1.bf16.msra.mxu1 %v10713_v34  ;;  %v7194_v32 = vrot.slane %v11892_v23, %v11652_v31  ;;  %v10668_v34 = vld [vmem:[#allocation17 + $0x190] ss:$8 sps:$4 sm:$0xff]  }
0x102d   :  { %7689 = vmatprep.subr.bf16.mxu0 %v10622_v5  ;;  %8007 = vmatprep.subr.bf16.mxu1 %v10718_v1  ;;  %v10673_v1 = vld [vmem:[#allocation17 + $0x1a4] ss:$8 sps:$4 sm:$0xff]  }
0x1030   :  { %7690 = vmatpush1.bf16.msra.mxu0 %v10620_v35  ;;  %8008 = vmatpush1.bf16.msra.mxu1 %v10716_v41  ;;  %v10671_v41 = vld [vmem:[#allocation17 + $0x1a0] ss:$8 sps:$4 sm:$0xff]  }
0x1031   :  { %7691 = vmatprep.subr.bf16.mxu0 %v10625_v33  ;;  %8009 = vmatprep.subr.bf16.mxu1 %v10721_v61  ;;  %v11900_v33 = vld [vmem:[#allocation16] sm:$0xf] }
0x1032   :  { %v10676_v61 = vld [vmem:[#allocation17 + $0x1b4] ss:$8 sps:$4 sm:$0xff]  }
0x1034   :  { %7692 = vmatpush1.bf16.msra.mxu0 %v10623_v40  ;;  %8010 = vmatpush1.bf16.msra.mxu1 %v10719_v52  ;;  %v10674_v52 = vld [vmem:[#allocation17 + $0x1b0] ss:$8 sps:$4 sm:$0xff]  }
0x1035   :  { %7693 = vmatprep.subr.bf16.mxu0 %v10628_v8  ;;  %8011 = vmatprep.subr.bf16.mxu1 %v10724_v54  ;;  %v7198_v8 = vrot.slane %v11892_v23, %v11616_v36  ;;  %v10679_v54 = vld [vmem:[#allocation17 + $0x1c4] ss:$8 sps:$4 sm:$0xff]  }
0x1038   :  { %7694 = vmatpush1.bf16.msra.mxu0 %v10626_v22  ;;  %8012 = vmatpush1.bf16.msra.mxu1 %v10722_v24  ;;  %v10677_v24 = vld [vmem:[#allocation17 + $0x1c0] ss:$8 sps:$4 sm:$0xff]  }
0x1039   :  { %7695 = vmatprep.subr.bf16.mxu0 %v10631_v46  ;;  %8013 = vmatprep.subr.bf16.mxu1 %v10727_v3  ;;  %v10682_v3 = vld [vmem:[#allocation17 + $0x1d4] ss:$8 sps:$4 sm:$0xff]  }
0x103c   :  { %7696 = vmatpush1.bf16.msra.mxu0 %v10629_v10  ;;  %v7220_v10 = vrot.slane %v11894_v63, %v11652_v31  ;;  %8014 = vmatpush1.bf16.msra.mxu1 %v10725_v27 }
0x103d   :  { %7697 = vmatprep.subr.bf16.mxu0 %v10634_v50 }
0x1040   :  { %7698 = vmatpush1.bf16.msra.mxu0 %v10632_v49 }
0x1041   :  { %7699 = vmatprep.subr.bf16.mxu0 %v10637_v47  ;;  %v7224_v47 = vrot.slane %v11894_v63, %v11616_v36 }
0x1044   :  { %7700 = vmatpush1.bf16.msra.mxu0 %v10635_v43 }
0x1045   :  { %7701 = vmatprep.subr.bf16.mxu0 %v10640_v53 }
0x1048   :  { %7702 = vmatpush1.bf16.msra.mxu0 %v10638_v55  ;;  %v7250_v55 = vrot.slane %v11900_v33, %v11616_v36 }
0x1049   :  { %7712 = vmatprep.subr.bf16.mxu0 %v10643_v60 }
0x105e   :  { %v6308_v26 = vpop.f32.mrb[56].mxu0  ;;  %v6349_v38 = vpop.f32.mrb[72].mxu1 }
0x105f   :  { %v11888_v56 = vadd.f32 %v6349_v38, %v6308_v26  ;;  %v6310_v58 = vpop.f32.mrb[57].mxu0  ;;  %v6351_v0 = vpop.f32.mrb[73].mxu1 }
0x1060   :  { %v11890_v57 = vadd.f32 %v6351_v0, %v6310_v58  ;;  %v6312_v42 = vpop.f32.mrb[58].mxu0  ;;  %v6353_v4 = vpop.f32.mrb[74].mxu1 }
0x1061   :  { %v6313_v30 = vpop.f32.mrb[59].mxu0  ;;  %v6354_v48 = vpop.f32.mrb[75].mxu1 }
0x1062   :  { %v10641_v30 = vld [vmem:[#allocation17 + $0x100] ss:$8 sps:$4 sm:$0xff]  }
0x109e   :  { %v7059_v39 = vpop.f32.mrb[60].mxu0  ;;  %v7100_v28 = vpop.f32.mrb[76].mxu1 }
0x109f   :  { %v7060_v29 = vadd.f32 %v7059_v39, %v11884_v44  ;;  %v7061_v21 = vpop.f32.mrb[61].mxu0  ;;  %v7102_v5 = vpop.f32.mrb[77].mxu1 }
0x10a0   :  { %v7062_v35 = vadd.f32 %v7061_v21, %v11886_v59  ;;  %v7063_v40 = vpop.f32.mrb[62].mxu0  ;;  %v7104_v22 = vpop.f32.mrb[78].mxu1  ;;  %v7246_v59 = vrot.slane %v11900_v33, %v11652_v31 }
0x10a1   :  { %v7101_v46 = vadd.f32 %v7100_v28, %v7060_v29  ;;  %v7064_v44 = vpop.f32.mrb[63].mxu0  ;;  %v7105_v50 = vpop.f32.mrb[79].mxu1  ;;  %v7202_v29 = vrot.slane %v11892_v23, %v11683_v6  ;;  %v10680_v22 = vld [vmem:[#allocation17 + $0x1d0] ss:$8 sps:$4 sm:$0xff]  }
0x10a2   :  { %v7103_v49 = vadd.f32 %v7102_v5, %v7062_v35  ;;  %v7206_v35 = vrot.slane %v11892_v23, %v11686_v9  ;;  %v10685_v50 = vld [vmem:[#allocation17 + $0x1e4] ss:$8 sps:$4 sm:$0xff]   ;;  %v7254_v23 = vrot.slane %v11900_v33, %v11683_v6 }
0x10a3   :  { %v7211_v43 = vadd.f32 %v7194_v32, %v7101_v46 }
0x10a4   :  { %v7212_v53 = vadd.f32 %v7198_v8, %v7103_v49 }
0x10a5   :  { %v7237_v60 = vmul.f32 %v7220_v10, %v7211_v43  ;;  %v7228_v10 = vrot.slane %v11894_v63, %v11683_v6 }
0x10a6   :  { %v7238_v26 = vmul.f32 %v7224_v47, %v7212_v53  ;;  %v7232_v47 = vrot.slane %v11894_v63, %v11686_v9  ;;  %v7258_v53 = vrot.slane %v11900_v33, %v11686_v9  ;;  %v10733_v9 = vld [vmem:[#allocation23 + $0xe4] ss:$8 sps:$4 sm:$0xff]   ;;  %v10731_v33 = vld [vmem:[#allocation23 + $0xe0] ss:$8 sps:$4 sm:$0xff]  }
0x10a7   :  { %v7263_v38 = vadd.f32 %v7246_v59, %v7237_v60  ;;  %v10683_v59 = vld [vmem:[#allocation17 + $0x1e0] ss:$8 sps:$4 sm:$0xff]   ;;  %v10688_v60 = vld [vmem:[#allocation17 + $0x1f4] ss:$8 sps:$4 sm:$0xff]  }
0x10a8   :  { %v7264_v58 = vadd.f32 %v7250_v55, %v7238_v26 }
0x10a9   :  { %v7267_v0 = vmax.f32 %v7263_v38, 0.0 }
0x10aa   :  { %v7268_v42 = vmax.f32 %v7264_v58, 0.0  ;;  %v10686_v58 = vld [vmem:[#allocation17 + $0x1f0] ss:$8 sps:$4 sm:$0xff]  }
0x10ab   :  { %v7271_v48 = vpack.c.bf16 %v7267_v0, %v7267_v0 }
0x10ac   :  { %v7272_v4 = vpack.c.bf16 %v7268_v42, %v7268_v42 }
0x10ae   :  { %7703 = vmatprep.mubr.bf16.mxu0 %v7272_v4 }
0x10af   :  { %7704 = vmatmul.mubr.bf16.vlgmr.msra.gmra.mrb[68].mxu0 %v7271_v48  ;;  %v10728_v48 = vld [vmem:[#allocation23 + $0xd0] ss:$8 sps:$4 sm:$0xff]  }
0x10b0   :  { %7713 = vmatpush1.bf16.msra.mxu0 %v10641_v30  ;;  %v10730_v30 = vld [vmem:[#allocation23 + $0xd4] ss:$8 sps:$4 sm:$0xff]  }
0x10b1   :  { %7714 = vmatprep.subr.bf16.mxu0 %v10646_v2  ;;  %8015 = vmatprep.subr.bf16.mxu1 %v10730_v30  ;;  %v10736_v2 = vld [vmem:[#allocation23 + $0xf4] ss:$8 sps:$4 sm:$0xff]  }
0x10b2   :  { %8016 = vmatpush1.bf16.msra.mxu1 %v10728_v48 }
0x10b3   :  { %8017 = vmatprep.subr.bf16.mxu1 %v10733_v9 }
0x10b4   :  { %7715 = vmatpush1.bf16.msra.mxu0 %v10644_v25  ;;  %v10734_v25 = vld [vmem:[#allocation23 + $0xf0] ss:$8 sps:$4 sm:$0xff]  }
0x10b5   :  { %7716 = vmatprep.subr.bf16.mxu0 %v10649_v45  ;;  %v10737_v45 = vld [vmem:[%s12020_s19 + $0x40] sm:$0xff]  }
0x10b6   :  { %8018 = vmatpush1.bf16.msra.mxu1 %v10731_v33 }
0x10b7   :  { %8019 = vmatprep.subr.bf16.mxu1 %v10736_v2 }
0x10b8   :  { %7717 = vmatpush1.bf16.msra.mxu0 %v10647_v51  ;;  %v7339_v51 = vld [vmem:[#allocation19] sm:$0x3] }
0x10b9   :  { %7718 = vmatprep.subr.bf16.mxu0 %v10652_v20  ;;  %v7753_v20 = vld [vmem:[#allocation20] sm:$0x3] }
0x10ba   :  { %8020 = vmatpush1.bf16.msra.mxu1 %v10734_v25 }
0x10bb   :  { %9235 = vmatprep.subr.bf16.mxu1 %v10737_v45 }
0x10bc   :  { %7719 = vmatpush1.bf16.msra.mxu0 %v10650_v37  ;;  %v7344_v37 = vrot.slane %v7339_v51, %v11652_v31 }
0x10bd   :  { %7720 = vmatprep.subr.bf16.mxu0 %v10655_v62  ;;  %v7767_v62 = vld [vmem:[#allocation22] sm:$0x3] }
0x10c0   :  { %7721 = vmatpush1.bf16.msra.mxu0 %v10653_v7  ;;  %v7348_v7 = vrot.slane %v7339_v51, %v11616_v36 }
0x10c1   :  { %7722 = vmatprep.subr.bf16.mxu0 %v10658_v11  ;;  %v7758_v11 = vrot.slane %v7753_v20, %v11652_v31 }
0x10c4   :  { %7723 = vmatpush1.bf16.msra.mxu0 %v10656_v12 }
0x10c5   :  { %7724 = vmatprep.subr.bf16.mxu0 %v10661_v13  ;;  %v7762_v13 = vrot.slane %v7753_v20, %v11616_v36 }
0x10c8   :  { %7725 = vmatpush1.bf16.msra.mxu0 %v10659_v14 }
0x10c9   :  { %7726 = vmatprep.subr.bf16.mxu0 %v10664_v15  ;;  %v7772_v15 = vrot.slane %v7767_v62, %v11652_v31 }
0x10cc   :  { %7727 = vmatpush1.bf16.msra.mxu0 %v10662_v16 }
0x10cd   :  { %7728 = vmatprep.subr.bf16.mxu0 %v10667_v17 }
0x10d0   :  { %7729 = vmatpush1.bf16.msra.mxu0 %v10665_v18  ;;  %v7776_v18 = vrot.slane %v7767_v62, %v11616_v36 }
0x10d1   :  { %7730 = vmatprep.subr.bf16.mxu0 %v10670_v19 }
0x10d4   :  { %7731 = vmatpush1.bf16.msra.mxu0 %v10668_v34 }
0x10d5   :  { %7732 = vmatprep.subr.bf16.mxu0 %v10673_v1 }
0x10d8   :  { %7733 = vmatpush1.bf16.msra.mxu0 %v10671_v41 }
0x10d9   :  { %7734 = vmatprep.subr.bf16.mxu0 %v10676_v61 }
0x10dc   :  { %7735 = vmatpush1.bf16.msra.mxu0 %v10674_v52 }
0x10dd   :  { %7736 = vmatprep.subr.bf16.mxu0 %v10679_v54 }
0x10de   :  { %v7141_v39 = vpop.f32.mrb[64].mxu0  ;;  %v7182_v28 = vpop.f32.mrb[80].mxu1 }
0x10df   :  { %v7142_v27 = vadd.f32 %v7141_v39, %v11888_v56  ;;  %v7143_v21 = vpop.f32.mrb[65].mxu0  ;;  %v7184_v32 = vpop.f32.mrb[81].mxu1  ;;  %v10738_v39 = vld [vmem:[%s12020_s19] sm:$0xff]  }
0x10e0   :  { %v7144_v5 = vadd.f32 %v7143_v21, %v11890_v57  ;;  %v7145_v40 = vpop.f32.mrb[66].mxu0  ;;  %v7186_v8 = vpop.f32.mrb[82].mxu1  ;;  %7737 = vmatpush1.bf16.msra.mxu0 %v10677_v24  ;;  %v10741_v21 = vld [vmem:[%s12020_s19 + $0x50] sm:$0xff]  }
0x10e1   :  { %v7183_v46 = vadd.f32 %v7182_v28, %v7142_v27  ;;  %v7146_v44 = vpop.f32.mrb[67].mxu0  ;;  %v7187_v56 = vpop.f32.mrb[83].mxu1  ;;  %7738 = vmatprep.subr.bf16.mxu0 %v10682_v3  ;;  %v10739_v27 = vld [vmem:[%s12020_s19 + $0x48] sm:$0xff]   ;;  %v10745_v40 = vld [vmem:[%s12020_s19 + $0x60] sm:$0xff]  }
0x10e2   :  { %v7185_v49 = vadd.f32 %v7184_v32, %v7144_v5  ;;  %v10742_v32 = vld [vmem:[%s12020_s19 + $0x10] sm:$0xff]   ;;  %v10743_v5 = vld [vmem:[%s12020_s19 + $0x58] sm:$0xff]   ;;  %v10746_v8 = vld [vmem:[%s12020_s19 + $0x20] sm:$0xff]  }
0x10e3   :  { %v7213_v57 = vadd.f32 %v7202_v29, %v7183_v46  ;;  %v10740_v29 = vld [vmem:[%s12020_s19 + $0x8] sm:$0xff]   ;;  %v10750_v44 = vld [vmem:[%s12020_s19 + $0x30] sm:$0xff]   ;;  %v10751_v56 = vld [vmem:[%s12020_s19 + $0x78] sm:$0xff]  }
0x10e4   :  { %v7214_v43 = vadd.f32 %v7206_v35, %v7185_v49  ;;  %7739 = vmatpush1.bf16.msra.mxu0 %v10680_v22  ;;  %v10744_v35 = vld [vmem:[%s12020_s19 + $0x18] sm:$0xff]   ;;  %v10747_v22 = vld [vmem:[%s12020_s19 + $0x68] sm:$0xff]   ;;  %v7817_v49 = vld [vmem:[#allocation25] sm:$0x3] }
0x10e5   :  { %v7239_v55 = vmul.f32 %v7228_v10, %v7213_v57  ;;  %7740 = vmatprep.subr.bf16.mxu0 %v10685_v50  ;;  %v10748_v46 = vld [vmem:[%s12020_s19 + $0x28] sm:$0xff]   ;;  %v10749_v10 = vld [vmem:[%s12020_s19 + $0x70] sm:$0xff]   ;;  %v10752_v50 = vld [vmem:[%s12020_s19 + $0x38] sm:$0xff]   ;;  %v7822_v57 = vrot.slane %v7817_v49, %v11652_v31 }
0x10e6   :  { %v7240_v26 = vmul.f32 %v7232_v47, %v7214_v43  ;;  %v8030_v47 = vld [vmem:[#allocation26] sm:$0x3]  ;;  %v7826_v43 = vrot.slane %v7817_v49, %v11616_v36 }
0x10e7   :  { %v7265_v38 = vadd.f32 %v7254_v23, %v7239_v55  ;;  %v8044_v23 = vld [vmem:[#allocation28] sm:$0x3]  ;;  %v8039_v55 = vrot.slane %v8030_v47, %v11616_v36 }
0x10e8   :  { %7741 = vmatpush1.bf16.msra.mxu0 %v10683_v59  ;;  %v7266_v0 = vadd.f32 %v7258_v53, %v7240_v26  ;;  %v8035_v59 = vrot.slane %v8030_v47, %v11652_v31  ;;  %v8049_v26 = vrot.slane %v8044_v23, %v11652_v31  ;;  %v9162_v31 = vld [vmem:[%s12021_s20] ss:$0 sm:$0xff] }
0x10e9   :  { %v7269_v42 = vmax.f32 %v7265_v38, 0.0  ;;  %7742 = vmatprep.subr.bf16.mxu0 %v10688_v60 }
0x10ea   :  { %v7270_v63 = vmax.f32 %v7266_v0, 0.0  ;;  %v8053_v0 = vrot.slane %v8044_v23, %v11616_v36 }
0x10eb   :  { %v7273_v6 = vpack.c.bf16 %v7269_v42, %v7269_v42 }
0x10ec   :  { %7743 = vmatpush1.bf16.msra.mxu0 %v10686_v58  ;;  %v7274_v4 = vpack.c.bf16 %v7270_v63, %v7270_v63 }
0x10ee   :  { %7744 = vmatprep.mubr.bf16.mxu0 %v7274_v4 }
0x10ef   :  { %7745 = vmatmul.mubr.bf16.vlgmr.msra.gmra.mrb[68].mxu0 %v7273_v6 }
0x11c2   :  { %v7746_v12 = vpop.f32.mrb[68].mxu0 }
0x11c3   :  { %v9377_v14 = vadd.f32 %v7746_v12, %v7344_v37  ;;  %v7748_v16 = vpop.f32.mrb[69].mxu0 }
0x11c4   :  { %v9378_v17 = vadd.f32 %v7748_v16, %v7348_v7  ;;  %v7750_v19 = vpop.f32.mrb[70].mxu0 }
0x11c5   :  { %v7765_v34 = vmul.f32 %v9377_v14, %v7758_v11  ;;  %v7751_v1 = vpop.f32.mrb[71].mxu0 }
0x11c6   :  { %v7766_v41 = vmul.f32 %v9378_v17, %v7762_v13 }
0x11c7   :  { %v7779_v61 = vadd.f32 %v7772_v15, %v7765_v34 }
0x11c8   :  { %v7780_v52 = vadd.f32 %v7776_v18, %v7766_v41 }
0x11c9   :  { %v7781_v54 = vmax.f32 %v7779_v61, 0.0 }
0x11ca   :  { %v7782_v24 = vmax.f32 %v7780_v52, 0.0 }
0x11cb   :  { %v7783_v28 = vpack.c.bf16 %v7781_v54, %v7781_v54 }
0x11cc   :  { %v7784_v3 = vpack.c.bf16 %v7782_v24, %v7782_v24 }
0x11ce   :  { %8021 = vmatprep.mubr.bf16.mxu1 %v7784_v3 }
0x11cf   :  { %8022 = vmatmul.mubr.bf16.vlgmr.msra.gmra.mrb[84].mxu1 %v7783_v28 }
0x11d0   :  { %9236 = vmatpush3.bf16.msra.mxu1 %v10738_v39 }
0x11d1   :  { %9237 = vmatprep.subr.bf16.mxu1 %v10739_v27 }
0x11d4   :  { %9238 = vmatpush3.bf16.msra.mxu1 %v10740_v29 }
0x11d5   :  { %9239 = vmatprep.subr.bf16.mxu1 %v10741_v21 }
0x11d8   :  { %9240 = vmatpush3.bf16.msra.mxu1 %v10742_v32 }
0x11d9   :  { %9241 = vmatprep.subr.bf16.mxu1 %v10743_v5 }
0x11dc   :  { %9242 = vmatpush3.bf16.msra.mxu1 %v10744_v35 }
0x11dd   :  { %9243 = vmatprep.subr.bf16.mxu1 %v10745_v40 }
0x11e0   :  { %9244 = vmatpush3.bf16.msra.mxu1 %v10746_v8 }
0x11e1   :  { %9245 = vmatprep.subr.bf16.mxu1 %v10747_v22 }
0x11e4   :  { %9246 = vmatpush3.bf16.msra.mxu1 %v10748_v46 }
0x11e5   :  { %9247 = vmatprep.subr.bf16.mxu1 %v10749_v10 }
0x11e8   :  { %9248 = vmatpush3.bf16.msra.mxu1 %v10750_v44 }
0x11e9   :  { %9249 = vmatprep.subr.bf16.mxu1 %v10751_v56 }
0x11ec   :  { %9250 = vmatpush3.bf16.msra.mxu1 %v10752_v50 }
0x12a2   :  { %v8023_v53 = vpop.f32.mrb[84].mxu1 }
0x12a3   :  { %v8024_v60 = vadd.f32 %v8023_v53, %v7822_v57  ;;  %v8025_v38 = vpop.f32.mrb[85].mxu1 }
0x12a4   :  { %v8026_v58 = vadd.f32 %v8025_v38, %v7826_v43  ;;  %v8027_v42 = vpop.f32.mrb[86].mxu1 }
0x12a5   :  { %v8042_v63 = vmul.f32 %v8035_v59, %v8024_v60  ;;  %v8028_v4 = vpop.f32.mrb[87].mxu1 }
0x12a6   :  { %v8043_v6 = vmul.f32 %v8039_v55, %v8026_v58 }
0x12a7   :  { %v8056_v30 = vadd.f32 %v8049_v26, %v8042_v63 }
0x12a8   :  { %v8057_v48 = vadd.f32 %v8053_v0, %v8043_v6 }
0x12a9   :  { %v8058_v9 = vmax.f32 %v8056_v30, 0.0 }
0x12aa   :  { %v8059_v33 = vmax.f32 %v8057_v48, 0.0 }
0x12ab   :  { %v8060_v25 = vpack.c.bf16 %v8058_v9, %v8058_v9 }
0x12ac   :  { %v8061_v2 = vpack.c.bf16 %v8059_v33, %v8059_v33 }
0x12ae   :  { %8229 = vmatprep.mubr.bf16.mxu1 %v8061_v2 }
0x12af   :  { %8230 = vmatmul.mubr.bf16.vlgmr.msra.gmra.mrb[88].mxu1 %v8060_v25 }
0x1382   :  { %v9251_v45 = vpop.f32.mrb[88].mxu1 }
0x1383   :  { %v9252_v51 = vpop.f32.mrb[89].mxu1 }
0x1384   :  { %v9253_v36 = vadd.f32 %v9252_v51, %v9251_v45  ;;  %v9254_v20 = vpop.f32.mrb[90].mxu1 }
0x1385   :  { %v9255_v37 = vpop.f32.mrb[91].mxu1 }
0x1386   :  { %v8232_v62 = vadd.f32 %v9253_v36, %v9162_v31 }
0x1388   :  { %8237 = vst [vmem:[#allocation29] sm:$0x3] %v8232_v62 }
0x1389   :  { %11176 = shalt.err (!%p11173_p0)
}
0x138a   :  { %s11177_s20 = scalar_lea.hbm %s12022_s21, 32 }
0x138b   :  { %p11178_p1 = scmp.ne.s32.totalorder %s12022_s21, %s11177_s20  ;;  %p11181_p2 = scmp.lt.u32.totalorder %s11177_s20, %s12022_s21 }
0x138d   :  { %p11183_p3 = pnand %p11181_p2, %p11178_p1 }
0x138f   :  { %11186 = shalt.err (!%p11183_p3)
}
0x1390   :  { %8247 = dma.vmem_to_hbm [thread:$0]  %s8245_s18, 32, %s12022_s21, [#allocation4]  }
0x1391   :  { %11205 = dma.done.wait [#allocation4], 32  }
0x1392   :  { %11206 = vsyncadd [#allocation4], 4294967264 }
0x1393   :  { %8251 = vsyncpa [#allocation3], 1 }
0x1394   :  { %8252 = vsyncpa [#allocation6], 1 }
0x1395   :  { %8253 = vsyncpa [#allocation9], 1 }
0x1396   :  { %8254 = vsyncpa [#allocation12], 1 }
0x1397   :  { %8255 = vsyncpa [#allocation15], 1 }
0x1398   :  { %8256 = vsyncpa [#allocation18], 1 }
0x1399   :  { %8257 = vsyncpa [#allocation21], 1 }
0x139a   :  { %8258 = vsyncpa [#allocation24], 1 }
0x139b   :  { %8259 = vsyncpa [#allocation27], 1 }
0x139c   :  { %8260 = vsyncpa [#allocation4], 1 }

</bundles_post_ra>
